<compile_context>
chip_gen: v7x
topology: tpu7x:2x2x1
jax: 0.10.0
libtpu: 0.0.40
codegen_flags: <defaults>
</compile_context>

<pallas_src>
import math
from functools import partial

import jax
import jax.numpy as jnp
from jax import lax
from jax.experimental import pallas as pl
from jax.experimental.pallas import tpu as pltpu


# ----------------------------- in-kernel helpers -----------------------------

def _layernorm(v, w, b, eps=1e-5):
    mu = jnp.mean(v, axis=-1, keepdims=True)
    var = jnp.mean((v - mu) ** 2, axis=-1, keepdims=True)
    return (v - mu) * lax.rsqrt(var + eps) * w + b


def _gelu_exact(v):
    # matches torch.nn.functional.gelu (erf form)
    return 0.5 * v * (1.0 + lax.erf(v / jnp.sqrt(jnp.float32(2.0))))


def _split_heads(x, n_head):
    # (T, C) -> (H, T, dh): lane-layout-aware permute so attention is head-batched
    t, c = x.shape
    x = x.reshape(t, n_head, c // n_head)
    return pltpu.einshape("thd->htd", x)


def _merge_heads(x):
    # (H, T, dh) -> (T, C)
    h, t, d = x.shape
    return pltpu.einshape("htd->thd", x).reshape(t, h * d)


# ------------------------- kernel 1: prep (GN + conv_input + K/V) ------------

def _prep_kernel(
    x_ref, gns_ref, gnb_ref,
    ci_w_ref, ci_b_ref, ln1_w_ref, ln1_b_ref, wk_ref, wv_ref,
    x1_ref, k_ref, v_ref,
    *, n_head: int,
):
    bf16, f32 = jnp.bfloat16, jnp.float32

    xt = x_ref[0].T                                   # (BT, C): fused NCHW -> token transpose
    xn = xt * gns_ref[0] + gnb_ref[0]                 # GroupNorm apply (f32 stats from wrapper)

    # conv_input: 1x1 conv == per-token matmul (bf16 inputs, f32 accumulation)
    x1 = jnp.dot(xn.astype(bf16), ci_w_ref[...],
                 preferred_element_type=f32) + ci_b_ref[...]
    x1_ref[0] = x1                                    # f32 residual carrier

    # LayerNorm_1 + self-attention K/V projections, written head-major in bf16
    h1 = _layernorm(x1, ln1_w_ref[...], ln1_b_ref[...]).astype(bf16)
    k = jnp.dot(h1, wk_ref[...], preferred_element_type=f32)
    v = jnp.dot(h1, wv_ref[...], preferred_element_type=f32)
    k_ref[0] = _split_heads(k.astype(bf16), n_head)
    v_ref[0] = _split_heads(v.astype(bf16), n_head)


# --------- kernel 2: flash self-attn + cross-attn + GeGLU + conv_output -------

def _main_kernel(
    x1_ref, k_ref, v_ref, x0_ref, ctx_ref,
    ln1_w_ref, ln1_b_ref, a1q_w_ref, a1o_w_ref, a1o_b_ref,
    ln2_w_ref, ln2_b_ref, a2q_w_ref, a2k_w_ref, a2v_w_ref, a2o_w_ref, a2o_b_ref,
    ln3_w_ref, ln3_b_ref, g1v_w_ref, g1v_b_ref, g1g_w_ref, g1g_b_ref,
    g2_w_ref, g2_b_ref, co_w_ref, co_b_ref,
    o_ref,
    q_sc, m_sc, l_sc, acc_sc,
    *, n_head: int,
):
    bf16, f32 = jnp.bfloat16, jnp.float32
    c = x1_ref.shape[2]
    dh = c // n_head
    scale = 1.0 / math.sqrt(dh)
    kv = pl.program_id(2)

    # ---- once per query tile: Q projection (softmax scale folded into Q) + init ----
    @pl.when(kv == 0)
    def _init():
        h1 = _layernorm(x1_ref[0], ln1_w_ref[...], ln1_b_ref[...])
        q = jnp.dot(h1.astype(bf16), a1q_w_ref[...], preferred_element_type=f32) * scale
        q_sc[...] = _split_heads(q.astype(bf16), n_head)
        m_sc[...] = jnp.full_like(m_sc, -jnp.inf)
        l_sc[...] = jnp.zeros_like(l_sc)
        acc_sc[...] = jnp.zeros_like(acc_sc)

    # ---- flash (online-softmax) self-attention step over this K/V tile -------------
    k = k_ref[0]                                      # (H, BTkv, dh) bf16, head-major
    v = v_ref[0]
    s = jnp.einsum("hqd,hkd->hqk", q_sc[...], k, preferred_element_type=f32)
    m_new = jnp.maximum(m_sc[...], jnp.max(s, axis=-1, keepdims=True))
    alpha = jnp.exp(m_sc[...] - m_new)
    p = jnp.exp(s - m_new)
    l_sc[...] = alpha * l_sc[...] + jnp.sum(p, axis=-1, keepdims=True)
    acc_sc[...] = alpha * acc_sc[...] + jnp.einsum(
        "hqk,hkd->hqd", p.astype(bf16), v, preferred_element_type=f32)
    m_sc[...] = m_new

    # ---- last K/V tile: finish attention, cross-attn, GeGLU, conv_output -----------
    @pl.when(kv == pl.num_programs(2) - 1)
    def _finalize():
        x1 = x1_ref[0]                                # (BT, C) f32 -- residue_short #1
        o1 = acc_sc[...] * pl.reciprocal(l_sc[...], approx=True)
        a1 = jnp.dot(_merge_heads(o1).astype(bf16), a1o_w_ref[...],
                     preferred_element_type=f32) + a1o_b_ref[...]
        x = a1 + x1                                   # residual add in f32

        # ---- cross-attention (context is small: plain softmax, head-batched) ----
        h2 = _layernorm(x, ln2_w_ref[...], ln2_b_ref[...])
        q2 = jnp.dot(h2.astype(bf16), a2q_w_ref[...], preferred_element_type=f32) * scale
        ctx = ctx_ref[0]                              # (S_ctx, D_ctx) bf16
        k2 = jnp.dot(ctx, a2k_w_ref[...], preferred_element_type=f32)
        v2 = jnp.dot(ctx, a2v_w_ref[...], preferred_element_type=f32)
        q2h = _split_heads(q2.astype(bf16), n_head)
        k2h = _split_heads(k2.astype(bf16), n_head)
        v2h = _split_heads(v2.astype(bf16), n_head)
        s2 = jnp.einsum("hqd,hkd->hqk", q2h, k2h, preferred_element_type=f32)
        s2 = s2 - jnp.max(s2, axis=-1, keepdims=True)
        p2 = jnp.exp(s2)
        p2 = p2 * pl.reciprocal(jnp.sum(p2, axis=-1, keepdims=True), approx=True)
        o2 = jnp.einsum("hqk,hkd->hqd", p2.astype(bf16), v2h, preferred_element_type=f32)
        a2 = jnp.dot(_merge_heads(o2).astype(bf16), a2o_w_ref[...],
                     preferred_element_type=f32) + a2o_b_ref[...]
        x = a2 + x

        # ---- GeGLU: value/gate halves as separate matmuls (no (BT, 8C) intermediate) ----
        h3 = _layernorm(x, ln3_w_ref[...], ln3_b_ref[...]).astype(bf16)
        val = jnp.dot(h3, g1v_w_ref[...], preferred_element_type=f32) + g1v_b_ref[...]
        gate = jnp.dot(h3, g1g_w_ref[...], preferred_element_type=f32) + g1g_b_ref[...]
        g = val * _gelu_exact(gate)
        ff = jnp.dot(g.astype(bf16), g2_w_ref[...], preferred_element_type=f32) + g2_b_ref[...]
        x = ff + x

        # ---- conv_output (1x1) + token->NCHW transpose + long residual, in-kernel ----
        y = jnp.dot(x.astype(bf16), co_w_ref[...], preferred_element_type=f32) + co_b_ref[...]
        o_ref[0] = (y.T + x0_ref[0]).astype(o_ref.dtype)


# --------------------------------- wrapper ------------------------------------

def _nbytes(shape, dtype):
    size = 1
    for s in shape:
        size *= s
    return size * jnp.dtype(dtype).itemsize


def _mosaic_params(dim_sem, vmem_estimate):
    # Explicit scoped-VMEM budget sized from the chosen tiles (review item); only set it
    # when the estimate exceeds the conservative cross-generation default so tiny test
    # shapes remain maximally portable.
    limit = None
    if vmem_estimate > 14 * 1024 * 1024:
        limit = int(min(max(vmem_estimate * 3 // 2, 32 * 1024 * 1024), 96 * 1024 * 1024))
    return pltpu.CompilerParams(dimension_semantics=dim_sem, vmem_limit_bytes=limit)


def unet_attention_block(x_nchw, context, params, n_head, n_groups=32, block_hw=128):
    n, c, hgt, wid = x_nchw.shape
    hw = hgt * wid
    dh = c // n_head
    s_ctx, d_ctx = context.shape[1], context.shape[2]
    f32, bf16 = jnp.float32, jnp.bfloat16

    # HW tile: a multiple of 128 (lane-dense NCHW blocks) or the whole image for toy shapes.
    if hw % block_hw == 0 and block_hw % 128 == 0:
        bt = block_hw
    else:
        bt = hw
    n_t = hw // bt

    x_cm = x_nchw.reshape(n, c, hw)                  # channel-major view (free, no transpose)

    # ---- GroupNorm statistics: tiny per-(batch, group) f32 reduction, centered variance ----
    # TODO(synk): at production shapes fold this pre-pass into a small Pallas stats kernel to
    # avoid the extra HBM read of x; its output is only a (N, C) scale/shift either way.
    gsz = c // n_groups
    xg = x_cm.reshape(n, n_groups, gsz * hw)
    g_mean = jnp.mean(xg, axis=-1)
    g_var = jnp.mean(jnp.square(xg - g_mean[..., None]), axis=-1)
    g_rstd = lax.rsqrt(g_var + 1e-6)
    mean_c = jnp.repeat(g_mean, gsz, axis=1)         # (N, C)
    rstd_c = jnp.repeat(g_rstd, gsz, axis=1)
    gamma, beta = params["gn_w"], params["gn_b"]     # (1, C)
    gn_scale = (rstd_c * gamma)[:, None, :]          # (N, 1, C)
    gn_shift = (beta - mean_c * rstd_c * gamma)[:, None, :]

    # ------------------- kernel 1: prep (GN apply + conv_input + LN1 + K/V) -------------------
    prep_weights = [
        params["ci_w"].astype(bf16), params["ci_b"],
        params["ln1_w"], params["ln1_b"],
        params["a1_k_w"].astype(bf16), params["a1_v_w"].astype(bf16),
    ]
    prep_in_specs = [
        pl.BlockSpec((1, c, bt), lambda b, t: (b, 0, t)),      # x, channel-major tile
        pl.BlockSpec((1, 1, c), lambda b, t: (b, 0, 0)),       # GN scale
        pl.BlockSpec((1, 1, c), lambda b, t: (b, 0, 0)),       # GN shift
    ] + [pl.BlockSpec(wt.shape, lambda b, t: (0, 0)) for wt in prep_weights]

    prep_est = (2 * (_nbytes((c, bt), f32) + _nbytes((bt, c), f32)
                     + 2 * _nbytes((n_head, bt, dh), bf16))
                + sum(_nbytes(wt.shape, wt.dtype) for wt in prep_weights)
                + 6 * _nbytes((bt, c), f32))

    x1, k_self, v_self = pl.pallas_call(
        partial(_prep_kernel, n_head=n_head),
        grid=(n, n_t),
        in_specs=prep_in_specs,
        out_specs=[
            pl.BlockSpec((1, bt, c), lambda b, t: (b, t, 0)),
            pl.BlockSpec((1, n_head, bt, dh), lambda b, t: (b, 0, t, 0)),
            pl.BlockSpec((1, n_head, bt, dh), lambda b, t: (b, 0, t, 0)),
        ],
        out_shape=[
            jax.ShapeDtypeStruct((n, hw, c), f32),               # x1: f32 residual carrier
            jax.ShapeDtypeStruct((n, n_head, hw, dh), bf16),     # K, head-major
            jax.ShapeDtypeStruct((n, n_head, hw, dh), bf16),     # V, head-major
        ],
        compiler_params=_mosaic_params(("parallel", "parallel"), prep_est),
    )(x_cm, gn_scale, gn_shift, *prep_weights)

    # ------------- kernel 2: flash self-attn + cross-attn + GeGLU + conv_output ---------------
    main_weights = [
        params["ln1_w"], params["ln1_b"],
        params["a1_q_w"].astype(bf16),
        params["a1_out_w"].astype(bf16), params["a1_out_b"],
        params["ln2_w"], params["ln2_b"],
        params["a2_q_w"].astype(bf16), params["a2_k_w"].astype(bf16),
        params["a2_v_w"].astype(bf16),
        params["a2_out_w"].astype(bf16), params["a2_out_b"],
        params["ln3_w"], params["ln3_b"],
        params["g1v_w"].astype(bf16), params["g1v_b"],
        params["g1g_w"].astype(bf16), params["g1g_b"],
        params["g2_w"].astype(bf16), params["g2_b"],
        params["co_w"].astype(bf16), params["co_b"],
    ]
    main_in_specs = [
        pl.BlockSpec((1, bt, c), lambda b, q, kv: (b, q, 0)),               # x1 (resident over kv)
        pl.BlockSpec((1, n_head, bt, dh), lambda b, q, kv: (b, 0, kv, 0)),  # K tile
        pl.BlockSpec((1, n_head, bt, dh), lambda b, q, kv: (b, 0, kv, 0)),  # V tile
        pl.BlockSpec((1, c, bt), lambda b, q, kv: (b, 0, q)),               # x0 (long residual)
        pl.BlockSpec((1, s_ctx, d_ctx), lambda b, q, kv: (b, 0, 0)),        # context
    ] + [pl.BlockSpec(wt.shape, lambda b, q, kv: (0, 0)) for wt in main_weights]

    main_est = (2 * (_nbytes((bt, c), f32) + 2 * _nbytes((n_head, bt, dh), bf16)
                     + 2 * _nbytes((c, bt), f32) + _nbytes((s_ctx, d_ctx), bf16))
                + sum(_nbytes(wt.shape, wt.dtype) for wt in main_weights)
                + 2 * _nbytes((n_head, bt, 128), f32)       # m/l scratch (lane padded)
                + 2 * _nbytes((n_head, bt, dh), f32)        # q/acc scratch
                + 2 * _nbytes((n_head, bt, bt), f32)        # score-tile temporaries
                + 3 * _nbytes((bt, 4 * c), f32))            # GeGLU temporaries

    out_cm = pl.pallas_call(
        partial(_main_kernel, n_head=n_head),
        grid=(n, n_t, n_t),
        in_specs=main_in_specs,
        out_specs=pl.BlockSpec((1, c, bt), lambda b, q, kv: (b, 0, q)),
        out_shape=jax.ShapeDtypeStruct((n, c, hw), x_nchw.dtype),
        scratch_shapes=[
            pltpu.VMEM((n_head, bt, dh), bf16),   # Q (pre-scaled), head-major
            pltpu.VMEM((n_head, bt, 1), f32),     # online-softmax running max
            pltpu.VMEM((n_head, bt, 1), f32),     # online-softmax running sum
            pltpu.VMEM((n_head, bt, dh), f32),    # output accumulator
        ],
        compiler_params=_mosaic_params(("parallel", "parallel", "arbitrary"), main_est),
    )(x1, k_self, v_self, x_cm, context.astype(bf16), *main_weights)

    return out_cm.reshape(n, c, hgt, wid)


# ------------------------- pure-JAX f32 reference (check) ----------------------

def _ref_mha(q, k, v, n_head):
    n, sq, c = q.shape
    dh = c // n_head
    qh = q.reshape(n, sq, n_head, dh).transpose(0, 2, 1, 3)
    kh = k.reshape(n, -1, n_head, dh).transpose(0, 2, 1, 3)
    vh = v.reshape(n, -1, n_head, dh).transpose(0, 2, 1, 3)
    s = jnp.einsum("nhqd,nhkd->nhqk", qh, kh) / math.sqrt(dh)
    p = jax.nn.softmax(s, axis=-1)
    o = jnp.einsum("nhqk,nhkd->nhqd", p, vh)
    return o.transpose(0, 2, 1, 3).reshape(n, sq, c)


def reference(x_nchw, context, params, n_head, n_groups=32):
    n, c, hgt, wid = x_nchw.shape
    hw = hgt * wid
    x0 = jnp.transpose(x_nchw.reshape(n, c, hw), (0, 2, 1))
    gsz = c // n_groups

    xg = x0.reshape(n, hw, n_groups, gsz)
    mean = xg.mean(axis=(1, 3), keepdims=True)
    var = ((xg - mean) ** 2).mean(axis=(1, 3), keepdims=True)
    x = ((xg - mean) * lax.rsqrt(var + 1e-6)).reshape(n, hw, c)
    x = x * params["gn_w"] + params["gn_b"]
    x = x @ params["ci_w"] + params["ci_b"]

    def ln(v, wt, b):
        mu = v.mean(-1, keepdims=True)
        va = ((v - mu) ** 2).mean(-1, keepdims=True)
        return (v - mu) * lax.rsqrt(va + 1e-5) * wt + b

    res = x
    hd = ln(x, params["ln1_w"], params["ln1_b"])
    q, k, v = hd @ params["a1_q_w"], hd @ params["a1_k_w"], hd @ params["a1_v_w"]
    x = _ref_mha(q, k, v, n_head) @ params["a1_out_w"] + params["a1_out_b"] + res

    res = x
    hd = ln(x, params["ln2_w"], params["ln2_b"])
    q = hd @ params["a2_q_w"]
    k, v = context @ params["a2_k_w"], context @ params["a2_v_w"]
    x = _ref_mha(q, k, v, n_head) @ params["a2_out_w"] + params["a2_out_b"] + res

    res = x
    hd = ln(x, params["ln3_w"], params["ln3_b"])
    val = hd @ params["g1v_w"] + params["g1v_b"]
    gate = hd @ params["g1g_w"] + params["g1g_b"]
    gl = 0.5 * gate * (1.0 + lax.erf(gate / jnp.sqrt(jnp.float32(2.0))))
    x = (val * gl) @ params["g2_w"] + params["g2_b"] + res

    out = x @ params["co_w"] + params["co_b"] + x0
    return jnp.transpose(out, (0, 2, 1)).reshape(n, c, hgt, wid)


# ---------------------------------- params ------------------------------------

def init_params(key, c, d_ctx, n_groups=32):
    ks = list(jax.random.split(key, 28))

    def nrm(k, shape, scale=0.05):
        return scale * jax.random.normal(k, shape, jnp.float32)

    return dict(
        gn_w=1.0 + nrm(ks[0], (1, c)), gn_b=nrm(ks[1], (1, c)),
        ci_w=nrm(ks[2], (c, c)), ci_b=nrm(ks[3], (1, c)),
        ln1_w=1.0 + nrm(ks[4], (1, c)), ln1_b=nrm(ks[5], (1, c)),
        a1_q_w=nrm(ks[6], (c, c)), a1_k_w=nrm(ks[7], (c, c)), a1_v_w=nrm(ks[8], (c, c)),
        a1_out_w=nrm(ks[9], (c, c)), a1_out_b=nrm(ks[10], (1, c)),
        ln2_w=1.0 + nrm(ks[11], (1, c)), ln2_b=nrm(ks[12], (1, c)),
        a2_q_w=nrm(ks[13], (c, c)), a2_k_w=nrm(ks[14], (d_ctx, c)), a2_v_w=nrm(ks[15], (d_ctx, c)),
        a2_out_w=nrm(ks[16], (c, c)), a2_out_b=nrm(ks[17], (1, c)),
        ln3_w=1.0 + nrm(ks[18], (1, c)), ln3_b=nrm(ks[19], (1, c)),
        g1v_w=nrm(ks[20], (c, 4 * c)), g1v_b=nrm(ks[21], (1, 4 * c)),
        g1g_w=nrm(ks[22], (c, 4 * c)), g1g_b=nrm(ks[23], (1, 4 * c)),
        g2_w=nrm(ks[24], (4 * c, c)), g2_b=nrm(ks[25], (1, c)),
        co_w=nrm(ks[26], (c, c)), co_b=nrm(ks[27], (1, c)),
    )


# ----------------------------------- main --------------------------------------

if __name__ == "__main__":
    # Small shapes consistent with the module: channels = n_head * n_embd must be a
    # multiple of 32 for GroupNorm(32, channels).  HW = 256 gives 2 query tiles x
    # 2 key/value tiles of 128, exercising the tiled flash-attention grid.
    n_head, n_embd = 4, 32
    channels = n_head * n_embd            # 128
    d_ctx, s_ctx = 64, 16
    n, h, w = 2, 16, 16                   # HW = 256

    key = jax.random.PRNGKey(0)
    kx, kc, kp = jax.random.split(key, 3)
    x = jax.random.normal(kx, (n, channels, h, w), jnp.float32)       # NCHW
    context = jax.random.normal(kc, (n, s_ctx, d_ctx), jnp.float32)   # (N, S_ctx, D_ctx)
    params = init_params(kp, channels, d_ctx)

    out = unet_attention_block(x, context, params, n_head)
    out = jax.block_until_ready(out)
    assert out.shape == (n, channels, h, w)
    assert bool(jnp.all(jnp.isfinite(out)))

    ref = reference(x, context, params, n_head)
    max_diff = float(jnp.max(jnp.abs(out - ref)))
    # Kernel uses bf16 matmul inputs (f32 accumulation) vs. a pure-f32 reference,
    # so allow a few e-2 absolute; structural bugs produce O(1) differences.
    assert max_diff < 7.5e-2, f"mismatch vs reference: {max_diff}"

    print("KERNEL_OK")
</pallas_src>

<mosaic_0001>
module attributes {stable_mosaic.version = 11 : i64} {
  func.func @_prep_kernel(%arg0: i32, %arg1: i32, %arg2: memref<1x128x128xf32, #tpu.memory_space<vmem>>, %arg3: memref<1x1x128xf32, #tpu.memory_space<vmem>>, %arg4: memref<1x1x128xf32, #tpu.memory_space<vmem>>, %arg5: memref<128x128xbf16, #tpu.memory_space<vmem>>, %arg6: memref<1x128xf32, #tpu.memory_space<vmem>>, %arg7: memref<1x128xf32, #tpu.memory_space<vmem>>, %arg8: memref<1x128xf32, #tpu.memory_space<vmem>>, %arg9: memref<128x128xbf16, #tpu.memory_space<vmem>>, %arg10: memref<128x128xbf16, #tpu.memory_space<vmem>>, %arg11: memref<1x128x128xf32, #tpu.memory_space<vmem>>, %arg12: memref<1x4x128x32xbf16, #tpu.memory_space<vmem>>, %arg13: memref<1x4x128x32xbf16, #tpu.memory_space<vmem>>) attributes {dimension_semantics = [#tpu.dimension_semantics<parallel>, #tpu.dimension_semantics<parallel>], iteration_bounds = array<i64: 2, 2>, scalar_prefetch = 0 : i64, scratch_operands = 0 : i64, tpu.core_type = #tpu.core_type<tc>, window_params = [{transform_indices = @transform_0, window_bounds = array<i64: 1, 128, 128>}, {transform_indices = @transform_1, window_bounds = array<i64: 1, 1, 128>}, {transform_indices = @transform_2, window_bounds = array<i64: 1, 1, 128>}, {pipeline_mode = #tpu.pipeline_mode<synchronous>, transform_indices = @transform_3, window_bounds = array<i64: 128, 128>}, {pipeline_mode = #tpu.pipeline_mode<synchronous>, transform_indices = @transform_4, window_bounds = array<i64: 1, 128>}, {pipeline_mode = #tpu.pipeline_mode<synchronous>, transform_indices = @transform_5, window_bounds = array<i64: 1, 128>}, {pipeline_mode = #tpu.pipeline_mode<synchronous>, transform_indices = @transform_6, window_bounds = array<i64: 1, 128>}, {pipeline_mode = #tpu.pipeline_mode<synchronous>, transform_indices = @transform_7, window_bounds = array<i64: 128, 128>}, {pipeline_mode = #tpu.pipeline_mode<synchronous>, transform_indices = @transform_8, window_bounds = array<i64: 128, 128>}, {transform_indices = @transform_9, window_bounds = array<i64: 1, 128, 128>}, {transform_indices = @transform_10, window_bounds = array<i64: 1, 4, 128, 32>}, {transform_indices = @transform_11, window_bounds = array<i64: 1, 4, 128, 32>}]} {
    %c0 = arith.constant 0 : index
    %c0_0 = arith.constant 0 : index
    %c0_1 = arith.constant 0 : index
    %0 = vector.load %arg2[%c0, %c0_0, %c0_1] : memref<1x128x128xf32, #tpu.memory_space<vmem>>, vector<1x128x128xf32>
    %1 = vector.shape_cast %0 : vector<1x128x128xf32> to vector<128x128xf32>
    %2 = tpu.transpose %1, [1, 0] : vector<128x128xf32> -> vector<128x128xf32>
    %c0_2 = arith.constant 0 : index
    %c0_3 = arith.constant 0 : index
    %c0_4 = arith.constant 0 : index
    %3 = vector.load %arg3[%c0_2, %c0_3, %c0_4] : memref<1x1x128xf32, #tpu.memory_space<vmem>>, vector<1x1x128xf32>
    %4 = vector.shape_cast %3 : vector<1x1x128xf32> to vector<1x128xf32>
    %5 = vector.broadcast %4 : vector<1x128xf32> to vector<128x128xf32>
    %6 = arith.mulf %2, %5 : vector<128x128xf32>
    %c0_5 = arith.constant 0 : index
    %c0_6 = arith.constant 0 : index
    %c0_7 = arith.constant 0 : index
    %7 = vector.load %arg4[%c0_5, %c0_6, %c0_7] : memref<1x1x128xf32, #tpu.memory_space<vmem>>, vector<1x1x128xf32>
    %8 = vector.shape_cast %7 : vector<1x1x128xf32> to vector<1x128xf32>
    %9 = vector.broadcast %8 : vector<1x128xf32> to vector<128x128xf32>
    %10 = arith.addf %6, %9 : vector<128x128xf32>
    %11 = arith.truncf %10 : vector<128x128xf32> to vector<128x128xbf16>
    %c0_8 = arith.constant 0 : index
    %c0_9 = arith.constant 0 : index
    %12 = vector.load %arg5[%c0_8, %c0_9] : memref<128x128xbf16, #tpu.memory_space<vmem>>, vector<128x128xbf16>
    %cst = arith.constant dense<0.000000e+00> : vector<128x128xf32>
    %13 = tpu.matmul %11, %12, %cst {dimension_numbers = #tpu.dot_dimension_numbers<[1], [0], [0], [1], [0, 0, 1, 1], [], []>} : vector<128x128xbf16>, vector<128x128xbf16>, vector<128x128xf32> -> vector<128x128xf32>
    %c0_10 = arith.constant 0 : index
    %c0_11 = arith.constant 0 : index
    %14 = vector.load %arg6[%c0_10, %c0_11] : memref<1x128xf32, #tpu.memory_space<vmem>>, vector<1x128xf32>
    %15 = vector.broadcast %14 : vector<1x128xf32> to vector<128x128xf32>
    %16 = arith.addf %13, %15 : vector<128x128xf32>
    %c0_12 = arith.constant 0 : index
    %c0_13 = arith.constant 0 : index
    %c0_14 = arith.constant 0 : index
    %17 = vector.load %arg11[%c0_12, %c0_13, %c0_14] : memref<1x128x128xf32, #tpu.memory_space<vmem>>, vector<1x128x128xf32>
    %18 = vector.shape_cast %17 : vector<1x128x128xf32> to vector<128x128xf32>
    %19 = vector.shape_cast %16 : vector<128x128xf32> to vector<1x128x128xf32>
    tpu.vector_store %arg11[%c0_12, %c0_13, %c0_14], %19 {strides = array<i32>} : memref<1x128x128xf32, #tpu.memory_space<vmem>>, vector<1x128x128xf32>,
    %c0_15 = arith.constant 0 : index
    %c0_16 = arith.constant 0 : index
    %20 = vector.load %arg7[%c0_15, %c0_16] : memref<1x128xf32, #tpu.memory_space<vmem>>, vector<1x128xf32>
    %c0_17 = arith.constant 0 : index
    %c0_18 = arith.constant 0 : index
    %21 = vector.load %arg8[%c0_17, %c0_18] : memref<1x128xf32, #tpu.memory_space<vmem>>, vector<1x128xf32>
    %cst_19 = arith.constant dense<0.000000e+00> : vector<128xf32>
    %22 = vector.multi_reduction <add>, %16, %cst_19 [1] : vector<128x128xf32> to vector<128xf32>
    %23 = vector.shape_cast %22 : vector<128xf32> to vector<128x1xf32>
    %cst_20 = arith.constant 1.280000e+02 : f32
    %24 = vector.broadcast %cst_20 : f32 to vector<128x1xf32>
    %25 = arith.divf %23, %24 : vector<128x1xf32>
    %26 = vector.broadcast %25 : vector<128x1xf32> to vector<128x128xf32>
    %27 = arith.subf %16, %26 : vector<128x128xf32>
    %28 = arith.mulf %27, %27 : vector<128x128xf32>
    %cst_21 = arith.constant dense<0.000000e+00> : vector<128xf32>
    %29 = vector.multi_reduction <add>, %28, %cst_21 [1] : vector<128x128xf32> to vector<128xf32>
    %30 = vector.shape_cast %29 : vector<128xf32> to vector<128x1xf32>
    %cst_22 = arith.constant 1.280000e+02 : f32
    %31 = vector.broadcast %cst_22 : f32 to vector<128x1xf32>
    %32 = arith.divf %30, %31 : vector<128x1xf32>
    %33 = vector.broadcast %25 : vector<128x1xf32> to vector<128x128xf32>
    %34 = arith.subf %16, %33 : vector<128x128xf32>
    %cst_23 = arith.constant 9.99999974E-6 : f32
    %35 = vector.broadcast %cst_23 : f32 to vector<128x1xf32>
    %36 = arith.addf %32, %35 : vector<128x1xf32>
    %37 = math.rsqrt %36 : vector<128x1xf32>
    %38 = vector.broadcast %37 : vector<128x1xf32> to vector<128x128xf32>
    %39 = arith.mulf %34, %38 : vector<128x128xf32>
    %40 = vector.broadcast %20 : vector<1x128xf32> to vector<128x128xf32>
    %41 = arith.mulf %39, %40 : vector<128x128xf32>
    %42 = vector.broadcast %21 : vector<1x128xf32> to vector<128x128xf32>
    %43 = arith.addf %41, %42 : vector<128x128xf32>
    %44 = arith.truncf %43 : vector<128x128xf32> to vector<128x128xbf16>
    %c0_24 = arith.constant 0 : index
    %c0_25 = arith.constant 0 : index
    %45 = vector.load %arg9[%c0_24, %c0_25] : memref<128x128xbf16, #tpu.memory_space<vmem>>, vector<128x128xbf16>
    %cst_26 = arith.constant dense<0.000000e+00> : vector<128x128xf32>
    %46 = tpu.matmul %44, %45, %cst_26 {dimension_numbers = #tpu.dot_dimension_numbers<[1], [0], [0], [1], [0, 0, 1, 1], [], []>} : vector<128x128xbf16>, vector<128x128xbf16>, vector<128x128xf32> -> vector<128x128xf32>
    %c0_27 = arith.constant 0 : index
    %c0_28 = arith.constant 0 : index
    %47 = vector.load %arg10[%c0_27, %c0_28] : memref<128x128xbf16, #tpu.memory_space<vmem>>, vector<128x128xbf16>
    %cst_29 = arith.constant dense<0.000000e+00> : vector<128x128xf32>
    %48 = tpu.matmul %44, %47, %cst_29 {dimension_numbers = #tpu.dot_dimension_numbers<[1], [0], [0], [1], [0, 0, 1, 1], [], []>} : vector<128x128xbf16>, vector<128x128xbf16>, vector<128x128xf32> -> vector<128x128xf32>
    %49 = arith.truncf %46 : vector<128x128xf32> to vector<128x128xbf16>
    %50 = vector.shape_cast %49 : vector<128x128xbf16> to vector<128x4x32xbf16>
    %51 = tpu.transpose %50, [1, 0, 2] : vector<128x4x32xbf16> -> vector<4x128x32xbf16>
    %c0_30 = arith.constant 0 : index
    %c0_31 = arith.constant 0 : index
    %c0_32 = arith.constant 0 : index
    %c0_33 = arith.constant 0 : index
    %52 = vector.load %arg12[%c0_30, %c0_31, %c0_32, %c0_33] : memref<1x4x128x32xbf16, #tpu.memory_space<vmem>>, vector<1x4x128x32xbf16>
    %53 = vector.shape_cast %52 : vector<1x4x128x32xbf16> to vector<4x128x32xbf16>
    %54 = vector.shape_cast %51 : vector<4x128x32xbf16> to vector<1x4x128x32xbf16>
    tpu.vector_store %arg12[%c0_30, %c0_31, %c0_32, %c0_33], %54 {strides = array<i32>} : memref<1x4x128x32xbf16, #tpu.memory_space<vmem>>, vector<1x4x128x32xbf16>,
    %55 = arith.truncf %48 : vector<128x128xf32> to vector<128x128xbf16>
    %56 = vector.shape_cast %55 : vector<128x128xbf16> to vector<128x4x32xbf16>
    %57 = tpu.transpose %56, [1, 0, 2] : vector<128x4x32xbf16> -> vector<4x128x32xbf16>
    %c0_34 = arith.constant 0 : index
    %c0_35 = arith.constant 0 : index
    %c0_36 = arith.constant 0 : index
    %c0_37 = arith.constant 0 : index
    %58 = vector.load %arg13[%c0_34, %c0_35, %c0_36, %c0_37] : memref<1x4x128x32xbf16, #tpu.memory_space<vmem>>, vector<1x4x128x32xbf16>
    %59 = vector.shape_cast %58 : vector<1x4x128x32xbf16> to vector<4x128x32xbf16>
    %60 = vector.shape_cast %57 : vector<4x128x32xbf16> to vector<1x4x128x32xbf16>
    tpu.vector_store %arg13[%c0_34, %c0_35, %c0_36, %c0_37], %60 {strides = array<i32>} : memref<1x4x128x32xbf16, #tpu.memory_space<vmem>>, vector<1x4x128x32xbf16>,
    return
  }
  func.func @transform_0(%arg0: i32, %arg1: i32) -> (i32, i32, i32) {
    %c0_i32 = arith.constant 0 : i32
    %c0_i32_0 = arith.constant 0 : i32
    return %arg0, %c0_i32, %arg1 : i32, i32, i32
  }
  func.func @transform_1(%arg0: i32, %arg1: i32) -> (i32, i32, i32) {
    %c0_i32 = arith.constant 0 : i32
    %c0_i32_0 = arith.constant 0 : i32
    %c0_i32_1 = arith.constant 0 : i32
    return %arg0, %c0_i32, %c0_i32_0 : i32, i32, i32
  }
  func.func @transform_2(%arg0: i32, %arg1: i32) -> (i32, i32, i32) {
    %c0_i32 = arith.constant 0 : i32
    %c0_i32_0 = arith.constant 0 : i32
    %c0_i32_1 = arith.constant 0 : i32
    return %arg0, %c0_i32, %c0_i32_0 : i32, i32, i32
  }
  func.func @transform_3(%arg0: i32, %arg1: i32) -> (i32, i32) {
    %c0_i32 = arith.constant 0 : i32
    %c0_i32_0 = arith.constant 0 : i32
    %c0_i32_1 = arith.constant 0 : i32
    return %c0_i32, %c0_i32_0 : i32, i32
  }
  func.func @transform_4(%arg0: i32, %arg1: i32) -> (i32, i32) {
    %c0_i32 = arith.constant 0 : i32
    %c0_i32_0 = arith.constant 0 : i32
    %c0_i32_1 = arith.constant 0 : i32
    return %c0_i32, %c0_i32_0 : i32, i32
  }
  func.func @transform_5(%arg0: i32, %arg1: i32) -> (i32, i32) {
    %c0_i32 = arith.constant 0 : i32
    %c0_i32_0 = arith.constant 0 : i32
    %c0_i32_1 = arith.constant 0 : i32
    return %c0_i32, %c0_i32_0 : i32, i32
  }
  func.func @transform_6(%arg0: i32, %arg1: i32) -> (i32, i32) {
    %c0_i32 = arith.constant 0 : i32
    %c0_i32_0 = arith.constant 0 : i32
    %c0_i32_1 = arith.constant 0 : i32
    return %c0_i32, %c0_i32_0 : i32, i32
  }
  func.func @transform_7(%arg0: i32, %arg1: i32) -> (i32, i32) {
    %c0_i32 = arith.constant 0 : i32
    %c0_i32_0 = arith.constant 0 : i32
    %c0_i32_1 = arith.constant 0 : i32
    return %c0_i32, %c0_i32_0 : i32, i32
  }
  func.func @transform_8(%arg0: i32, %arg1: i32) -> (i32, i32) {
    %c0_i32 = arith.constant 0 : i32
    %c0_i32_0 = arith.constant 0 : i32
    %c0_i32_1 = arith.constant 0 : i32
    return %c0_i32, %c0_i32_0 : i32, i32
  }
  func.func @transform_9(%arg0: i32, %arg1: i32) -> (i32, i32, i32) {
    %c0_i32 = arith.constant 0 : i32
    %c0_i32_0 = arith.constant 0 : i32
    return %arg0, %arg1, %c0_i32 : i32, i32, i32
  }
  func.func @transform_10(%arg0: i32, %arg1: i32) -> (i32, i32, i32, i32) {
    %c0_i32 = arith.constant 0 : i32
    %c0_i32_0 = arith.constant 0 : i32
    %c0_i32_1 = arith.constant 0 : i32
    return %arg0, %c0_i32, %arg1, %c0_i32_0 : i32, i32, i32, i32
  }
  func.func @transform_11(%arg0: i32, %arg1: i32) -> (i32, i32, i32, i32) {
    %c0_i32 = arith.constant 0 : i32
    %c0_i32_0 = arith.constant 0 : i32
    %c0_i32_1 = arith.constant 0 : i32
    return %arg0, %c0_i32, %arg1, %c0_i32_0 : i32, i32, i32, i32
  }
}

</mosaic_0001>

<bundles_post_ra>
// kernel: tpu_custom_call.1
= control target key start
LH: loop header
LB: loop body
LE: loop exit
PB: predicated region body
PF: predicated region fallthrough
CT: control target
= control target key end

     0   :  { %s10001_s0 = inlined_call_operand.hbm [shape: f32[2,128,256], index: 0, kind: input, shape index: {}]   ;;  %s10002_s1 = inlined_call_operand.vmem [shape: f32[2,1,128], index: 1, kind: input, shape index: {}]   ;;  %s10003_s2 = inlined_call_operand.vmem [shape: f32[2,1,128], index: 2, kind: input, shape index: {}]   ;;  %s10004_s3 = inlined_call_operand.hbm [shape: bf16[128,128], index: 3, kind: input, shape index: {}]   ;;  %s10005_s4 = inlined_call_operand.vmem [shape: f32[1,128], index: 4, kind: input, shape index: {}]   ;;  %s10006_s5 = inlined_call_operand.vmem [shape: f32[1,128], index: 5, kind: input, shape index: {}]   ;;  %s10007_s6 = inlined_call_operand.vmem [shape: f32[1,128], index: 6, kind: input, shape index: {}]   ;;  %s10008_s7 = inlined_call_operand.hbm [shape: bf16[128,128], index: 7, kind: input, shape index: {}]   ;;  %s10009_s8 = inlined_call_operand.hbm [shape: bf16[128,128], index: 8, kind: input, shape index: {}]   ;;  %s10010_s9 = inlined_call_operand.hbm [shape: f32[2,256,128], index: 9, kind: output, shape index: {0}]   ;;  %s10011_s10 = inlined_call_operand.vmem [shape: bf16[2,4,256,32], index: 10, kind: output, shape index: {1}]   ;;  %s10012_s11 = inlined_call_operand.vmem [shape: bf16[2,4,256,32], index: 11, kind: output, shape index: {2}]  }
   0x1   :  { %10026 = sst [smem:[#allocation22_spill]] %s10003_s2 }
   0x2   :  { %10027 = sst [smem:[#allocation23_spill]] %s10005_s4 }
   0x3   :  { %10028 = sst [smem:[#allocation24_spill]] %s10006_s5 }
   0x4   :  { %10029 = sst [smem:[#allocation25_spill]] %s10007_s6 }
   0x5   :  { %10030 = sst [smem:[#allocation26_spill]] %s10010_s9 }
   0x6   :  { %10031 = sst [smem:[#allocation27_spill]] %s10011_s10 }
   0x7   :  { %10032 = sst [smem:[#allocation28_spill]] %s10012_s11 }
   0x8   :  { %17 = vsyncpa [#allocation3], 0 }
   0x9   :  { %19 = vsyncpa [#allocation3 + $0x1], 0 }
   0xa   :  { %20 = vsyncpa [#allocation6], 0 }
   0xb   :  { %21 = vsyncpa [#allocation9], 0 }
   0xc   :  { %22 = vsyncpa [#allocation4], 0 }
   0xd   :  { %24 = vsyncpa [#allocation4 + $0x1], 0  ;;  %s7872_s17 = smov 0   ;;  %s7874_s18 = smov 0  }
   0xe   :  { %s7876_s19 = smov 0   ;;  %s7878_s20 = smov 0  }
   0xf   :  { %s7880_s21 = smov 0   ;;  %s7882_s22 = smov 0  }
  0x10   :  { %s7884_s23 = smov 0   ;;  %s7886_s24 = smov 0  }
  0x11 LB: > { %10033 = sst [smem:[#allocation17_spill]] %s7764_s17  ;;  %s6981_s25 = sadd.s32 4294967295, %s7792_s24   ;;  %s7792_s24 = sphi %s7886_s24, %s30_s24   ;;  %s7788_s23 = sphi %s7884_s23, %s10075_s23   ;;  %s7784_s22 = sphi %s7882_s22, %s10074_s22   ;;  %s7780_s21 = sphi %s7880_s21, %s10073_s21   ;;  %s7776_s20 = sphi %s7878_s20, %s10072_s20   ;;  %s7772_s19 = sphi %s7876_s19, %s10071_s19   ;;  %s7768_s18 = sphi %s7874_s18, %s10070_s18   ;;  %s7764_s17 = sphi %s7872_s17, %s10069_s17  }
  0x12   : > { %10034 = sst [smem:[#allocation18_spill]] %s7776_s20  ;;  %s6982_s26 = sadd.s32 4294967294, %s7792_s24  }
  0x13   : > { %10035 = sst [smem:[#allocation19_spill]] %s7792_s24  ;;  %p58_p0 = scmp.ne.s32.totalorder %s7772_s19, %s7768_s18 }
  0x14   : > { %p59_p1 = scmp.eq.s32.totalorder %s7792_s24, 0  ;;  %p64_p2 = scmp.ne.s32.totalorder %s7768_s18, %s7764_s17 }
  0x15   : > { %p7920_p3 = scmp.eq.s32.totalorder %s6981_s25, 0  ;;  %p268_p4 = scmp.eq.s32.totalorder %s6981_s25, 3 }
  0x16   : > { %p7924_p5 = por %p59_p1, %p58_p0  ;;  %p274_p6 = scmp.eq.s32.totalorder %s6982_s26, 3 }
  0x17   : > { %s10036_s28 = scalar_select %p7920_p3, 1, 0 }
  0x18   : > { %p7930_p7 = por %p7920_p3, %p64_p2  ;;  %p7934_p8 = por %p268_p4, %p58_p0 }
  0x19   : > { %p7938_p9 = por %p274_p6, %p64_p2  ;;  %p6983_p10 = scmp.ge.s32.totalorder %s7792_s24, 1 }
  0x1a   : > { %s10038_s30 = scalar_select %p7930_p7, 1, 0 }
  0x1b   : > { %s10039_s12 = scalar_select %p7934_p8, 1, 0 }
  0x1c   : > { %s10041_s13 = scalar_select %p7938_p9, 1, 0 }
  0x1d   : > { %10040 = sst [smem:[#allocation20_spill]] %s10039_s12  ;;  %p337_p11 = scmp.lt.s32.totalorder %s7792_s24, 5 }
  0x1e   : > { %10042 = sst [smem:[#allocation21_spill]] %s10041_s13  ;;  %s7794_s15 = smov [#allocation5]  }
  0x1f   : > { %p7944_p12 = pnand %p6983_p10, %p337_p11  ;;  %s349_s16 = sshll.u32 %s7794_s15, 4  ;;  %s7948_s16 = int_to_ptr.vmem [resolvable:$true] %s349_s16 }
  0x20   : > { %p7431_p0 = scmp.lt.s32.totalorder %s7792_s24, 4  ;;  %s7795_s26 = smov [#allocation7]  }
  0x21   : > { %s10043_s14 = scalar_select %p7944_p12, 1, 0 }
  0x22   : > { %p7410_p13 = pneg %p7944_p12  ;;  %s371_s27 = sshll.u32 %s7795_s26, 4  ;;  %s7965_s27 = int_to_ptr.vmem [resolvable:$true] %s371_s27 }
  0x23   : > { %p7961_p2 = pnand %p7431_p0, %p7924_p5  ;;  %s7572_s11 = scalar_lea.hbm %s10004_s3, 1024 }
  0x24   : > { %p7955_p1 = pnand %p7410_p13, %p7920_p3  ;;  %p7573_p4 = scmp.ne.s32.totalorder %s10004_s3, %s7572_s11 }
  0x25   : > { %s10045_s13 = scalar_select %p7961_p2, 1, 0 }
  0x26   : > { %p7975_p6 = pneg %p7955_p1  ;;  %p7579_p11 = scmp.lt.u32.totalorder %s7572_s11, %s10004_s3 }
  0x28   : > { %p7575_p5 = pnand %p7975_p6, %p7573_p4 }
  0x2a   : > { %p7576_p10 = pneg %p7575_p5 }
  0x2c   : > { %p7581_p13 = pnand %p7579_p11, %p7576_p10 }
  0x2e   : > { %7584 = shalt.err (!%p7581_p13)
}
  0x2f   : > { %s7585_s10 = scalar_lea.vmem %s7948_s16, 1024  ;;  %p7593_p3 = scmp.lt.s32.totalorder %s7948_s16, %s7948_s16 }
  0x30   : > { %p7586_p0 = scmp.ne.s32.totalorder %s7948_s16, %s7585_s10  ;;  %p7594_p7 = scmp.lt.s32.totalorder %s7585_s10, %s7585_s10 }
  0x32   : > { %p7588_p9 = pnand %p7586_p0, %p7975_p6  ;;  %p7595_p4 = por %p7594_p7, %p7593_p3 }
  0x34   : > { %p7589_p8 = pneg %p7588_p9 }
  0x36   : > { %p7596_p5 = pnand %p7595_p4, %p7589_p8 }
  0x38   : > { %7599 = shalt.err (!%p7596_p5)
}
  0x39   : > { %s7796_s17 = smov 64   ;;  %s7797_s11 = smov 4  }
  0x3a   : > { %7413 = dma.hbm_to_vmem [thread:$0]  (!%p7955_p1), %s10004_s3, 1024, %s7948_s16, [#allocation6], %s7796_s17, %s7796_s17, %s7797_s11  }
  0x3b   : > { %s7798_s29 = smov [#allocation8]   ;;  %s7600_s20 = scalar_lea.hbm %s10008_s7, 1024 }
  0x3c   : > { %s384_s26 = sshll.u32 %s7798_s29, 4  ;;  %p7601_p3 = scmp.ne.s32.totalorder %s10008_s7, %s7600_s20  ;;  %s385_s26 = int_to_ptr.vmem [resolvable:$true] %s384_s26 }
  0x3d   : > { %p7607_p9 = scmp.lt.u32.totalorder %s7600_s20, %s10008_s7 }
  0x3e   : > { %p7603_p7 = pnand %p7601_p3, %p7975_p6 }
  0x40   : > { %p7604_p8 = pneg %p7603_p7 }
  0x42   : > { %p7609_p10 = pnand %p7607_p9, %p7604_p8 }
  0x44   : > { %7612 = shalt.err (!%p7609_p10)
}
  0x45   : > { %s7613_s16 = scalar_lea.vmem %s7965_s27, 1024  ;;  %p7621_p4 = scmp.lt.s32.totalorder %s7965_s27, %s7965_s27 }
  0x46   : > { %p7614_p11 = scmp.ne.s32.totalorder %s7965_s27, %s7613_s16  ;;  %p7622_p5 = scmp.lt.s32.totalorder %s7613_s16, %s7613_s16 }
  0x48   : > { %p7616_p13 = pnand %p7614_p11, %p7975_p6  ;;  %p7623_p3 = por %p7622_p5, %p7621_p4 }
  0x4a   : > { %p7617_p0 = pneg %p7616_p13 }
  0x4c   : > { %p7624_p7 = pnand %p7623_p3, %p7617_p0 }
  0x4e   : > { %7627 = shalt.err (!%p7624_p7)
}
  0x4f   : > { %7416 = dma.hbm_to_vmem [thread:$0]  (!%p7955_p1), %s10008_s7, 1024, %s7965_s27, [#allocation6], %s7796_s17, %s7796_s17, %s7797_s11  }
  0x50   : > { %s7628_s9 = scalar_lea.hbm %s10009_s8, 1024 }
  0x51   : > { %p7629_p8 = scmp.ne.s32.totalorder %s10009_s8, %s7628_s9  ;;  %p7635_p11 = scmp.lt.u32.totalorder %s7628_s9, %s10009_s8 }
  0x53   : > { %p7631_p9 = pnand %p7629_p8, %p7975_p6 }
  0x55   : > { %p7632_p10 = pneg %p7631_p9 }
  0x57   : > { %p7637_p13 = pnand %p7635_p11, %p7632_p10 }
  0x59   : > { %7640 = shalt.err (!%p7637_p13)
}
  0x5a   : > { %s7641_s10 = scalar_lea.vmem %s385_s26, 1024  ;;  %p7649_p3 = scmp.lt.s32.totalorder %s385_s26, %s385_s26 }
  0x5b   : > { %p7642_p0 = scmp.ne.s32.totalorder %s385_s26, %s7641_s10  ;;  %p7650_p7 = scmp.lt.s32.totalorder %s7641_s10, %s7641_s10 }
  0x5d   : > { %p7644_p4 = pnand %p7642_p0, %p7975_p6  ;;  %p7651_p12 = por %p7650_p7, %p7649_p3 }
  0x5f   : > { %p7645_p5 = pneg %p7644_p4 }
  0x61   : > { %p7652_p2 = pnand %p7651_p12, %p7645_p5 }
  0x63   : > { %7655 = shalt.err (!%p7652_p2)
}
  0x64   : > { %7419 = dma.hbm_to_vmem [thread:$0]  (!%p7955_p1), %s10009_s8, 1024, %s385_s26, [#allocation9], %s7796_s17, %s7796_s17, %s7797_s11  }
  0x65   : > { %s39_s12 = sadd.s32 1, %s7784_s22  ;;  %s42_s2 = sadd.s32 1, %s7788_s23 }
  0x66   : > { %p40_p12 = scmp.ge.s32.totalorder %s39_s12, 2  ;;  %s398_s4 = sand.u32 1, %s7772_s19  }
  0x67   : > { %s6989_s25 = sshll.u32 %s7788_s23, 5  ;;  %s6988_s6 = sshll.u32 %s398_s4, 7 }
  0x68   : > { %s10077_s12 = smov (%p40_p12, %s39_s12), 0  ;;  %s10079_s2 = smov (!%p40_p12, %s42_s2), %s7788_s23 }
  0x69   : > { %s47_s5 = ssub.s32 %s7784_s22, %s10077_s12  ;;  %p44_p2 = scmp.ge.s32.totalorder %s10079_s2, 2 }
  0x6a   : > { %s407_s9 = sadd.s32 %s7784_s22, %s6989_s25  ;;  %s402_s11 = scalar_lea.vmem [#allocation2], %s6988_s6 }
  0x6b   : > { %s10081_s2 = smov (%p44_p2, %s10079_s2), 0  ;;  %s6990_s17 = sshll.u32 %s407_s9, 7 }
  0x6c   : > { %s410_s26 = sshll.u32 %s402_s11, 4  ;;  %s46_s20 = ssub.s32 %s7788_s23, %s10081_s2  ;;  %s8065_s26 = int_to_ptr.vmem [resolvable:$true] %s410_s26 }
  0x6d   : > { %s8063_s29 = scalar_lea.hbm %s10001_s0, %s6990_s17  ;;  %s48_s10 = sor.u32 %s47_s5, %s46_s20 }
  0x6e   : > { %p49_p1 = scmp.eq.s32.totalorder %s48_s10, 0  ;;  %s10047_s27 = sadd.s32 1, %s7772_s19 }
  0x6f   : > { %s8072_s25 = scalar_lea.sflag [#allocation3], %s398_s4  ;;  %s7656_s6 = scalar_lea.hbm %s8063_s29, 2048 }
  0x70   : > { %s8070_s16 = scalar_select %p49_p1, %s7772_s19, %s10047_s27  }
  0x71   : > { %p7657_p6 = scmp.ne.s32.totalorder %s8063_s29, %s7656_s6  ;;  %p10048_p8 = scmp.ne.s32.totalorder %s10045_s13, 0 }
  0x72   : > { %s7661_s5 = scalar_lea.hbm %s10001_s0, 8192  ;;  %p7662_p13 = scmp.lt.u32.totalorder %s8063_s29, %s10001_s0 }
  0x73   : > { %p7658_p9 = pneg %p10048_p8  ;;  %p7663_p0 = scmp.lt.u32.totalorder %s7661_s5, %s7656_s6 }
  0x74   : > { %p7665_p5 = scmp.lt.u32.totalorder %s7656_s6, %s8063_s29 }
  0x75   : > { %p7659_p10 = pnand %p7658_p9, %p7657_p6  ;;  %p7664_p4 = por %p7663_p0, %p7662_p13 }
  0x77   : > { %p7660_p11 = pneg %p7659_p10  ;;  %p7666_p3 = por %p7665_p5, %p7664_p4 }
  0x79   : > { %p7667_p7 = pnand %p7666_p3, %p7660_p11 }
  0x7b   : > { %7670 = shalt.err (!%p7667_p7)
}
  0x7c   : > { %s7671_s4 = scalar_lea.vmem %s8065_s26, 2048  ;;  %s7799_s24 = smov [#allocation2]  }
  0x7d   : > { %p7672_p12 = scmp.ne.s32.totalorder %s8065_s26, %s7671_s4  ;;  %s7676_s15 = sshll.u32 %s7799_s24, 4  ;;  %s7677_s15 = int_to_ptr.vmem [resolvable:$false] %s7676_s15 }
  0x7e   : > { %s7678_s10 = scalar_lea.vmem %s7677_s15, 4096  ;;  %p7679_p6 = scmp.lt.s32.totalorder %s8065_s26, %s7677_s15 }
  0x7f   : > { %p7674_p2 = pnand %p7672_p12, %p7658_p9  ;;  %p7680_p10 = scmp.lt.s32.totalorder %s7678_s10, %s7671_s4 }
  0x81   : > { %p7675_p1 = pneg %p7674_p2  ;;  %p7681_p13 = por %p7680_p10, %p7679_p6 }
  0x83   : > { %p7682_p0 = pnand %p7681_p13, %p7675_p1 }
  0x85   : > { %7685 = shalt.err (!%p7682_p0)
}
  0x86   : > { %s7800_s27 = smov 256   ;;  %s7801_s6 = smov 128  }
  0x87   : > { %s7802_s9 = smov 8   ;;  %p10049_p9 = scmp.ne.s32.totalorder %s10043_s14, 0 }
  0x88   : > { %7423 = dma.hbm_to_vmem [thread:$0]  (!%p10048_p8), %s8063_s29, 2048, %s8065_s26, %s8072_s25, %s7800_s27, %s7801_s6, %s7802_s9  }
  0x89   : > { %434 = sbr.rel (%p10049_p9) target bundleno = 1550 (0x60e), region = 56  ;;  %s8103_s17 = sand.u32 (!%p10049_p9), 1, %s7768_s18  }
  0x8a   : > { %s6992_s5 = sshll.u32 (!%p10049_p9), %s8103_s17, 7  ;;  %s437_s11 = scalar_lea.sflag (!%p10049_p9), [#allocation3], %s8103_s17 }
  0x8b   : > { %s8109_s20 = scalar_lea.vmem (!%p10049_p9), [#allocation2], %s6992_s5  ;;  %p10050_p11 = scmp.ne.s32.totalorder (!%p10049_p9), %s10038_s30, 0 }
  0x90   : > { %7747 = dma.done.wait (%p10050_p11), %s437_s11, 2048  }
  0x91   : > { %7749 = vsyncadd (%p10050_p11), %s437_s11, 4294965248  ;;  %p10051_p8 = scmp.ne.s32.totalorder %s10036_s28, 0 }
  0x93   : > { %7751 = dma.done.wait (%p10051_p8), [#allocation6], 2048  }
  0x94   : > { %7753 = vsyncadd (%p10051_p8), [#allocation6], 4294965248 }
  0x95   : > { %7755 = dma.done.wait (%p10051_p8), [#allocation9], 1024  }
  0x96   : > { %7757 = vsyncadd (%p10051_p8), [#allocation9], 4294966272  ;;  %v515_v0 = vld [vmem:[%s8109_s20] sm:$0xff]  ;;  %v516_v1 = vld [vmem:[%s8109_s20 + $0x8] sm:$0xff]  ;;  %p505_p4 = scmp.lt.s32.totalorder %s7780_s21, 1  ;;  %s10052_s25 = sld [smem:[#allocation22_spill]] }
  0x97   : > { %531 = vxpose.xlu0.b32.start [1/16] %v515_v0, 128  ;;  %v517_v2 = vld [vmem:[%s8109_s20 + $0x10] sm:$0xff]  ;;  %v7516_v3 = vld [vmem:[#allocation5] sm:$0xff]   ;;  %v7517_v4 = vld [vmem:[#allocation5 + $0x8] sm:$0xff]   ;;  %s10053_s10 = sld [smem:[#allocation23_spill]]  ;;  %s8174_s27 = scalar_lea.vmem [#allocation10], %s6992_s5  ;;  %vm3696_vm0 = vcmask 257024  }
  0x98   : > { %7282 = vmatprep.subr.bf16.mxu0 %v7516_v3  ;;  %v518_v5 = vld [vmem:[%s8109_s20 + $0x18] sm:$0xff]  ;;  %v7518_v6 = vld [vmem:[#allocation5 + $0x10] sm:$0xff]   ;;  %v519_v7 = vld [vmem:[%s8109_s20 + $0x20] sm:$0xff]  ;;  %s506_s28 = scalar_select %p505_p4, %s7780_s21, 1 }
  0x99   : > { %7283 = vmatpush3.bf16.msra.mxu0 %v7516_v3  ;;  %v7519_v8 = vld [vmem:[#allocation5 + $0x18] sm:$0xff]   ;;  %v520_v9 = vld [vmem:[%s8109_s20 + $0x28] sm:$0xff]  ;;  %v7520_v10 = vld [vmem:[#allocation5 + $0x20] sm:$0xff]   ;;  %s10054_s5 = sld [smem:[#allocation24_spill]]  ;;  %s7803_s30 = smov 64  }
  0x9a   : > { %7284 = vmatprep.subr.bf16.mxu0 %v7517_v4  ;;  %v521_v11 = vld [vmem:[%s8109_s20 + $0x30] sm:$0xff]  ;;  %v7521_v12 = vld [vmem:[#allocation5 + $0x28] sm:$0xff]   ;;  %v522_v13 = vld [vmem:[%s8109_s20 + $0x38] sm:$0xff]  ;;  %s507_s14 = scalar_lea.vmem %s10002_s1, %s506_s28  ;;  %s7804_s13 = smov 96  }
  0x9b   : > { %532 = vxpose.xlu0.b32.cont [2/16] %v516_v1, 128  ;;  %v7522_v14 = vld [vmem:[#allocation5 + $0x30] sm:$0xff]   ;;  %v523_v15 = vld [vmem:[%s8109_s20 + $0x40] sm:$0xff]  ;;  %v7523_v16 = vld [vmem:[#allocation5 + $0x38] sm:$0xff]   ;;  %s6997_s26 = sshll.u32 %s8103_s17, 8  ;;  %s7224_s15 = sshll.u32 %s7780_s21, 5 }
  0x9c   : > { %v524_v17 = vld [vmem:[%s8109_s20 + $0x48] sm:$0xff]  ;;  %v525_v18 = vld [vmem:[%s8109_s20 + $0x50] sm:$0xff]  ;;  %v526_v19 = vld [vmem:[%s8109_s20 + $0x58] sm:$0xff]  ;;  %s510_s4 = scalar_lea.vmem %s10052_s25, %s506_s28  ;;  %s10055_s28 = sld [smem:[#allocation25_spill]] }
  0x9d   : > { %7285 = vmatpush3.bf16.msra.mxu0 %v7517_v4  ;;  %v527_v20 = vld [vmem:[%s8109_s20 + $0x60] sm:$0xff]  ;;  %v528_v21 = vld [vmem:[%s8109_s20 + $0x68] sm:$0xff]  ;;  %v529_v22 = vld [vmem:[%s8109_s20 + $0x70] sm:$0xff]  ;;  %s8684_s29 = scalar_lea.vmem [#allocation11], %s6997_s26  ;;  %s8768_s25 = scalar_lea.vmem [#allocation12], %s6997_s26 }
  0x9e   : > { %7286 = vmatprep.subr.bf16.mxu0 %v7518_v6  ;;  %v530_v23 = vld [vmem:[%s8109_s20 + $0x78] sm:$0xff]  ;;  %v8144_v24 = vld [vmem:[%s507_s14] ss:$0 sm:$0xff]  ;;  %s7805_s14 = smov 32   ;;  %s10057_s11 = sld [smem:[#allocation26_spill]] }
  0x9f   : > { %533 = vxpose.xlu0.b32.cont [3/16] %v517_v2, 128  ;;  %v7000_v28 = vld [vmem:[%s510_s4] ss:$0 sm:$0xff]  ;;  %s10056_s4 = sld [smem:[#allocation18_spill]] }
  0xa1   : > { %7287 = vmatpush3.bf16.msra.mxu0 %v7518_v6 }
  0xa2   : > { %7288 = vmatprep.subr.bf16.mxu0 %v7519_v8 }
  0xa3   : > { %534 = vxpose.xlu0.b32.cont [4/16] %v518_v5, 128 }
  0xa5   : > { %7289 = vmatpush3.bf16.msra.mxu0 %v7519_v8  ;;  %s9331_s24 = sshll.u32 %s10056_s4, 4 }
  0xa6   : > { %7290 = vmatprep.subr.bf16.mxu0 %v7520_v10 }
  0xa7   : > { %535 = vxpose.xlu0.b32.cont [5/16] %v519_v7, 128 }
  0xa9   : > { %7291 = vmatpush3.bf16.msra.mxu0 %v7520_v10 }
  0xaa   : > { %7292 = vmatprep.subr.bf16.mxu0 %v7521_v12 }
  0xab   : > { %536 = vxpose.xlu0.b32.cont [6/16] %v520_v9, 128 }
  0xad   : > { %7293 = vmatpush3.bf16.msra.mxu0 %v7521_v12 }
  0xae   : > { %7294 = vmatprep.subr.bf16.mxu0 %v7522_v14 }
  0xaf   : > { %537 = vxpose.xlu0.b32.cont [7/16] %v521_v11, 128 }
  0xb1   : > { %7295 = vmatpush3.bf16.msra.mxu0 %v7522_v14 }
  0xb2   : > { %7296 = vmatprep.subr.bf16.mxu0 %v7523_v16 }
  0xb3   : > { %538 = vxpose.xlu0.b32.cont [8/16] %v522_v13, 128 }
  0xb5   : > { %7297 = vmatpush3.bf16.msra.mxu0 %v7523_v16 }
  0xb7   : > { %539 = vxpose.xlu0.b32.cont [9/16] %v523_v15, 128 }
  0xbb   : > { %540 = vxpose.xlu0.b32.cont [10/16] %v524_v17, 128 }
  0xbf   : > { %541 = vxpose.xlu0.b32.cont [11/16] %v525_v18, 128  ;;  %v7001_v18 = vld [vmem:[%s10053_s10] ss:$0 sm:$0xff]  ;;  %s6182_s10 = sadd.s32 %s7224_s15, %s9331_s24 }
  0xc0   : > { %s7225_s6 = sshll.u32 %s6182_s10, 7 }
  0xc1   : > { %s9360_s20 = scalar_lea.hbm %s10057_s11, %s7225_s6 }
  0xc3   : > { %542 = vxpose.xlu0.b32.cont [12/16] %v526_v19, 128 }
  0xc7   : > { %543 = vxpose.xlu0.b32.cont [13/16] %v527_v20, 128 }
  0xcb   : > { %544 = vxpose.xlu0.b32.cont [14/16] %v528_v21, 128 }
  0xcf   : > { %545 = vxpose.xlu0.b32.cont [15/16] %v529_v22, 128 }
  0xd3   : > { %546 = vxpose.xlu0.b32.end [16/16] %v530_v23, 128 }
 0x117   : > { %v547_v25 = vpop.trf.xlu0 }
 0x118   : > { %v570_v26 = vmul.f32 %v8144_v24, %v547_v25 }
 0x11a   : > { %v593_v30 = vadd.f32 %v7000_v28, %v570_v26 }
 0x11b   : > { %v548_v27 = vpop.trf.xlu0 }
 0x11c   : > { %v571_v29 = vmul.f32 %v8144_v24, %v548_v27 }
 0x11e   : > { %v594_v31 = vadd.f32 %v7000_v28, %v571_v29 }
 0x11f   : > { %v549_v32 = vpop.trf.xlu0 }
 0x120   : > { %v609_v33 = vpack.c.bf16 %v594_v31, %v593_v30  ;;  %v572_v34 = vmul.f32 %v8144_v24, %v549_v32 }
 0x122   : > { %7298 = vmatprep.mubr.bf16.mxu0 %v609_v33  ;;  %v595_v37 = vadd.f32 %v7000_v28, %v572_v34 }
 0x123   : > { %v550_v35 = vpop.trf.xlu0 }
 0x124   : > { %v573_v36 = vmul.f32 %v8144_v24, %v550_v35 }
 0x126   : > { %v596_v38 = vadd.f32 %v7000_v28, %v573_v36 }
 0x127   : > { %v551_v39 = vpop.trf.xlu0 }
 0x128   : > { %v574_v40 = vmul.f32 %v8144_v24, %v551_v39  ;;  %v610_v41 = vpack.c.bf16 %v596_v38, %v595_v37 }
 0x12a   : > { %7299 = vmatmul.mubr.bf16.vlgmr.msra.gmra.mrb[0].mxu0 %v610_v41  ;;  %v597_v43 = vadd.f32 %v7000_v28, %v574_v40 }
 0x12b   : > { %v552_v42 = vpop.trf.xlu0 }
 0x12c   : > { %v575_v44 = vmul.f32 %v8144_v24, %v552_v42 }
 0x12e   : > { %v598_v45 = vadd.f32 %v7000_v28, %v575_v44 }
 0x12f   : > { %v553_v46 = vpop.trf.xlu0 }
 0x130   : > { %v576_v47 = vmul.f32 %v8144_v24, %v553_v46  ;;  %v611_v48 = vpack.c.bf16 %v598_v45, %v597_v43 }
 0x132   : > { %7302 = vmatprep.mubr.bf16.mxu0 %v611_v48  ;;  %v599_v50 = vadd.f32 %v7000_v28, %v576_v47 }
 0x133   : > { %v554_v49 = vpop.trf.xlu0 }
 0x134   : > { %v577_v51 = vmul.f32 %v8144_v24, %v554_v49 }
 0x136   : > { %v600_v52 = vadd.f32 %v7000_v28, %v577_v51 }
 0x137   : > { %v555_v53 = vpop.trf.xlu0 }
 0x138   : > { %v578_v54 = vmul.f32 %v8144_v24, %v555_v53  ;;  %v612_v55 = vpack.c.bf16 %v600_v52, %v599_v50 }
 0x13a   : > { %7303 = vmatmul.mubr.bf16.gmra.mrb[4].mxu0 %v612_v55  ;;  %v601_v57 = vadd.f32 %v7000_v28, %v578_v54 }
 0x13b   : > { %v556_v56 = vpop.trf.xlu0 }
 0x13c   : > { %v579_v58 = vmul.f32 %v8144_v24, %v556_v56 }
 0x13e   : > { %v602_v59 = vadd.f32 %v7000_v28, %v579_v58 }
 0x13f   : > { %v557_v60 = vpop.trf.xlu0 }
 0x140   : > { %v580_v61 = vmul.f32 %v8144_v24, %v557_v60  ;;  %v613_v62 = vpack.c.bf16 %v602_v59, %v601_v57 }
 0x142   : > { %7306 = vmatprep.mubr.bf16.mxu0 %v613_v62  ;;  %v603_v0 = vadd.f32 %v7000_v28, %v580_v61 }
 0x143   : > { %v558_v63 = vpop.trf.xlu0 }
 0x144   : > { %v581_v1 = vmul.f32 %v8144_v24, %v558_v63 }
 0x146   : > { %v604_v2 = vadd.f32 %v7000_v28, %v581_v1 }
 0x147   : > { %v559_v3 = vpop.trf.xlu0 }
 0x148   : > { %v582_v4 = vmul.f32 %v8144_v24, %v559_v3  ;;  %v614_v5 = vpack.c.bf16 %v604_v2, %v603_v0 }
 0x14a   : > { %7307 = vmatmul.mubr.bf16.gmra.mrb[8].mxu0 %v614_v5  ;;  %v605_v7 = vadd.f32 %v7000_v28, %v582_v4 }
 0x14b   : > { %v560_v6 = vpop.trf.xlu0 }
 0x14c   : > { %v583_v8 = vmul.f32 %v8144_v24, %v560_v6 }
 0x14e   : > { %v606_v9 = vadd.f32 %v7000_v28, %v583_v8 }
 0x14f   : > { %v561_v10 = vpop.trf.xlu0 }
 0x150   : > { %v584_v11 = vmul.f32 %v8144_v24, %v561_v10  ;;  %v615_v12 = vpack.c.bf16 %v606_v9, %v605_v7  ;;  %v7524_v10 = vld [vmem:[#allocation7] sm:$0xff]  }
 0x151   : > { %7314 = vmatprep.subr.bf16.mxu1 %v7524_v10 }
 0x152   : > { %7310 = vmatprep.mubr.bf16.mxu0 %v615_v12  ;;  %v607_v14 = vadd.f32 %v7000_v28, %v584_v11  ;;  %v8280_v11 = vld [vmem:[#allocation8] sm:$0xff]   ;;  %7315 = vmatpush3.bf16.msra.mxu1 %v7524_v10 }
 0x153   : > { %v562_v13 = vpop.trf.xlu0  ;;  %7346 = vmatprep.subr.bf16.mxu0 %v8280_v11 }
 0x154   : > { %v585_v15 = vmul.f32 %v8144_v24, %v562_v13  ;;  %7347 = vmatpush3.bf16.msra.mxu0 %v8280_v11 }
 0x156   : > { %v608_v16 = vadd.f32 %v7000_v28, %v585_v15 }
 0x158   : > { %v616_v17 = vpack.c.bf16 %v608_v16, %v607_v14  ;;  %v7526_v16 = vld [vmem:[#allocation7 + $0x8] sm:$0xff]  }
 0x159   : > { %7316 = vmatprep.subr.bf16.mxu1 %v7526_v16 }
 0x15a   : > { %7311 = vmatmul.mubr.bf16.gmra.mrb[12].mxu0 %v616_v17  ;;  %v8289_v17 = vld [vmem:[#allocation8 + $0x8] sm:$0xff]   ;;  %7317 = vmatpush3.bf16.msra.mxu1 %v7526_v16 }
 0x15b   : > { %7348 = vmatprep.subr.bf16.mxu0 %v8289_v17 }
 0x15c   : > { %7349 = vmatpush3.bf16.msra.mxu0 %v8289_v17 }
 0x1fd   : > { %v7300_v19 = vpop.f32.mrb[0].mxu0 }
 0x1fe   : > { %v8168_v20 = vadd.f32 %v7300_v19, %v7001_v18  ;;  %v722_v21 = vpop.f32.mrb[1].mxu0 }
 0x1ff   : > { %v8170_v22 = vadd.f32 %v7001_v18, %v722_v21  ;;  %v7301_v23 = vpop.f32.mrb[2].mxu0 }
 0x200   : > { %787 = vst [vmem:[%s8174_s27 + $0x10] sm:$0xff] %v8168_v20  ;;  %v8178_v24 = vadd.f32 %v7301_v23, %v7001_v18  ;;  %807 = vadd.xlane.f32.xlu1 %v8168_v20  ;;  %v725_v25 = vpop.f32.mrb[3].mxu0  ;;  %v8298_v23 = vld [vmem:[#allocation8 + $0x10] sm:$0xff]  }
 0x201   : > { %785 = vst [vmem:[%s8174_s27] sm:$0xff] %v8170_v22  ;;  %v8183_v26 = vadd.f32 %v7001_v18, %v725_v25  ;;  %7350 = vmatprep.subr.bf16.mxu0 %v8298_v23 }
 0x202   : > { %788 = vst [vmem:[%s8174_s27 + $0x18] sm:$0xff] %v8178_v24  ;;  %7351 = vmatpush3.bf16.msra.mxu0 %v8298_v23 }
 0x203   : > { %786 = vst [vmem:[%s8174_s27 + $0x8] sm:$0xff] %v8183_v26 }
 0x204   : > { %803 = vadd.xlane.f32.xlu1 %v8170_v22 }
 0x208   : > { %809 = vadd.xlane.f32.xlu1 %v8178_v24 }
 0x20c   : > { %805 = vadd.xlane.f32.xlu1 %v8183_v26 }
 0x20d   : > { %v7304_v27 = vpop.f32.mrb[4].mxu0 }
 0x20e   : > { %v8192_v28 = vadd.f32 %v7304_v27, %v7001_v18  ;;  %v738_v29 = vpop.f32.mrb[5].mxu0 }
 0x20f   : > { %v8194_v30 = vadd.f32 %v7001_v18, %v738_v29  ;;  %v7305_v31 = vpop.f32.mrb[6].mxu0  ;;  %v8307_v29 = vld [vmem:[#allocation8 + $0x18] sm:$0xff]  }
 0x210   : > { %791 = vst [vmem:[%s8174_s27 + $0x30] sm:$0xff] %v8192_v28  ;;  %815 = vadd.xlane.f32.xlu1 %v8192_v28  ;;  %v8199_v32 = vadd.f32 %v7305_v31, %v7001_v18  ;;  %v741_v33 = vpop.f32.mrb[7].mxu0  ;;  %7352 = vmatprep.subr.bf16.mxu0 %v8307_v29 }
 0x211   : > { %789 = vst [vmem:[%s8174_s27 + $0x20] sm:$0xff] %v8194_v30  ;;  %v8203_v34 = vadd.f32 %v7001_v18, %v741_v33  ;;  %7353 = vmatpush3.bf16.msra.mxu0 %v8307_v29 }
 0x212   : > { %792 = vst [vmem:[%s8174_s27 + $0x38] sm:$0xff] %v8199_v32 }
 0x213   : > { %790 = vst [vmem:[%s8174_s27 + $0x28] sm:$0xff] %v8203_v34 }
 0x214   : > { %811 = vadd.xlane.f32.xlu1 %v8194_v30 }
 0x218   : > { %817 = vadd.xlane.f32.xlu1 %v8199_v32 }
 0x21c   : > { %813 = vadd.xlane.f32.xlu1 %v8203_v34 }
 0x21d   : > { %v7308_v35 = vpop.f32.mrb[8].mxu0 }
 0x21e   : > { %v8212_v36 = vadd.f32 %v7308_v35, %v7001_v18  ;;  %v754_v37 = vpop.f32.mrb[9].mxu0  ;;  %v8316_v35 = vld [vmem:[#allocation8 + $0x20] sm:$0xff]  }
 0x21f   : > { %v8214_v38 = vadd.f32 %v7001_v18, %v754_v37  ;;  %v7309_v39 = vpop.f32.mrb[10].mxu0  ;;  %7354 = vmatprep.subr.bf16.mxu0 %v8316_v35 }
 0x220   : > { %795 = vst [vmem:[%s8174_s27 + $0x50] sm:$0xff] %v8212_v36  ;;  %823 = vadd.xlane.f32.xlu1 %v8212_v36  ;;  %v8219_v40 = vadd.f32 %v7309_v39, %v7001_v18  ;;  %v757_v41 = vpop.f32.mrb[11].mxu0  ;;  %7355 = vmatpush3.bf16.msra.mxu0 %v8316_v35  ;;  %v7534_v39 = vld [vmem:[#allocation7 + $0x28] sm:$0xff]  }
 0x221   : > { %793 = vst [vmem:[%s8174_s27 + $0x40] sm:$0xff] %v8214_v38  ;;  %v8223_v42 = vadd.f32 %v7001_v18, %v757_v41  ;;  %v8322_v41 = vld [vmem:[#allocation8 + $0x28] sm:$0xff]  }
 0x222   : > { %796 = vst [vmem:[%s8174_s27 + $0x58] sm:$0xff] %v8219_v40  ;;  %7356 = vmatprep.subr.bf16.mxu0 %v8322_v41 }
 0x223   : > { %794 = vst [vmem:[%s8174_s27 + $0x48] sm:$0xff] %v8223_v42 }
 0x224   : > { %819 = vadd.xlane.f32.xlu1 %v8214_v38  ;;  %7357 = vmatpush3.bf16.msra.mxu0 %v8322_v41 }
 0x228   : > { %825 = vadd.xlane.f32.xlu1 %v8219_v40 }
 0x22c   : > { %821 = vadd.xlane.f32.xlu1 %v8223_v42 }
 0x22d   : > { %v7312_v43 = vpop.f32.mrb[12].mxu0 }
 0x22e   : > { %v8232_v44 = vadd.f32 %v7312_v43, %v7001_v18  ;;  %v770_v45 = vpop.f32.mrb[13].mxu0 }
 0x22f   : > { %v8234_v46 = vadd.f32 %v7001_v18, %v770_v45  ;;  %v7313_v47 = vpop.f32.mrb[14].mxu0 }
 0x230   : > { %799 = vst [vmem:[%s8174_s27 + $0x70] sm:$0xff] %v8232_v44  ;;  %831 = vadd.xlane.f32.xlu1 %v8232_v44  ;;  %v8239_v48 = vadd.f32 %v7313_v47, %v7001_v18  ;;  %v773_v49 = vpop.f32.mrb[15].mxu0 }
 0x231   : > { %797 = vst [vmem:[%s8174_s27 + $0x60] sm:$0xff] %v8234_v46  ;;  %v8243_v50 = vadd.f32 %v7001_v18, %v773_v49  ;;  %v7536_v49 = vld [vmem:[#allocation7 + $0x30] sm:$0xff]  }
 0x232   : > { %800 = vst [vmem:[%s8174_s27 + $0x78] sm:$0xff] %v8239_v48 }
 0x233   : > { %798 = vst [vmem:[%s8174_s27 + $0x68] sm:$0xff] %v8243_v50 }
 0x234   : > { %827 = vadd.xlane.f32.xlu1 %v8234_v46 }
 0x238   : > { %829 = vadd.xlane.f32.xlu1 %v8243_v50 }
 0x23c   : > { %833 = vadd.xlane.f32.xlu1 %v8239_v48 }
 0x28d   : > { %v808_v51 = vpop.xlane.xlu1 %807 }
 0x28e   : > { %v838_v52 = vmul.f32 0.0078125, %v808_v51  ;;  %v8329_v51 = vld [vmem:[#allocation8 + $0x30] sm:$0xff]  }
 0x28f   : > { %7358 = vmatprep.subr.bf16.mxu0 %v8329_v51 }
 0x290   : > { %v8253_v53 = vsub.f32 %v8168_v20, %v838_v52  ;;  %7359 = vmatpush3.bf16.msra.mxu0 %v8329_v51 }
 0x291   : > { %v804_v54 = vpop.xlane.xlu1 %803 }
 0x292   : > { %v836_v55 = vmul.f32 0.0078125, %v804_v54  ;;  %v870_v56 = vmul.f32 %v8253_v53, %v8253_v53 }
 0x294   : > { %888 = vadd.xlane.f32.xlu1 %v870_v56  ;;  %v8258_v57 = vsub.f32 %v8170_v22, %v836_v55  ;;  %v7528_v22 = vld [vmem:[#allocation7 + $0x10] sm:$0xff]   ;;  %v7538_v56 = vld [vmem:[#allocation7 + $0x38] sm:$0xff]  }
 0x295   : > { %v810_v58 = vpop.xlane.xlu1 %809  ;;  %7318 = vmatprep.subr.bf16.mxu1 %v7528_v22 }
 0x296   : > { %v839_v59 = vmul.f32 0.0078125, %v810_v58  ;;  %v868_v60 = vmul.f32 %v8258_v57, %v8258_v57  ;;  %7319 = vmatpush3.bf16.msra.mxu1 %v7528_v22 }
 0x298   : > { %884 = vadd.xlane.f32.xlu0 %v868_v60  ;;  %v8263_v61 = vsub.f32 %v8178_v24, %v839_v59 }
 0x299   : > { %v806_v62 = vpop.xlane.xlu1 %805 }
 0x29a   : > { %v837_v63 = vmul.f32 0.0078125, %v806_v62  ;;  %v871_v0 = vmul.f32 %v8263_v61, %v8263_v61 }
 0x29c   : > { %890 = vadd.xlane.f32.xlu1 %v871_v0  ;;  %v8268_v1 = vsub.f32 %v8183_v26, %v837_v63 }
 0x29d   : > { %v816_v2 = vpop.xlane.xlu1 %815 }
 0x29e   : > { %v842_v3 = vmul.f32 0.0078125, %v816_v2  ;;  %v869_v4 = vmul.f32 %v8268_v1, %v8268_v1 }
 0x2a0   : > { %886 = vadd.xlane.f32.xlu1 %v869_v4  ;;  %v8273_v5 = vsub.f32 %v8192_v28, %v842_v3  ;;  %v7530_v28 = vld [vmem:[#allocation7 + $0x18] sm:$0xff]  }
 0x2a1   : > { %v812_v6 = vpop.xlane.xlu1 %811  ;;  %7320 = vmatprep.subr.bf16.mxu1 %v7530_v28 }
 0x2a2   : > { %v840_v7 = vmul.f32 0.0078125, %v812_v6  ;;  %v874_v8 = vmul.f32 %v8273_v5, %v8273_v5  ;;  %7321 = vmatpush3.bf16.msra.mxu1 %v7530_v28 }
 0x2a4   : > { %v8278_v9 = vsub.f32 %v8194_v30, %v840_v7  ;;  %896 = vadd.xlane.f32.xlu1 %v874_v8 }
 0x2a5   : > { %v818_v12 = vpop.xlane.xlu1 %817 }
 0x2a6   : > { %v843_v13 = vmul.f32 0.0078125, %v818_v12  ;;  %v872_v14 = vmul.f32 %v8278_v9, %v8278_v9 }
 0x2a8   : > { %v8287_v15 = vsub.f32 %v8199_v32, %v843_v13  ;;  %892 = vadd.xlane.f32.xlu1 %v872_v14 }
 0x2a9   : > { %v814_v18 = vpop.xlane.xlu1 %813 }
 0x2aa   : > { %v841_v19 = vmul.f32 0.0078125, %v814_v18  ;;  %v875_v20 = vmul.f32 %v8287_v15, %v8287_v15 }
 0x2ac   : > { %v8296_v21 = vsub.f32 %v8203_v34, %v841_v19  ;;  %898 = vadd.xlane.f32.xlu1 %v875_v20  ;;  %v7532_v34 = vld [vmem:[#allocation7 + $0x20] sm:$0xff]  }
 0x2ad   : > { %v824_v24 = vpop.xlane.xlu1 %823  ;;  %7322 = vmatprep.subr.bf16.mxu1 %v7532_v34 }
 0x2ae   : > { %v846_v25 = vmul.f32 0.0078125, %v824_v24  ;;  %v873_v26 = vmul.f32 %v8296_v21, %v8296_v21  ;;  %7323 = vmatpush3.bf16.msra.mxu1 %v7532_v34 }
 0x2af   : > { %7324 = vmatprep.subr.bf16.mxu1 %v7534_v39 }
 0x2b0   : > { %v8305_v27 = vsub.f32 %v8212_v36, %v846_v25  ;;  %894 = vadd.xlane.f32.xlu1 %v873_v26 }
 0x2b1   : > { %v820_v30 = vpop.xlane.xlu1 %819 }
 0x2b2   : > { %v844_v31 = vmul.f32 0.0078125, %v820_v30  ;;  %v878_v32 = vmul.f32 %v8305_v27, %v8305_v27  ;;  %7325 = vmatpush3.bf16.msra.mxu1 %v7534_v39 }
 0x2b3   : > { %7326 = vmatprep.subr.bf16.mxu1 %v7536_v49 }
 0x2b4   : > { %v8314_v33 = vsub.f32 %v8214_v38, %v844_v31  ;;  %904 = vadd.xlane.f32.xlu1 %v878_v32 }
 0x2b5   : > { %v826_v36 = vpop.xlane.xlu1 %825 }
 0x2b6   : > { %v876_v37 = vmul.f32 %v8314_v33, %v8314_v33  ;;  %v847_v43 = vmul.f32 0.0078125, %v826_v36  ;;  %7327 = vmatpush3.bf16.msra.mxu1 %v7536_v49 }
 0x2b7   : > { %7328 = vmatprep.subr.bf16.mxu1 %v7538_v56 }
 0x2b8   : > { %900 = vadd.xlane.f32.xlu1 %v876_v37  ;;  %v8332_v54 = vsub.f32 %v8219_v40, %v847_v43 }
 0x2b9   : > { %v822_v38 = vpop.xlane.xlu1 %821 }
 0x2ba   : > { %v845_v45 = vmul.f32 0.0078125, %v822_v38  ;;  %v879_v40 = vmul.f32 %v8332_v54, %v8332_v54  ;;  %7329 = vmatpush3.bf16.msra.mxu1 %v7538_v56 }
 0x2bb   : > { %7378 = vmatprep.subr.bf16.mxu1 %v8280_v11 }
 0x2bc   : > { %v8327_v47 = vsub.f32 %v8223_v42, %v845_v45  ;;  %v8338_v42 = vld [vmem:[#allocation8 + $0x38] sm:$0xff]  }
 0x2bd   : > { %v832_v52 = vpop.xlane.xlu1 %831  ;;  %7360 = vmatprep.subr.bf16.mxu0 %v8338_v42 }
 0x2be   : > { %v877_v55 = vmul.f32 %v8327_v47, %v8327_v47  ;;  %v850_v59 = vmul.f32 0.0078125, %v832_v52  ;;  %7361 = vmatpush3.bf16.msra.mxu0 %v8338_v42 }
 0x2c0   : > { %902 = vadd.xlane.f32.xlu1 %v877_v55  ;;  %v8349_v0 = vsub.f32 %v8232_v44, %v850_v59  ;;  %v8371_v55 = vld [vmem:[%s10054_s5] ss:$0 sm:$0xff] }
 0x2c1   : > { %v828_v58 = vpop.xlane.xlu1 %827 }
 0x2c2   : > { %v848_v60 = vmul.f32 0.0078125, %v828_v58 }
 0x2c4   : > { %v8345_v62 = vsub.f32 %v8234_v46, %v848_v60  ;;  %906 = vadd.xlane.f32.xlu1 %v879_v40  ;;  %v882_v46 = vmul.f32 %v8349_v0, %v8349_v0 }
 0x2c5   : > { %v830_v63 = vpop.xlane.xlu1 %829 }
 0x2c6   : > { %v849_v2 = vmul.f32 0.0078125, %v830_v63  ;;  %v880_v3 = vmul.f32 %v8345_v62, %v8345_v62  ;;  %v8380_v63 = vld [vmem:[%s10055_s28] ss:$0 sm:$0xff]  ;;  %s6185_s28 = sshll.u32 %s8174_s27, 4  ;;  %s6162_s27 = scalar_lea.sflag [#allocation4], %s8103_s17  ;;  %s9366_s28 = int_to_ptr.vmem [resolvable:$true] %s6185_s28 }
 0x2c8   : > { %v8354_v4 = vsub.f32 %v8243_v50, %v849_v2  ;;  %908 = vadd.xlane.f32.xlu1 %v880_v3 }
 0x2c9   : > { %v834_v6 = vpop.xlane.xlu1 %833 }
 0x2ca   : > { %v851_v7 = vmul.f32 0.0078125, %v834_v6  ;;  %v881_v8 = vmul.f32 %v8354_v4, %v8354_v4 }
 0x2cc   : > { %v8361_v10 = vsub.f32 %v8239_v48, %v851_v7  ;;  %912 = vadd.xlane.f32.xlu1 %v882_v46  ;;  %910 = vadd.xlane.f32.xlu0 %v881_v8 }
 0x2ce   : > { %v883_v44 = vmul.f32 %v8361_v10, %v8361_v10 }
 0x2d0   : > { %914 = vadd.xlane.f32.xlu0 %v883_v44 }
 0x321   : > { %v889_v50 = vpop.xlane.xlu1 %888 }
 0x322   : > { %v918_v12 = vmul.f32 0.0078125, %v889_v50 }
 0x324   : > { %v934_v18 = vadd.f32 1e-05, %v918_v12 }
 0x325   : > { %v885_v13 = vpop.xlane.xlu0 %884 }
 0x326   : > { %v916_v14 = vmul.f32 0.0078125, %v885_v13 }
 0x328   : > { %v932_v16 = vadd.f32 1e-05, %v916_v14 }
 0x329   : > { %v891_v19 = vpop.xlane.xlu1 %890 }
 0x32a   : > { %v919_v20 = vmul.f32 0.0078125, %v891_v19  ;;  %7540 = vrsqrt.f32 %v932_v16 }
 0x32b   : > { %7542 = vrsqrt.f32 %v934_v18 }
 0x32c   : > { %v935_v22 = vadd.f32 1e-05, %v919_v20 }
 0x32d   : > { %v887_v24 = vpop.xlane.xlu1 %886 }
 0x32e   : > { %7544 = vrsqrt.f32 %v935_v22  ;;  %v917_v48 = vmul.f32 0.0078125, %v887_v24 }
 0x330   : > { %v933_v25 = vadd.f32 1e-05, %v917_v48 }
 0x331   : > { %v897_v26 = vpop.xlane.xlu1 %896 }
 0x332   : > { %7546 = vrsqrt.f32 %v933_v25  ;;  %v922_v28 = vmul.f32 0.0078125, %v897_v26 }
 0x334   : > { %v7541_v31 = vpop.eup %7540  ;;  %v938_v39 = vadd.f32 1e-05, %v922_v28 }
 0x335   : > { %v893_v30 = vpop.xlane.xlu1 %892  ;;  %v7543_v34 = vpop.eup %7542  ;;  %v964_v43 = vmul.f32 %v7541_v31, %v8258_v57 }
 0x336   : > { %v920_v32 = vmul.f32 0.0078125, %v893_v30  ;;  %v966_v52 = vmul.f32 %v7543_v34, %v8253_v53 }
 0x337   : > { %v986_v57 = vmul.f32 %v8371_v55, %v964_v43 }
 0x338   : > { %v7545_v36 = vpop.eup %7544  ;;  %v936_v37 = vadd.f32 1e-05, %v920_v32  ;;  %v988_v53 = vmul.f32 %v8371_v55, %v966_v52 }
 0x339   : > { %v899_v38 = vpop.xlane.xlu1 %898  ;;  %v967_v45 = vmul.f32 %v7545_v36, %v8263_v61  ;;  %v1008_v46 = vadd.f32 %v8380_v63, %v986_v57 }
 0x33a   : > { %v923_v49 = vmul.f32 0.0078125, %v899_v38  ;;  %7548 = vrsqrt.f32 %v936_v37  ;;  %v1010_v8 = vadd.f32 %v8380_v63, %v988_v53 }
 0x33b   : > { %v989_v59 = vmul.f32 %v8371_v55, %v967_v45  ;;  %7550 = vrsqrt.f32 %v938_v39 }
 0x33c   : > { %v7547_v56 = vpop.eup %7546  ;;  %v939_v58 = vadd.f32 1e-05, %v923_v49 }
 0x33d   : > { %v895_v60 = vpop.xlane.xlu1 %894  ;;  %v965_v40 = vmul.f32 %v7547_v56, %v8268_v1  ;;  %v1011_v6 = vadd.f32 %v8380_v63, %v989_v59 }
 0x33e   : > { %7552 = vrsqrt.f32 %v939_v58  ;;  %v921_v61 = vmul.f32 0.0078125, %v895_v60 }
 0x33f   : > { %v987_v2 = vmul.f32 %v8371_v55, %v965_v40  ;;  %v1025_v50 = vpack.c.bf16 %v1011_v6, %v1010_v8 }
 0x340   : > { %v937_v3 = vadd.f32 1e-05, %v921_v61 }
 0x341   : > { %v905_v7 = vpop.xlane.xlu1 %904  ;;  %v1009_v1 = vadd.f32 %v8380_v63, %v987_v2 }
 0x342   : > { %7554 = vrsqrt.f32 %v937_v3  ;;  %v926_v19 = vmul.f32 0.0078125, %v905_v7 }
 0x343   : > { %v1024_v44 = vpack.c.bf16 %v1009_v1, %v1008_v46 }
 0x344   : > { %v7549_v13 = vpop.eup %7548  ;;  %v942_v26 = vadd.f32 1e-05, %v926_v19 }
 0x345   : > { %v901_v12 = vpop.xlane.xlu1 %900  ;;  %7330 = vmatprep.mubr.bf16.mxu1 %v1024_v44  ;;  %7362 = vmatprep.mubr.bf16.mxu0 %v1024_v44  ;;  %v7551_v16 = vpop.eup %7550  ;;  %v968_v22 = vmul.f32 %v7549_v13, %v8278_v9 }
 0x346   : > { %v924_v14 = vmul.f32 0.0078125, %v901_v12  ;;  %7331 = vmatmul.mubr.bf16.vlgmr.msra.gmra.mrb[0].mxu1 %v1025_v50  ;;  %7363 = vmatmul.mubr.bf16.vlgmr.msra.gmra.mrb[16].mxu0 %v1025_v50  ;;  %v970_v48 = vmul.f32 %v7551_v16, %v8273_v5 }
 0x347   : > { %7386 = vmatpush3.bf16.msra.mxu1 %v8280_v11  ;;  %v990_v31 = vmul.f32 %v8371_v55, %v968_v22 }
 0x348   : > { %v7553_v18 = vpop.eup %7552  ;;  %v940_v20 = vadd.f32 1e-05, %v924_v14  ;;  %7379 = vmatprep.subr.bf16.mxu1 %v8289_v17  ;;  %v992_v9 = vmul.f32 %v8371_v55, %v970_v48 }
 0x349   : > { %v971_v24 = vmul.f32 %v7553_v18, %v8287_v15  ;;  %v1012_v36 = vadd.f32 %v8380_v63, %v990_v31 }
 0x34a   : > { %7556 = vrsqrt.f32 %v940_v20  ;;  %v1014_v39 = vadd.f32 %v8380_v63, %v992_v9 }
 0x34b   : > { %7387 = vmatpush3.bf16.msra.mxu1 %v8289_v17  ;;  %v993_v28 = vmul.f32 %v8371_v55, %v971_v24  ;;  %7558 = vrsqrt.f32 %v942_v26 }
 0x34c   : > { %v7555_v25 = vpop.eup %7554  ;;  %7380 = vmatprep.subr.bf16.mxu1 %v8298_v23 }
 0x34d   : > { %v903_v11 = vpop.xlane.xlu1 %902  ;;  %v969_v30 = vmul.f32 %v7555_v25, %v8296_v21  ;;  %v1015_v17 = vadd.f32 %v8380_v63, %v993_v28 }
 0x34e   : > { %v925_v32 = vmul.f32 0.0078125, %v903_v11 }
 0x34f   : > { %v991_v15 = vmul.f32 %v8371_v55, %v969_v30  ;;  %7388 = vmatpush3.bf16.msra.mxu1 %v8298_v23  ;;  %v1027_v23 = vpack.c.bf16 %v1015_v17, %v1014_v39 }
 0x350   : > { %v941_v5 = vadd.f32 1e-05, %v925_v32  ;;  %7381 = vmatprep.subr.bf16.mxu1 %v8307_v29 }
 0x351   : > { %v907_v34 = vpop.xlane.xlu1 %906  ;;  %v1013_v21 = vadd.f32 %v8380_v63, %v991_v15 }
 0x352   : > { %7560 = vrsqrt.f32 %v941_v5  ;;  %v927_v37 = vmul.f32 0.0078125, %v907_v34 }
 0x353   : > { %v1026_v38 = vpack.c.bf16 %v1013_v21, %v1012_v36  ;;  %7389 = vmatpush3.bf16.msra.mxu1 %v8307_v29 }
 0x354   : > { %v943_v43 = vadd.f32 1e-05, %v927_v37  ;;  %7382 = vmatprep.subr.bf16.mxu1 %v8316_v35  ;;  %v7557_v49 = vpop.eup %7556 }
 0x355   : > { %v909_v45 = vpop.xlane.xlu1 %908  ;;  %7334 = vmatprep.mubr.bf16.mxu1 %v1026_v38  ;;  %7366 = vmatprep.mubr.bf16.mxu0 %v1026_v38  ;;  %v972_v29 = vmul.f32 %v7557_v49, %v8314_v33  ;;  %v7559_v60 = vpop.eup %7558 }
 0x356   : > { %7562 = vrsqrt.f32 %v943_v43  ;;  %v928_v52 = vmul.f32 0.0078125, %v909_v45  ;;  %7335 = vmatmul.mubr.bf16.gmra.mrb[4].mxu1 %v1027_v23  ;;  %7367 = vmatmul.mubr.bf16.gmra.mrb[20].mxu0 %v1027_v23  ;;  %v974_v7 = vmul.f32 %v7559_v60, %v8305_v27 }
 0x357   : > { %7390 = vmatpush3.bf16.msra.mxu1 %v8316_v35  ;;  %v994_v6 = vmul.f32 %v8371_v55, %v972_v29 }
 0x358   : > { %v944_v56 = vadd.f32 1e-05, %v928_v52  ;;  %7383 = vmatprep.subr.bf16.mxu1 %v8322_v41  ;;  %v996_v50 = vmul.f32 %v8371_v55, %v974_v7 }
 0x359   : > { %v913_v58 = vpop.xlane.xlu1 %912  ;;  %v911_v59 = vpop.xlane.xlu0 %910  ;;  %v1016_v8 = vadd.f32 %v8380_v63, %v994_v6 }
 0x35a   : > { %7564 = vrsqrt.f32 %v944_v56  ;;  %v930_v40 = vmul.f32 0.0078125, %v913_v58  ;;  %v929_v57 = vmul.f32 0.0078125, %v911_v59 }
 0x35b   : > { %7391 = vmatpush3.bf16.msra.mxu1 %v8322_v41 }
 0x35c   : > { %v7561_v61 = vpop.eup %7560  ;;  %v946_v53 = vadd.f32 1e-05, %v930_v40  ;;  %v945_v2 = vadd.f32 1e-05, %v929_v57  ;;  %7384 = vmatprep.subr.bf16.mxu1 %v8329_v51 }
 0x35d   : > { %v915_v3 = vpop.xlane.xlu0 %914  ;;  %v973_v35 = vmul.f32 %v7561_v61, %v8327_v47 }
 0x35e   : > { %7566 = vrsqrt.f32 %v946_v53  ;;  %v931_v33 = vmul.f32 0.0078125, %v915_v3 }
 0x35f   : > { %7568 = vrsqrt.f32 %v945_v2  ;;  %v995_v46 = vmul.f32 %v8371_v55, %v973_v35  ;;  %7392 = vmatpush3.bf16.msra.mxu1 %v8329_v51  ;;  %v1018_v51 = vadd.f32 %v8380_v63, %v996_v50 }
 0x360   : > { %v7563_v41 = vpop.eup %7562  ;;  %v947_v1 = vadd.f32 1e-05, %v931_v33  ;;  %7385 = vmatprep.subr.bf16.mxu1 %v8338_v42 }
 0x361   : > { %v1017_v44 = vadd.f32 %v8380_v63, %v995_v46  ;;  %v975_v47 = vmul.f32 %v7563_v41, %v8332_v54 }
 0x362   : > { %7570 = vrsqrt.f32 %v947_v1 }
 0x363   : > { %v1028_v27 = vpack.c.bf16 %v1017_v44, %v1016_v8  ;;  %v997_v12 = vmul.f32 %v8371_v55, %v975_v47  ;;  %7393 = vmatpush3.bf16.msra.mxu1 %v8338_v42 }
 0x364   : > { %v7565_v13 = vpop.eup %7564 }
 0x365   : > { %7338 = vmatprep.mubr.bf16.mxu1 %v1028_v27  ;;  %v1019_v14 = vadd.f32 %v8380_v63, %v997_v12  ;;  %v976_v16 = vmul.f32 %v7565_v13, %v8345_v62 }
 0x367   : > { %v1029_v18 = vpack.c.bf16 %v1019_v14, %v1018_v51  ;;  %v998_v24 = vmul.f32 %v8371_v55, %v976_v16 }
 0x368   : > { %v7567_v19 = vpop.eup %7566 }
 0x369   : > { %v7569_v20 = vpop.eup %7568  ;;  %7339 = vmatmul.mubr.bf16.gmra.mrb[8].mxu1 %v1029_v18  ;;  %v978_v54 = vmul.f32 %v7567_v19, %v8349_v0  ;;  %v1020_v28 = vadd.f32 %v8380_v63, %v998_v24  ;;  %v7806_v19 = vmov 1983009808  }
 0x36a   : > { %v977_v22 = vmul.f32 %v7569_v20, %v8354_v4  ;;  %v1554_v20 = vunpack.c.l.s4 %v7806_v19 }
 0x36b   : > { %v1000_v26 = vmul.f32 %v8371_v55, %v978_v54  ;;  %v1556_v54 = vlaneseq }
 0x36c   : > { %v7571_v48 = vpop.eup %7570  ;;  %v999_v42 = vmul.f32 %v8371_v55, %v977_v22  ;;  %v7807_v22 = vmov 1934713408  }
 0x36d   : > { %v979_v25 = vmul.f32 %v7571_v48, %v8361_v10  ;;  %v1022_v0 = vadd.f32 %v8380_v63, %v1000_v26  ;;  %v1585_v24 = vunpack.c.l.s4 %v7807_v22  ;;  %v1555_v48 = vunpack.c.0.s8 %v1554_v20 }
 0x36e   : > { %v1021_v62 = vadd.f32 %v8380_v63, %v999_v42  ;;  %v1557_v42 = vshrl.u32 %v1556_v54, 7  ;;  %v7808_v26 = vmov 0  }
 0x36f   : > { %v1001_v11 = vmul.f32 %v8371_v55, %v979_v25  ;;  %v1586_v25 = vunpack.c.0.s8 %v1585_v24 }
 0x370   : > { %v1030_v30 = vpack.c.bf16 %v1021_v62, %v1020_v28  ;;  %v8566_v28 = vpack.i.b16 %v7808_v26, %v7808_v26 }
 0x371   : > { %v1023_v4 = vadd.f32 %v8380_v63, %v1001_v11  ;;  %v8568_v11 = vsub.s32 %v1555_v48, %v1557_v42 }
 0x372   : > { %7342 = vmatprep.mubr.bf16.mxu1 %v1030_v30 }
 0x373   : > { %v1031_v31 = vpack.c.bf16 %v1023_v4, %v1022_v0 }
 0x375   : > { %7343 = vmatmul.mubr.bf16.gmra.mrb[12].mxu1 %v1031_v31 }
 0x376   : > { %7370 = vmatprep.mubr.bf16.mxu1 %v1028_v27 }
 0x37d   : > { %7371 = vmatmul.mubr.bf16.vlgmr.msra.gmra.mrb[16].mxu1 %v1029_v18 }
 0x37e   : > { %7374 = vmatprep.mubr.bf16.mxu1 %v1030_v30 }
 0x385   : > { %7375 = vmatmul.mubr.bf16.gmra.mrb[20].mxu1 %v1031_v31 }
 0x419   : > { %v7332_v10 = vpop.f32.mrb[0].mxu1  ;;  %v7364_v32 = vpop.f32.mrb[16].mxu0 }
 0x41a   : > { %v1130_v9 = vpop.f32.mrb[1].mxu1  ;;  %v1291_v15 = vpop.f32.mrb[17].mxu0 }
 0x41b   : > { %v7333_v5 = vpop.f32.mrb[2].mxu1  ;;  %v7365_v17 = vpop.f32.mrb[18].mxu0 }
 0x41c   : > { %v8438_v34 = vpack.c.bf16 %v7333_v5, %v7332_v10  ;;  %v8440_v55 = vpack.c.bf16 %v7365_v17, %v7364_v32  ;;  %v1133_v36 = vpop.f32.mrb[3].mxu1  ;;  %v1294_v21 = vpop.f32.mrb[19].mxu0  ;;  %v8572_v10 = vsub.s32 %v1586_v25, %v1557_v42 }
 0x41d   : > { %v8442_v63 = vpack.c.bf16 %v1133_v36, %v1130_v9  ;;  %v8444_v37 = vpack.c.bf16 %v1294_v21, %v1291_v15 }
 0x41e   : > { %1388 = vrot.lane.b32.xlu1 %v8438_v34, %s7803_s30  ;;  %1372 = vrot.lane.b32.xlu0 %v8438_v34, %s7804_s13  ;;  %v1444_v0 = vshrl.u32 %v8438_v34, 16  ;;  %v3845_v32 = vshrl.u32 %v8440_v55, 16 }
 0x41f   : > { %v3829_v9 = vshrl.u32 %v8444_v37, 16  ;;  %v1422_v15 = vshrl.u32 %v8442_v63, 16 }
 0x422   : > { %1404 = vrot.lane.b32.xlu1 %v8438_v34, %s7805_s14  ;;  %1386 = vrot.lane.b32.xlu0 %v8442_v63, %s7803_s30 }
 0x426   : > { %3779 = vrot.lane.b32.xlu1 %v8440_v55, %s7804_s13  ;;  %1402 = vrot.lane.b32.xlu0 %v8442_v63, %s7805_s14 }
 0x429   : > { %v7336_v39 = vpop.f32.mrb[4].mxu1  ;;  %v7368_v38 = vpop.f32.mrb[20].mxu0 }
 0x42a   : > { %v1307_v43 = vpop.f32.mrb[21].mxu0  ;;  %3795 = vrot.lane.b32.xlu1 %v8440_v55, %s7803_s30  ;;  %3777 = vrot.lane.b32.xlu0 %v8444_v37, %s7804_s13  ;;  %v1146_v23 = vpop.f32.mrb[5].mxu1 }
 0x42b   : > { %v7337_v45 = vpop.f32.mrb[6].mxu1  ;;  %v7369_v49 = vpop.f32.mrb[22].mxu0 }
 0x42c   : > { %v8462_v52 = vpack.c.bf16 %v7337_v45, %v7336_v39  ;;  %v8464_v56 = vpack.c.bf16 %v7369_v49, %v7368_v38  ;;  %v1149_v58 = vpop.f32.mrb[7].mxu1  ;;  %v1310_v59 = vpop.f32.mrb[23].mxu0 }
 0x42d   : > { %v8466_v29 = vpack.c.bf16 %v1149_v58, %v1146_v23  ;;  %v8468_v60 = vpack.c.bf16 %v1310_v59, %v1307_v43 }
 0x42e   : > { %3811 = vrot.lane.b32.xlu1 %v8440_v55, %s7805_s14  ;;  %3793 = vrot.lane.b32.xlu0 %v8444_v37, %s7803_s30  ;;  %v1476_v5 = vshrl.u32 %v8462_v52, 16  ;;  %v3877_v39 = vshrl.u32 %v8464_v56, 16 }
 0x42f   : > { %v3861_v21 = vshrl.u32 %v8468_v60, 16  ;;  %v1460_v23 = vshrl.u32 %v8466_v29, 16 }
 0x432   : > { %3809 = vrot.lane.b32.xlu0 %v8444_v37, %s7805_s14  ;;  %1370 = vrot.lane.b32.xlu1 %v8442_v63, %s7804_s13 }
 0x436   : > { %1376 = vrot.lane.b32.xlu1 %v8462_v52, %s7804_s13  ;;  %1390 = vrot.lane.b32.xlu0 %v8466_v29, %s7803_s30 }
 0x43a   : > { %1392 = vrot.lane.b32.xlu1 %v8462_v52, %s7803_s30  ;;  %1406 = vrot.lane.b32.xlu0 %v8466_v29, %s7805_s14 }
 0x43c   : > { %v7340_v40 = vpop.f32.mrb[8].mxu1 }
 0x43d   : > { %v1162_v57 = vpop.f32.mrb[9].mxu1 }
 0x43e   : > { %1408 = vrot.lane.b32.xlu1 %v8462_v52, %s7805_s14  ;;  %3781 = vrot.lane.b32.xlu0 %v8468_v60, %s7804_s13  ;;  %v7341_v61 = vpop.f32.mrb[10].mxu1 }
 0x43f   : > { %v8490_v53 = vpack.c.bf16 %v7341_v61, %v7340_v40  ;;  %v1165_v2 = vpop.f32.mrb[11].mxu1 }
 0x440   : > { %v8492_v3 = vpack.c.bf16 %v1165_v2, %v1162_v57 }
 0x441   : > { %v1508_v45 = vshrl.u32 %v8490_v53, 16 }
 0x442   : > { %3783 = vrot.lane.b32.xlu1 %v8464_v56, %s7804_s13  ;;  %3797 = vrot.lane.b32.xlu0 %v8468_v60, %s7803_s30  ;;  %v1492_v43 = vshrl.u32 %v8492_v3, 16 }
 0x446   : > { %3799 = vrot.lane.b32.xlu1 %v8464_v56, %s7803_s30  ;;  %3813 = vrot.lane.b32.xlu0 %v8468_v60, %s7805_s14 }
 0x448   : > { %v7344_v35 = vpop.f32.mrb[12].mxu1 }
 0x449   : > { %v1178_v6 = vpop.f32.mrb[13].mxu1 }
 0x44a   : > { %3815 = vrot.lane.b32.xlu1 %v8464_v56, %s7805_s14  ;;  %1378 = vrot.lane.b32.xlu0 %v8492_v3, %s7804_s13  ;;  %v7345_v7 = vpop.f32.mrb[14].mxu1 }
 0x44b   : > { %v8506_v33 = vpack.c.bf16 %v7345_v7, %v7344_v35  ;;  %v1181_v46 = vpop.f32.mrb[15].mxu1 }
 0x44c   : > { %v8508_v41 = vpack.c.bf16 %v1181_v46, %v1178_v6 }
 0x44d   : > { %v1540_v49 = vshrl.u32 %v8506_v33, 16 }
 0x44e   : > { %1374 = vrot.lane.b32.xlu1 %v8466_v29, %s7804_s13  ;;  %1394 = vrot.lane.b32.xlu0 %v8492_v3, %s7803_s30  ;;  %v1524_v40 = vshrl.u32 %v8508_v41, 16 }
 0x450   : > { %v7372_v1 = vpop.f32.mrb[16].mxu1 }
 0x451   : > { %v1323_v8 = vpop.f32.mrb[17].mxu1 }
 0x452   : > { %1380 = vrot.lane.b32.xlu1 %v8490_v53, %s7804_s13  ;;  %1410 = vrot.lane.b32.xlu0 %v8492_v3, %s7805_s14  ;;  %v7373_v44 = vpop.f32.mrb[18].mxu1 }
 0x453   : > { %v8518_v47 = vpack.c.bf16 %v7373_v44, %v7372_v1  ;;  %v1326_v50 = vpop.f32.mrb[19].mxu1 }
 0x454   : > { %v8520_v27 = vpack.c.bf16 %v1326_v50, %v1323_v8 }
 0x455   : > { %v3909_v35 = vshrl.u32 %v8518_v47, 16 }
 0x456   : > { %1396 = vrot.lane.b32.xlu1 %v8490_v53, %s7803_s30  ;;  %1382 = vrot.lane.b32.xlu0 %v8508_v41, %s7804_s13  ;;  %v3893_v57 = vshrl.u32 %v8520_v27, 16 }
 0x458   : > { %v7376_v12 = vpop.f32.mrb[20].mxu1 }
 0x459   : > { %v1339_v13 = vpop.f32.mrb[21].mxu1 }
 0x45a   : > { %1412 = vrot.lane.b32.xlu1 %v8490_v53, %s7805_s14  ;;  %1398 = vrot.lane.b32.xlu0 %v8508_v41, %s7803_s30  ;;  %v7377_v51 = vpop.f32.mrb[22].mxu1 }
 0x45b   : > { %v8530_v14 = vpack.c.bf16 %v7377_v51, %v7376_v12  ;;  %v1342_v16 = vpop.f32.mrb[23].mxu1 }
 0x45c   : > { %v8532_v18 = vpack.c.bf16 %v1342_v16, %v1339_v13 }
 0x45e   : > { %1384 = vrot.lane.b32.xlu1 %v8506_v33, %s7804_s13  ;;  %1414 = vrot.lane.b32.xlu0 %v8508_v41, %s7805_s14 }
 0x462   : > { %1400 = vrot.lane.b32.xlu1 %v8506_v33, %s7803_s30  ;;  %3785 = vrot.lane.b32.xlu0 %v8520_v27, %s7804_s13 }
 0x466   : > { %1416 = vrot.lane.b32.xlu1 %v8506_v33, %s7805_s14  ;;  %3801 = vrot.lane.b32.xlu0 %v8520_v27, %s7803_s30 }
 0x46a   : > { %3787 = vrot.lane.b32.xlu1 %v8518_v47, %s7804_s13  ;;  %3817 = vrot.lane.b32.xlu0 %v8520_v27, %s7805_s14 }
 0x46e   : > { %3803 = vrot.lane.b32.xlu1 %v8518_v47, %s7803_s30  ;;  %3789 = vrot.lane.b32.xlu0 %v8532_v18, %s7804_s13 }
 0x472   : > { %3819 = vrot.lane.b32.xlu1 %v8518_v47, %s7805_s14  ;;  %3805 = vrot.lane.b32.xlu0 %v8532_v18, %s7803_s30 }
 0x476   : > { %3791 = vrot.lane.b32.xlu1 %v8530_v14, %s7804_s13  ;;  %3821 = vrot.lane.b32.xlu0 %v8532_v18, %s7805_s14  ;;  %s7686_s13 = scalar_lea.vmem %s9366_s28, 2048 }
 0x477   : > { %p7687_p5 = scmp.ne.s32.totalorder %s9366_s28, %s7686_s13 }
 0x47a   : > { %3807 = vrot.lane.b32.xlu1 %v8530_v14, %s7803_s30  ;;  %s10058_s30 = sld [smem:[#allocation20_spill]] }
 0x47e   : > { %3823 = vrot.lane.b32.xlu1 %v8530_v14, %s7805_s14  ;;  %s7809_s14 = smov [#allocation10]  }
 0x47f   : > { %s7690_s26 = sshll.u32 %s7809_s14, 4  ;;  %s7691_s26 = int_to_ptr.vmem [resolvable:$false] %s7690_s26 }
 0x480   : > { %p10059_p3 = scmp.ne.s32.totalorder %s10058_s30, 0  ;;  %s7692_s4 = scalar_lea.vmem %s7691_s26, 4096 }
 0x481   : > { %p7693_p2 = scmp.lt.s32.totalorder %s9366_s28, %s7691_s26  ;;  %p7694_p1 = scmp.lt.s32.totalorder %s7692_s4, %s7686_s13 }
 0x482   : > { %p7688_p7 = pnand %p7687_p5, %p10059_p3 }
 0x483   : > { %p7695_p6 = por %p7694_p1, %p7693_p2 }
 0x484   : > { %p7689_p12 = pneg %p7688_p7 }
 0x486   : > { %p7696_p10 = pnand %p7695_p6, %p7689_p12 }
 0x490   : > { %v1389_v62 = vpop.permute.xlu1 %1388  ;;  %v1373_v30 = vpop.permute.xlu0 %1372 }
 0x491   : > { %v1442_v4 = vpack.i.b16 %v1373_v30, %v8438_v34  ;;  %v1445_v31 = vshrl.u32 %v1373_v30, 16  ;;  %v1452_v61 = vshrl.u32 %v1389_v62, 16 }
 0x493   : > { %v1446_v17 = vpack.i.b16 %v1445_v31, %v1444_v0  ;;  %v1684_v36 = vcombine.high %v1442_v4, %v8566_v28  ;;  %v1691_v7 = vrot.slane %v1442_v4, %v8568_v11 }
 0x494   : > { %v1405_v38 = vpop.permute.xlu1 %1404  ;;  %v8581_v34 = vpop.permute.xlu0 %1386 }
 0x495   : > { %v1750_v58 = vcombine.high %v1446_v17, %v8566_v28  ;;  %v1450_v59 = vpack.i.b16 %v1405_v38, %v1389_v62  ;;  %v1453_v2 = vshrl.u32 %v1405_v38, 16  ;;  %v1698_v46 = vrot.slane %v1684_v36, %v8568_v11 }
 0x496   : > { %v1757_v44 = vrot.slane %v1446_v17, %v8568_v11  ;;  %v1430_v13 = vshrl.u32 %v8581_v34, 16 }
 0x497   : > { %v1699_v1 = vcombine.high %v1450_v59, %v8566_v28  ;;  %v1706_v8 = vrot.slane %v1450_v59, %v8568_v11  ;;  %v1764_v50 = vrot.slane %v1750_v58, %v8568_v11  ;;  %v1454_v12 = vpack.i.b16 %v1453_v2, %v1452_v61 }
 0x498   : > { %v3780_v51 = vpop.permute.xlu1 %3779  ;;  %v8599_v16 = vpop.permute.xlu0 %1402 }
 0x499   : > { %v1713_v19 = vrot.slane %v1699_v1, %v8568_v11  ;;  %v1714_v20 = vcombine.low %v1691_v7, %v1706_v8  ;;  %v1715_v54 = vcombine.high %v1691_v7, %v1706_v8  ;;  %v3843_v22 = vpack.i.b16 %v3780_v51, %v8440_v55 }
 0x49a   : > { %v1765_v24 = vcombine.high %v1454_v12, %v8566_v28  ;;  %v1772_v48 = vrot.slane %v1454_v12, %v8568_v11  ;;  %v3846_v42 = vshrl.u32 %v3780_v51, 16  ;;  %v1428_v25 = vpack.i.b16 %v8599_v16, %v8581_v34 }
 0x49b   : > { %v1722_v26 = vrot.slane %v1714_v20, %v8572_v10  ;;  %v1729_v62 = vrot.slane %v1715_v54, %v8572_v10  ;;  %v1730_v30 = vcombine.low %v1698_v46, %v1713_v19  ;;  %v1731_v0 = vcombine.high %v1698_v46, %v1713_v19 }
 0x49c   : > { %v1779_v4 = vrot.slane %v1765_v24, %v8568_v11  ;;  %v1780_v31 = vcombine.low %v1757_v44, %v1772_v48  ;;  %v1781_v17 = vcombine.high %v1757_v44, %v1772_v48  ;;  %v3847_v36 = vpack.i.b16 %v3846_v42, %v3845_v32 }
 0x49d   : > { %v1738_v55 = vrot.slane %v1730_v30, %v8572_v10  ;;  %v1745_v38 = vrot.slane %v1731_v0, %v8572_v10  ;;  %v2708_v58 = vcombine.low %v1722_v26, %v1729_v62  ;;  %v7032_v59 = vcombine.high %v1722_v26, %v1729_v62  ;;  %v3796_v0 = vpop.permute.xlu1 %3795 }
 0x49e   : > { %v1788_v61 = vrot.slane %v1780_v31, %v8572_v10  ;;  %v1795_v2 = vrot.slane %v1781_v17, %v8572_v10  ;;  %v1796_v7 = vcombine.low %v1764_v50, %v1779_v4  ;;  %v1797_v1 = vcombine.high %v1764_v50, %v1779_v4 }
 0x49f   : > { %v2715_v8 = vrot.slane %v2708_v58, %v8568_v11  ;;  %v2723_v46 = vrot.slane %v7032_v59, %v8568_v11  ;;  %v2724_v12 = vcombine.low %v1738_v55, %v1745_v38  ;;  %v7033_v51 = vcombine.high %v1738_v55, %v1745_v38  ;;  %v3778_v38 = vpop.permute.xlu0 %3777 }
 0x4a0   : > { %v1804_v32 = vrot.slane %v1796_v7, %v8572_v10  ;;  %v1811_v44 = vrot.slane %v1797_v1, %v8572_v10  ;;  %v2758_v19 = vcombine.low %v1788_v61, %v1795_v2  ;;  %v7034_v20 = vcombine.high %v1788_v61, %v1795_v2 }
 0x4a1   : > { %v2731_v54 = vrot.slane %v2724_v12, %v8568_v11  ;;  %v2739_v24 = vrot.slane %v7033_v51, %v8568_v11  ;;  %v2740_v48 = vcombine.low %v2715_v8, %v2723_v46  ;;  %v4085_v42 = vcombine.high %v3843_v22, %v8566_v28 }
 0x4a2   : > { %v2765_v50 = vrot.slane %v2758_v19, %v8568_v11  ;;  %v2773_v26 = vrot.slane %v7034_v20, %v8568_v11  ;;  %v2774_v62 = vcombine.low %v1804_v32, %v1811_v44  ;;  %v7035_v30 = vcombine.high %v1804_v32, %v1811_v44 }
 0x4a3   : > { %v2747_v4 = vrot.slane %v2740_v48, %v8572_v10  ;;  %v2748_v31 = vcombine.low %v2731_v54, %v2739_v24  ;;  %v8625_v17 = vrot.slane %v3843_v22, %v8568_v11  ;;  %v8628_v55 = vrot.slane %v4085_v42, %v8568_v11  ;;  %v3812_v42 = vpop.permute.xlu1 %3811 }
 0x4a4   : > { %v2781_v58 = vrot.slane %v2774_v62, %v8568_v11  ;;  %v2789_v59 = vrot.slane %v7035_v30, %v8568_v11  ;;  %v2790_v61 = vcombine.low %v2765_v50, %v2773_v26  ;;  %v4151_v2 = vcombine.high %v3847_v36, %v8566_v28  ;;  %v8657_v30 = vpop.permute.xlu0 %3793 }
 0x4a5   : > { %v2755_v7 = vrot.slane %v2748_v31, %v8572_v10  ;;  %v8635_v1 = vrot.slane %v3847_v36, %v8568_v11  ;;  %v1431_v22 = vshrl.u32 %v8599_v16, 16  ;;  %v1567_v8 = vcombine.high %v1428_v25, %v8566_v28 }
 0x4a6   : > { %v2797_v46 = vrot.slane %v2790_v61, %v8572_v10  ;;  %v2798_v12 = vcombine.low %v2781_v58, %v2789_v59  ;;  %v8641_v51 = vrot.slane %v4151_v2, %v8568_v11  ;;  %v8644_v32 = vrot.slane %v1428_v25, %v8568_v11 }
 0x4a7   : > { %v2756_v44 = vcombine.low %v2747_v4, %v2755_v7  ;;  %v2757_v19 = vcombine.high %v2747_v4, %v2755_v7  ;;  %v1432_v36 = vpack.i.b16 %v1431_v22, %v1430_v13  ;;  %v8649_v20 = vrot.slane %v1567_v8, %v8568_v11 }
 0x4a8   : > { %v2805_v16 = vrot.slane %v2798_v12, %v8572_v10  ;;  %v3853_v54 = vshrl.u32 %v3796_v0, 16  ;;  %v3827_v24 = vpack.i.b16 %v3778_v38, %v8444_v37  ;;  %v3830_v48 = vshrl.u32 %v3778_v38, 16 }
 0x4a9   : > { %v3423_v50 = vshrl.u32 %v2756_v44, 16  ;;  %v3429_v26 = vshrl.u32 %v2757_v19, 16  ;;  %v1633_v25 = vcombine.high %v1432_v36, %v8566_v28  ;;  %v8655_v62 = vrot.slane %v1432_v36, %v8568_v11 }
 0x4aa   : > { %v2806_v34 = vcombine.low %v2797_v46, %v2805_v16  ;;  %v2807_v13 = vcombine.high %v2797_v46, %v2805_v16  ;;  %v3831_v4 = vpack.i.b16 %v3830_v48, %v3829_v9  ;;  %v3953_v31 = vcombine.high %v3827_v24, %v8566_v28 }
 0x4ab   : > { %v8664_v38 = vrot.slane %v1633_v25, %v8568_v11  ;;  %v8667_v58 = vrot.slane %v3827_v24, %v8568_v11  ;;  %v3851_v59 = vpack.i.b16 %v3812_v42, %v3796_v0  ;;  %v3854_v61 = vshrl.u32 %v3812_v42, 16  ;;  %v1371_v25 = vpop.permute.xlu1 %1370 }
 0x4ac   : > { %v3422_v2 = vpack.i.b16 %v2806_v34, %v2756_v44  ;;  %v3424_v7 = vshrl.u32 %v2806_v34, 16  ;;  %v3428_v22 = vpack.i.b16 %v2807_v13, %v2757_v19  ;;  %v3430_v8 = vshrl.u32 %v2807_v13, 16  ;;  %v8680_v34 = vpop.permute.xlu0 %3809 }
 0x4ad   : > { %v8670_v12 = vrot.slane %v3953_v31, %v8568_v11  ;;  %v4019_v37 = vcombine.high %v3831_v4, %v8566_v28  ;;  %v8674_v9 = vrot.slane %v3831_v4, %v8568_v11  ;;  %v3855_v46 = vpack.i.b16 %v3854_v61, %v3853_v54 }
 0x4ae   : > { %v3425_v36 = vpack.i.b16 %v3424_v7, %v3423_v50  ;;  %v3431_v16 = vpack.i.b16 %v3430_v8, %v3429_v26  ;;  %v7062_v24 = vcombine.low %v3422_v2, %v3422_v2  ;;  %v7063_v48 = vcombine.high %v3422_v2, %v3422_v2 }
 0x4af   : > { %v7094_v0 = vcombine.low %v3428_v22, %v3428_v22  ;;  %v7095_v42 = vcombine.high %v3428_v22, %v3428_v22  ;;  %v8677_v44 = vrot.slane %v4019_v37, %v8568_v11  ;;  %v4100_v19 = vcombine.high %v3851_v59, %v8566_v28 }
 0x4b0   : > { %v7078_v13 = vcombine.low %v3425_v36, %v3425_v36  ;;  %v7079_v31 = vcombine.high %v3425_v36, %v3425_v36  ;;  %v7110_v4 = vcombine.low %v3431_v16, %v3431_v16  ;;  %v7111_v6 = vcombine.high %v3431_v16, %v3431_v16  ;;  %3699 = vst.msk [vmem:[%s8684_s29 + $0x8] sm:$0xf] %vm3696_vm0, %v7062_v24 }
 0x4b1   : > { %3700 = vst.msk [vmem:[%s8684_s29 + $0xc] sm:$0xf] %vm3696_vm0, %v7063_v48  ;;  %3731 = vst.msk [vmem:[%s8684_s29 + $0x88] sm:$0xf] %vm3696_vm0, %v7094_v0  ;;  %v4107_v54 = vrot.slane %v3851_v59, %v8568_v11  ;;  %v4114_v50 = vrot.slane %v4100_v19, %v8568_v11  ;;  %v4166_v26 = vcombine.high %v3855_v46, %v8566_v28  ;;  %v3837_v2 = vshrl.u32 %v8657_v30, 16 }
 0x4b2   : > { %3732 = vst.msk [vmem:[%s8684_s29 + $0x8c] sm:$0xf] %vm3696_vm0, %v7095_v42  ;;  %v4173_v61 = vrot.slane %v3855_v46, %v8568_v11  ;;  %3715 = vst.msk [vmem:[%s8684_s29 + $0x48] sm:$0xf] %vm3696_vm0, %v7078_v13  ;;  %v1420_v7 = vpack.i.b16 %v1371_v25, %v8442_v63  ;;  %v1423_v22 = vshrl.u32 %v1371_v25, 16  ;;  %v8710_v59 = vpack.i.b16 %v8680_v34, %v8657_v30 }
 0x4b3   : > { %3716 = vst.msk [vmem:[%s8684_s29 + $0x4c] sm:$0xf] %vm3696_vm0, %v7079_v31  ;;  %3747 = vst.msk [vmem:[%s8684_s29 + $0xc8] sm:$0xf] %vm3696_vm0, %v7110_v4  ;;  %v4115_v8 = vcombine.low %v8625_v17, %v4107_v54  ;;  %v4116_v37 = vcombine.high %v8625_v17, %v4107_v54  ;;  %v4131_v46 = vcombine.low %v8628_v55, %v4114_v50 }
 0x4b4   : > { %3748 = vst.msk [vmem:[%s8684_s29 + $0xcc] sm:$0xf] %vm3696_vm0, %v7111_v6  ;;  %v4132_v36 = vcombine.high %v8628_v55, %v4114_v50  ;;  %v4180_v16 = vrot.slane %v4166_v26, %v8568_v11  ;;  %v4181_v6 = vcombine.low %v8635_v1, %v4173_v61  ;;  %v4182_v24 = vcombine.high %v8635_v1, %v4173_v61 }
 0x4b5   : > { %v1424_v48 = vpack.i.b16 %v1423_v22, %v1422_v15  ;;  %v4123_v0 = vrot.slane %v4115_v8, %v8572_v10  ;;  %v4130_v42 = vrot.slane %v4116_v37, %v8572_v10  ;;  %v4139_v19 = vrot.slane %v4131_v46, %v8572_v10 }
 0x4b6   : > { %v4146_v17 = vrot.slane %v4132_v36, %v8572_v10  ;;  %v4189_v25 = vrot.slane %v4181_v6, %v8572_v10  ;;  %v4196_v55 = vrot.slane %v4182_v24, %v8572_v10  ;;  %v4197_v13 = vcombine.low %v8641_v51, %v4180_v16 }
 0x4b7   : > { %v4198_v31 = vcombine.high %v8641_v51, %v4180_v16  ;;  %v5109_v1 = vcombine.low %v4123_v0, %v4130_v42  ;;  %v7128_v4 = vcombine.high %v4123_v0, %v4130_v42  ;;  %v1552_v42 = vcombine.high %v1420_v7, %v8566_v28 }
 0x4b8   : > { %v5125_v63 = vcombine.low %v4139_v19, %v4146_v17  ;;  %v7129_v15 = vcombine.high %v4139_v19, %v4146_v17  ;;  %v4205_v54 = vrot.slane %v4197_v13, %v8572_v10  ;;  %v5159_v26 = vcombine.low %v4189_v25, %v4196_v55 }
 0x4b9   : > { %v4212_v50 = vrot.slane %v4198_v31, %v8572_v10  ;;  %v7130_v61 = vcombine.high %v4189_v25, %v4196_v55  ;;  %v5116_v22 = vrot.slane %v5109_v1, %v8568_v11  ;;  %v5124_v8 = vrot.slane %v7128_v4, %v8568_v11 }
 0x4ba   : > { %v5132_v37 = vrot.slane %v5125_v63, %v8568_v11  ;;  %v5140_v46 = vrot.slane %v7129_v15, %v8568_v11  ;;  %v5166_v51 = vrot.slane %v5159_v26, %v8568_v11  ;;  %v1559_v19 = vrot.slane %v1420_v7, %v8568_v11 }
 0x4bb   : > { %v5174_v36 = vrot.slane %v7130_v61, %v8568_v11  ;;  %v5175_v16 = vcombine.low %v4205_v54, %v4212_v50  ;;  %v7131_v6 = vcombine.high %v4205_v54, %v4212_v50  ;;  %v5141_v24 = vcombine.low %v5116_v22, %v5124_v8 }
 0x4bc   : > { %v5149_v0 = vcombine.low %v5132_v37, %v5140_v46  ;;  %v1618_v13 = vcombine.high %v1424_v48, %v8566_v28  ;;  %v1566_v4 = vrot.slane %v1552_v42, %v8568_v11  ;;  %v1582_v63 = vcombine.low %v1559_v19, %v8644_v32 }
 0x4bd   : > { %v5182_v17 = vrot.slane %v5175_v16, %v8568_v11  ;;  %v5190_v25 = vrot.slane %v7131_v6, %v8568_v11  ;;  %v5191_v55 = vcombine.low %v5166_v51, %v5174_v36  ;;  %v5148_v31 = vrot.slane %v5141_v24, %v8572_v10 }
 0x4be   : > { %v5156_v1 = vrot.slane %v5149_v0, %v8572_v10  ;;  %v1583_v7 = vcombine.high %v1559_v19, %v8644_v32  ;;  %v1625_v50 = vrot.slane %v1424_v48, %v8568_v11  ;;  %v1590_v22 = vrot.slane %v1582_v63, %v8572_v10 }
 0x4bf   : > { %v5198_v15 = vrot.slane %v5191_v55, %v8572_v10  ;;  %v5199_v54 = vcombine.low %v5182_v17, %v5190_v25  ;;  %v1598_v8 = vcombine.low %v1566_v4, %v8649_v20  ;;  %v1599_v51 = vcombine.high %v1566_v4, %v8649_v20 }
 0x4c0   : > { %v5157_v26 = vcombine.low %v5148_v31, %v5156_v1  ;;  %v5158_v61 = vcombine.high %v5148_v31, %v5156_v1  ;;  %v1597_v46 = vrot.slane %v1583_v7, %v8572_v10  ;;  %v1632_v36 = vrot.slane %v1618_v13, %v8568_v11 }
 0x4c1   : > { %v5206_v37 = vrot.slane %v5199_v54, %v8572_v10  ;;  %v1606_v32 = vrot.slane %v1598_v8, %v8572_v10  ;;  %v1648_v48 = vcombine.low %v1625_v50, %v8655_v62  ;;  %v1613_v42 = vrot.slane %v1599_v51, %v8572_v10 }
 0x4c2   : > { %v5824_v16 = vshrl.u32 %v5157_v26, 16  ;;  %v5830_v6 = vshrl.u32 %v5158_v61, 16  ;;  %v1649_v19 = vcombine.high %v1625_v50, %v8655_v62  ;;  %v1664_v25 = vcombine.low %v1632_v36, %v8664_v38 }
 0x4c3   : > { %v5207_v24 = vcombine.low %v5198_v15, %v5206_v37  ;;  %v5208_v0 = vcombine.high %v5198_v15, %v5206_v37  ;;  %v1656_v17 = vrot.slane %v1648_v48, %v8572_v10  ;;  %v1665_v20 = vcombine.high %v1632_v36, %v8664_v38 }
 0x4c4   : > { %v2608_v55 = vcombine.low %v1590_v22, %v1597_v46  ;;  %v1663_v63 = vrot.slane %v1649_v19, %v8572_v10  ;;  %v1672_v15 = vrot.slane %v1664_v25, %v8572_v10  ;;  %v7028_v36 = vcombine.high %v1590_v22, %v1597_v46 }
 0x4c5   : > { %v5823_v13 = vpack.i.b16 %v5207_v24, %v5157_v26  ;;  %v5825_v31 = vshrl.u32 %v5207_v24, 16  ;;  %v5829_v1 = vpack.i.b16 %v5208_v0, %v5158_v61  ;;  %v5831_v4 = vshrl.u32 %v5208_v0, 16 }
 0x4c6   : > { %v1679_v54 = vrot.slane %v1665_v20, %v8572_v10  ;;  %v2615_v62 = vrot.slane %v2608_v55, %v8568_v11  ;;  %v2624_v26 = vcombine.low %v1606_v32, %v1613_v42  ;;  %v2623_v22 = vrot.slane %v7028_v36, %v8568_v11 }
 0x4c7   : > { %v5826_v7 = vpack.i.b16 %v5825_v31, %v5824_v16  ;;  %v5832_v50 = vpack.i.b16 %v5831_v4, %v5830_v6  ;;  %v7158_v8 = vcombine.low %v5823_v13, %v5823_v13  ;;  %v7159_v37 = vcombine.high %v5823_v13, %v5823_v13 }
 0x4c8   : > { %v7190_v51 = vcombine.low %v5829_v1, %v5829_v1  ;;  %v7191_v38 = vcombine.high %v5829_v1, %v5829_v1  ;;  %v2631_v46 = vrot.slane %v2624_v26, %v8568_v11  ;;  %v7029_v16 = vcombine.high %v1606_v32, %v1613_v42 }
 0x4c9   : > { %v7174_v48 = vcombine.low %v5826_v7, %v5826_v7  ;;  %v7175_v61 = vcombine.high %v5826_v7, %v5826_v7  ;;  %v7206_v24 = vcombine.low %v5832_v50, %v5832_v50  ;;  %v7207_v0 = vcombine.high %v5832_v50, %v5832_v50  ;;  %6099 = vst.msk [vmem:[%s8768_s25 + $0x8] sm:$0xf] %vm3696_vm0, %v7158_v8 }
 0x4ca   : > { %6100 = vst.msk [vmem:[%s8768_s25 + $0xc] sm:$0xf] %vm3696_vm0, %v7159_v37  ;;  %6131 = vst.msk [vmem:[%s8768_s25 + $0x88] sm:$0xf] %vm3696_vm0, %v7190_v51  ;;  %v2658_v6 = vcombine.low %v1656_v17, %v1663_v63  ;;  %v7030_v19 = vcombine.high %v1656_v17, %v1663_v63  ;;  %v2674_v25 = vcombine.low %v1672_v15, %v1679_v54  ;;  %v3838_v55 = vshrl.u32 %v8680_v34, 16 }
 0x4cb   : > { %6132 = vst.msk [vmem:[%s8768_s25 + $0x8c] sm:$0xf] %vm3696_vm0, %v7191_v38  ;;  %6115 = vst.msk [vmem:[%s8768_s25 + $0x48] sm:$0xf] %vm3696_vm0, %v7174_v48  ;;  %v7031_v20 = vcombine.high %v1672_v15, %v1679_v54  ;;  %v2639_v13 = vrot.slane %v7029_v16, %v8568_v11  ;;  %v2640_v31 = vcombine.low %v2615_v62, %v2623_v22 }
 0x4cc   : > { %6116 = vst.msk [vmem:[%s8768_s25 + $0x4c] sm:$0xf] %vm3696_vm0, %v7175_v61  ;;  %6147 = vst.msk [vmem:[%s8768_s25 + $0xc8] sm:$0xf] %vm3696_vm0, %v7206_v24  ;;  %v2665_v1 = vrot.slane %v2658_v6, %v8568_v11  ;;  %v3968_v32 = vcombine.high %v8710_v59, %v8566_v28  ;;  %v2673_v42 = vrot.slane %v7030_v19, %v8568_v11 }
 0x4cd   : > { %6148 = vst.msk [vmem:[%s8768_s25 + $0xcc] sm:$0xf] %vm3696_vm0, %v7207_v0  ;;  %v2681_v4 = vrot.slane %v2674_v25, %v8568_v11  ;;  %v2689_v7 = vrot.slane %v7031_v20, %v8568_v11  ;;  %v3839_v17 = vpack.i.b16 %v3838_v55, %v3837_v2  ;;  %v2647_v63 = vrot.slane %v2640_v31, %v8572_v10 }
 0x4ce   : > { %v2648_v34 = vcombine.low %v2631_v46, %v2639_v13  ;;  %v3975_v15 = vrot.slane %v8710_v59, %v8568_v11  ;;  %v3982_v54 = vrot.slane %v3968_v32, %v8568_v11  ;;  %v2690_v62 = vcombine.low %v2665_v1, %v2673_v42 }
 0x4cf   : > { %v2698_v50 = vcombine.low %v2681_v4, %v2689_v7  ;;  %v4034_v8 = vcombine.high %v3839_v17, %v8566_v28  ;;  %v4041_v37 = vrot.slane %v3839_v17, %v8568_v11  ;;  %v1377_v17 = vpop.permute.xlu1 %1376 }
 0x4d0   : > { %v2655_v51 = vrot.slane %v2648_v34, %v8572_v10  ;;  %v3983_v38 = vcombine.low %v8667_v58, %v3975_v15  ;;  %v3984_v30 = vcombine.high %v8667_v58, %v3975_v15  ;;  %v3999_v2 = vcombine.low %v8670_v12, %v3982_v54 }
 0x4d1   : > { %v2697_v36 = vrot.slane %v2690_v62, %v8572_v10  ;;  %v2705_v59 = vrot.slane %v2698_v50, %v8572_v10  ;;  %v4000_v26 = vcombine.high %v8670_v12, %v3982_v54  ;;  %v4048_v48 = vrot.slane %v4034_v8, %v8568_v11 }
 0x4d2   : > { %v2656_v61 = vcombine.low %v2647_v63, %v2655_v51  ;;  %v2657_v24 = vcombine.high %v2647_v63, %v2655_v51  ;;  %v3991_v0 = vrot.slane %v3983_v38, %v8572_v10  ;;  %v3998_v22 = vrot.slane %v3984_v30, %v8572_v10 }
 0x4d3   : > { %v2706_v46 = vcombine.low %v2697_v36, %v2705_v59  ;;  %v2707_v16 = vcombine.high %v2697_v36, %v2705_v59  ;;  %v4007_v58 = vrot.slane %v3999_v2, %v8572_v10  ;;  %v4014_v6 = vrot.slane %v4000_v26, %v8572_v10 }
 0x4d4   : > { %v3411_v19 = vshrl.u32 %v2656_v61, 16  ;;  %v3417_v25 = vshrl.u32 %v2657_v24, 16  ;;  %v4049_v20 = vcombine.low %v8674_v9, %v4041_v37  ;;  %v4050_v12 = vcombine.high %v8674_v9, %v4041_v37  ;;  %v8824_v37 = vpop.permute.xlu0 %1390 }
 0x4d5   : > { %v3410_v55 = vpack.i.b16 %v2706_v46, %v2656_v61  ;;  %v3412_v13 = vshrl.u32 %v2706_v46, 16  ;;  %v3416_v31 = vpack.i.b16 %v2707_v16, %v2657_v24  ;;  %v3418_v1 = vshrl.u32 %v2707_v16, 16 }
 0x4d6   : > { %v4057_v32 = vrot.slane %v4049_v20, %v8572_v10  ;;  %v4064_v42 = vrot.slane %v4050_v12, %v8572_v10  ;;  %v4065_v4 = vcombine.low %v8677_v44, %v4048_v48  ;;  %v4066_v7 = vcombine.high %v8677_v44, %v4048_v48 }
 0x4d7   : > { %v3413_v63 = vpack.i.b16 %v3412_v13, %v3411_v19  ;;  %v3419_v34 = vpack.i.b16 %v3418_v1, %v3417_v25  ;;  %v7060_v9 = vcombine.low %v3410_v55, %v3410_v55  ;;  %v7061_v15 = vcombine.high %v3410_v55, %v3410_v55 }
 0x4d8   : > { %v7092_v54 = vcombine.low %v3416_v31, %v3416_v31  ;;  %v7093_v62 = vcombine.high %v3416_v31, %v3416_v31  ;;  %v4073_v50 = vrot.slane %v4065_v4, %v8572_v10  ;;  %v4080_v8 = vrot.slane %v4066_v7, %v8572_v10 }
 0x4d9   : > { %v7076_v44 = vcombine.low %v3413_v63, %v3413_v63  ;;  %v7077_v51 = vcombine.high %v3413_v63, %v3413_v63  ;;  %v7108_v38 = vcombine.low %v3419_v34, %v3419_v34  ;;  %v7109_v30 = vcombine.high %v3419_v34, %v3419_v34  ;;  %3697 = vst.msk [vmem:[%s8684_s29] sm:$0xf] %vm3696_vm0, %v7060_v9 }
 0x4da   : > { %3698 = vst.msk [vmem:[%s8684_s29 + $0x4] sm:$0xf] %vm3696_vm0, %v7061_v15  ;;  %3729 = vst.msk [vmem:[%s8684_s29 + $0x80] sm:$0xf] %vm3696_vm0, %v7092_v54  ;;  %v5009_v2 = vcombine.low %v3991_v0, %v3998_v22  ;;  %v7124_v36 = vcombine.high %v3991_v0, %v3998_v22  ;;  %v5025_v59 = vcombine.low %v4007_v58, %v4014_v6  ;;  %v1477_v1 = vshrl.u32 %v1377_v17, 16 }
 0x4db   : > { %3730 = vst.msk [vmem:[%s8684_s29 + $0x84] sm:$0xf] %vm3696_vm0, %v7093_v62  ;;  %v7125_v26 = vcombine.high %v4007_v58, %v4014_v6  ;;  %3713 = vst.msk [vmem:[%s8684_s29 + $0x40] sm:$0xf] %vm3696_vm0, %v7076_v44  ;;  %v5059_v48 = vcombine.low %v4057_v32, %v4064_v42  ;;  %v7126_v61 = vcombine.high %v4057_v32, %v4064_v42  ;;  %v8846_v58 = vpop.permute.xlu1 %1392  ;;  %v1407_v32 = vpop.permute.xlu0 %1406  ;;  %v1468_v7 = vshrl.u32 %v8824_v37, 16 }
 0x4dc   : > { %3714 = vst.msk [vmem:[%s8684_s29 + $0x44] sm:$0xf] %vm3696_vm0, %v7077_v51  ;;  %3745 = vst.msk [vmem:[%s8684_s29 + $0xc0] sm:$0xf] %vm3696_vm0, %v7108_v38  ;;  %v5075_v24 = vcombine.low %v4073_v50, %v4080_v8  ;;  %v7127_v46 = vcombine.high %v4073_v50, %v4080_v8  ;;  %v5016_v16 = vrot.slane %v5009_v2, %v8568_v11  ;;  %v3941_v63 = vshrl.u32 %v8530_v14, 16 }
 0x4dd   : > { %3746 = vst.msk [vmem:[%s8684_s29 + $0xc4] sm:$0xf] %vm3696_vm0, %v7109_v30  ;;  %v5024_v19 = vrot.slane %v7124_v36, %v8568_v11  ;;  %v5032_v0 = vrot.slane %v5025_v59, %v8568_v11  ;;  %v5040_v22 = vrot.slane %v7125_v26, %v8568_v11  ;;  %v5066_v6 = vrot.slane %v5059_v48, %v8568_v11 }
 0x4de   : > { %v5074_v25 = vrot.slane %v7126_v61, %v8568_v11  ;;  %v5082_v20 = vrot.slane %v5075_v24, %v8568_v11  ;;  %v5090_v12 = vrot.slane %v7127_v46, %v8568_v11  ;;  %v1474_v31 = vpack.i.b16 %v1377_v17, %v8462_v52 }
 0x4df   : > { %v5041_v55 = vcombine.low %v5016_v16, %v5024_v19  ;;  %v5049_v13 = vcombine.low %v5032_v0, %v5040_v22  ;;  %v1478_v15 = vpack.i.b16 %v1477_v1, %v1476_v5  ;;  %v1484_v50 = vshrl.u32 %v8846_v58, 16  ;;  %v1409_v2 = vpop.permute.xlu1 %1408 }
 0x4e0   : > { %v5091_v42 = vcombine.low %v5066_v6, %v5074_v25  ;;  %v5099_v4 = vcombine.low %v5082_v20, %v5090_v12  ;;  %v1948_v54 = vcombine.high %v1474_v31, %v8566_v28  ;;  %v1466_v8 = vpack.i.b16 %v1407_v32, %v8824_v37 }
 0x4e1   : > { %v5048_v34 = vrot.slane %v5041_v55, %v8572_v10  ;;  %v5056_v9 = vrot.slane %v5049_v13, %v8572_v10  ;;  %v1955_v38 = vrot.slane %v1474_v31, %v8568_v11  ;;  %v2014_v30 = vcombine.high %v1478_v15, %v8566_v28 }
 0x4e2   : > { %v5098_v62 = vrot.slane %v5091_v42, %v8572_v10  ;;  %v5106_v17 = vrot.slane %v5099_v4, %v8572_v10  ;;  %v8867_v5 = vrot.slane %v1948_v54, %v8568_v11  ;;  %v1469_v59 = vshrl.u32 %v1407_v32, 16  ;;  %v3782_v4 = vpop.permute.xlu0 %3781 }
 0x4e3   : > { %v5057_v44 = vcombine.low %v5048_v34, %v5056_v9  ;;  %v5058_v51 = vcombine.high %v5048_v34, %v5056_v9  ;;  %v8870_v61 = vrot.slane %v1478_v15, %v8568_v11  ;;  %v1831_v37 = vcombine.high %v1466_v8, %v8566_v28 }
 0x4e4   : > { %v5107_v36 = vcombine.low %v5098_v62, %v5106_v17  ;;  %v5108_v52 = vcombine.high %v5098_v62, %v5106_v17  ;;  %v8874_v0 = vrot.slane %v2014_v30, %v8568_v11  ;;  %v8876_v22 = vpack.i.b16 %v1469_v59, %v1468_v7 }
 0x4e5   : > { %v5812_v26 = vshrl.u32 %v5057_v44, 16  ;;  %v5818_v48 = vshrl.u32 %v5058_v51, 16  ;;  %v8879_v6 = vrot.slane %v1466_v8, %v8568_v11  ;;  %v1482_v25 = vpack.i.b16 %v1409_v2, %v8846_v58  ;;  %v3784_v58 = vpop.permute.xlu1 %3783 }
 0x4e6   : > { %v5811_v24 = vpack.i.b16 %v5107_v36, %v5057_v44  ;;  %v5813_v46 = vshrl.u32 %v5107_v36, 16  ;;  %v5817_v16 = vpack.i.b16 %v5108_v52, %v5058_v51  ;;  %v5819_v19 = vshrl.u32 %v5108_v52, 16 }
 0x4e7   : > { %v8883_v32 = vrot.slane %v1831_v37, %v8568_v11  ;;  %v1897_v42 = vcombine.high %v8876_v22, %v8566_v28  ;;  %v8897_v54 = vrot.slane %v8876_v22, %v8568_v11  ;;  %v1485_v62 = vshrl.u32 %v1409_v2, 16 }
 0x4e8   : > { %v5814_v20 = vpack.i.b16 %v5813_v46, %v5812_v26  ;;  %v5820_v12 = vpack.i.b16 %v5819_v19, %v5818_v48  ;;  %v7156_v55 = vcombine.low %v5811_v24, %v5811_v24  ;;  %v7157_v13 = vcombine.high %v5811_v24, %v5811_v24 }
 0x4e9   : > { %v7188_v31 = vcombine.low %v5817_v16, %v5817_v16  ;;  %v7189_v1 = vcombine.high %v5817_v16, %v5817_v16  ;;  %v1963_v17 = vcombine.high %v1482_v25, %v8566_v28  ;;  %v1970_v8 = vrot.slane %v1482_v25, %v8568_v11 }
 0x4ea   : > { %v7172_v7 = vcombine.low %v5814_v20, %v5814_v20  ;;  %v7173_v34 = vcombine.high %v5814_v20, %v5814_v20  ;;  %v7204_v9 = vcombine.low %v5820_v12, %v5820_v12  ;;  %v7205_v15 = vcombine.high %v5820_v12, %v5820_v12  ;;  %6097 = vst.msk [vmem:[%s8768_s25] sm:$0xf] %vm3696_vm0, %v7156_v55  ;;  %v3798_v12 = vpop.permute.xlu0 %3797 }
 0x4eb   : > { %6098 = vst.msk [vmem:[%s8768_s25 + $0x4] sm:$0xf] %vm3696_vm0, %v7157_v13  ;;  %6129 = vst.msk [vmem:[%s8768_s25 + $0x80] sm:$0xf] %vm3696_vm0, %v7188_v31  ;;  %v3859_v44 = vpack.i.b16 %v3782_v4, %v8468_v60  ;;  %v3862_v51 = vshrl.u32 %v3782_v4, 16  ;;  %v3875_v30 = vpack.i.b16 %v3784_v58, %v8464_v56  ;;  %v3878_v36 = vshrl.u32 %v3784_v58, 16 }
 0x4ec   : > { %6130 = vst.msk [vmem:[%s8768_s25 + $0x84] sm:$0xf] %vm3696_vm0, %v7189_v1  ;;  %6113 = vst.msk [vmem:[%s8768_s25 + $0x40] sm:$0xf] %vm3696_vm0, %v7172_v7  ;;  %v1486_v52 = vpack.i.b16 %v1485_v62, %v1484_v50  ;;  %v1977_v2 = vrot.slane %v1963_v17, %v8568_v11  ;;  %v1978_v59 = vcombine.low %v1955_v38, %v1970_v8 }
 0x4ed   : > { %6114 = vst.msk [vmem:[%s8768_s25 + $0x44] sm:$0xf] %vm3696_vm0, %v7173_v34  ;;  %6145 = vst.msk [vmem:[%s8768_s25 + $0xc0] sm:$0xf] %vm3696_vm0, %v7204_v9  ;;  %v1979_v26 = vcombine.high %v1955_v38, %v1970_v8  ;;  %v3863_v48 = vpack.i.b16 %v3862_v51, %v3861_v21  ;;  %v4217_v37 = vcombine.high %v3859_v44, %v8566_v28 }
 0x4ee   : > { %6146 = vst.msk [vmem:[%s8768_s25 + $0xc4] sm:$0xf] %vm3696_vm0, %v7205_v15  ;;  %v8916_v24 = vrot.slane %v3859_v44, %v8568_v11  ;;  %v3879_v46 = vpack.i.b16 %v3878_v36, %v3877_v39  ;;  %v1986_v16 = vrot.slane %v1978_v59, %v8572_v10  ;;  %v1994_v50 = vcombine.low %v8867_v5, %v1977_v2  ;;  %v3800_v44 = vpop.permute.xlu1 %3799 }
 0x4ef   : > { %v1993_v19 = vrot.slane %v1979_v26, %v8572_v10  ;;  %v1995_v25 = vcombine.high %v8867_v5, %v1977_v2  ;;  %v2029_v38 = vcombine.high %v1486_v52, %v8566_v28  ;;  %v2036_v60 = vrot.slane %v1486_v52, %v8568_v11 }
 0x4f0   : > { %v8927_v21 = vrot.slane %v4217_v37, %v8568_v11  ;;  %v4283_v20 = vcombine.high %v3863_v48, %v8566_v28  ;;  %v2002_v56 = vrot.slane %v1994_v50, %v8572_v10  ;;  %v8936_v4 = vrot.slane %v3863_v48, %v8568_v11  ;;  %v3814_v37 = vpop.permute.xlu0 %3813 }
 0x4f1   : > { %v2009_v39 = vrot.slane %v1995_v25, %v8572_v10  ;;  %v2908_v55 = vcombine.low %v1986_v16, %v1993_v19  ;;  %v7040_v13 = vcombine.high %v1986_v16, %v1993_v19  ;;  %v2043_v31 = vrot.slane %v2029_v38, %v8568_v11 }
 0x4f2   : > { %v2044_v5 = vcombine.low %v8870_v61, %v2036_v60  ;;  %v2045_v1 = vcombine.high %v8870_v61, %v2036_v60  ;;  %v8947_v52 = vrot.slane %v4283_v20, %v8568_v11  ;;  %v8954_v50 = vrot.slane %v3875_v30, %v8568_v11 }
 0x4f3   : > { %v2915_v58 = vrot.slane %v2908_v55, %v8568_v11  ;;  %v2923_v7 = vrot.slane %v7040_v13, %v8568_v11  ;;  %v2924_v34 = vcombine.low %v2002_v56, %v2009_v39  ;;  %v7041_v9 = vcombine.high %v2002_v56, %v2009_v39 }
 0x4f4   : > { %v2052_v15 = vrot.slane %v2044_v5, %v8572_v10  ;;  %v2059_v62 = vrot.slane %v2045_v1, %v8572_v10  ;;  %v2060_v17 = vcombine.low %v8874_v0, %v2043_v31  ;;  %v2061_v8 = vcombine.high %v8874_v0, %v2043_v31 }
 0x4f5   : > { %v2931_v61 = vrot.slane %v2924_v34, %v8568_v11  ;;  %v2939_v51 = vrot.slane %v7041_v9, %v8568_v11  ;;  %v2940_v36 = vcombine.low %v2915_v58, %v2923_v7  ;;  %v4349_v0 = vcombine.high %v3875_v30, %v8566_v28  ;;  %v3816_v58 = vpop.permute.xlu1 %3815 }
 0x4f6   : > { %v2068_v2 = vrot.slane %v2060_v17, %v8572_v10  ;;  %v2075_v59 = vrot.slane %v2061_v8, %v8572_v10  ;;  %v2958_v26 = vcombine.low %v2052_v15, %v2059_v62  ;;  %v7042_v48 = vcombine.high %v2052_v15, %v2059_v62 }
 0x4f7   : > { %v2947_v16 = vrot.slane %v2940_v36, %v8572_v10  ;;  %v2948_v19 = vcombine.low %v2931_v61, %v2939_v51  ;;  %v8960_v39 = vrot.slane %v4349_v0, %v8568_v11  ;;  %v4415_v55 = vcombine.high %v3879_v46, %v8566_v28 }
 0x4f8   : > { %v2965_v25 = vrot.slane %v2958_v26, %v8568_v11  ;;  %v2973_v38 = vrot.slane %v7042_v48, %v8568_v11  ;;  %v2974_v60 = vcombine.low %v2068_v2, %v2075_v59  ;;  %v7043_v20 = vcombine.high %v2068_v2, %v2075_v59 }
 0x4f9   : > { %v2955_v56 = vrot.slane %v2948_v19, %v8572_v10  ;;  %v8964_v13 = vrot.slane %v3879_v46, %v8568_v11  ;;  %v3869_v1 = vshrl.u32 %v3798_v12, 16  ;;  %v8969_v9 = vrot.slane %v4415_v55, %v8568_v11  ;;  %v8972_v46 = vpop.permute.xlu0 %1378 }
 0x4fa   : > { %v2981_v31 = vrot.slane %v2974_v60, %v8568_v11  ;;  %v2989_v30 = vrot.slane %v7043_v20, %v8568_v11  ;;  %v2990_v5 = vcombine.low %v2965_v25, %v2973_v38  ;;  %v3885_v15 = vshrl.u32 %v3800_v44, 16 }
 0x4fb   : > { %v2956_v7 = vcombine.low %v2947_v16, %v2955_v56  ;;  %v2957_v34 = vcombine.high %v2947_v16, %v2955_v56  ;;  %v3867_v8 = vpack.i.b16 %v3814_v37, %v3798_v12  ;;  %v3870_v61 = vshrl.u32 %v3814_v37, 16 }
 0x4fc   : > { %v2997_v62 = vrot.slane %v2990_v5, %v8572_v10  ;;  %v2998_v17 = vcombine.low %v2981_v31, %v2989_v30  ;;  %v3883_v2 = vpack.i.b16 %v3816_v58, %v3800_v44  ;;  %v3886_v59 = vshrl.u32 %v3816_v58, 16 }
 0x4fd   : > { %v3447_v51 = vshrl.u32 %v2956_v7, 16  ;;  %v3453_v36 = vshrl.u32 %v2957_v34, 16  ;;  %v3871_v48 = vpack.i.b16 %v3870_v61, %v3869_v1  ;;  %v4232_v16 = vcombine.high %v3867_v8, %v8566_v28 }
 0x4fe   : > { %v3005_v26 = vrot.slane %v2998_v17, %v8572_v10  ;;  %v4239_v19 = vrot.slane %v3867_v8, %v8568_v11  ;;  %v8977_v0 = vpack.i.b16 %v3886_v59, %v3885_v15  ;;  %v4364_v25 = vcombine.high %v3883_v2, %v8566_v28 }
 0x4ff   : > { %v8981_v12 = vrot.slane %v3883_v2, %v8568_v11  ;;  %v8985_v37 = vpack.i.b16 %v8972_v46, %v8492_v3  ;;  %v4246_v60 = vrot.slane %v4232_v16, %v8568_v11  ;;  %v4298_v55 = vcombine.high %v3871_v48, %v8566_v28 }
 0x500   : > { %v3006_v44 = vcombine.low %v2997_v62, %v3005_v26  ;;  %v3007_v38 = vcombine.high %v2997_v62, %v3005_v26  ;;  %v4247_v20 = vcombine.low %v8916_v24, %v4239_v19  ;;  %v4248_v56 = vcombine.high %v8916_v24, %v4239_v19 }
 0x501   : > { %v4305_v31 = vrot.slane %v3871_v48, %v8568_v11  ;;  %v8993_v30 = vrot.slane %v4364_v25, %v8568_v11  ;;  %v4263_v8 = vcombine.low %v8927_v21, %v4246_v60  ;;  %v4264_v24 = vcombine.high %v8927_v21, %v4246_v60 }
 0x502   : > { %v3446_v5 = vpack.i.b16 %v3006_v44, %v2956_v7  ;;  %v3448_v1 = vshrl.u32 %v3006_v44, 16  ;;  %v3452_v58 = vpack.i.b16 %v3007_v38, %v2957_v34  ;;  %v3454_v15 = vshrl.u32 %v3007_v38, 16 }
 0x503   : > { %v4255_v17 = vrot.slane %v4247_v20, %v8572_v10  ;;  %v4262_v62 = vrot.slane %v4248_v56, %v8572_v10  ;;  %v4271_v48 = vrot.slane %v4263_v8, %v8572_v10  ;;  %v4278_v16 = vrot.slane %v4264_v24, %v8572_v10 }
 0x504   : > { %v3449_v61 = vpack.i.b16 %v3448_v1, %v3447_v51  ;;  %v3455_v2 = vpack.i.b16 %v3454_v15, %v3453_v36  ;;  %v7066_v59 = vcombine.low %v3446_v5, %v3446_v5  ;;  %v7067_v26 = vcombine.high %v3446_v5, %v3446_v5 }
 0x505   : > { %v7098_v7 = vcombine.low %v3452_v58, %v3452_v58  ;;  %v7099_v34 = vcombine.high %v3452_v58, %v3452_v58  ;;  %v4312_v21 = vrot.slane %v4298_v55, %v8568_v11  ;;  %v4313_v51 = vcombine.low %v8936_v4, %v4305_v31 }
 0x506   : > { %v7082_v19 = vcombine.low %v3449_v61, %v3449_v61  ;;  %v7083_v25 = vcombine.high %v3449_v61, %v3449_v61  ;;  %v7114_v44 = vcombine.low %v3455_v2, %v3455_v2  ;;  %v7115_v38 = vcombine.high %v3455_v2, %v3455_v2  ;;  %3703 = vst.msk [vmem:[%s8684_s29 + $0x18] sm:$0xf] %vm3696_vm0, %v7066_v59 }
 0x507   : > { %3704 = vst.msk [vmem:[%s8684_s29 + $0x1c] sm:$0xf] %vm3696_vm0, %v7067_v26  ;;  %3735 = vst.msk [vmem:[%s8684_s29 + $0x98] sm:$0xf] %vm3696_vm0, %v7098_v7  ;;  %v4314_v36 = vcombine.high %v8936_v4, %v4305_v31  ;;  %v5209_v60 = vcombine.low %v4255_v17, %v4262_v62  ;;  %v7132_v20 = vcombine.high %v4255_v17, %v4262_v62 }
 0x508   : > { %3736 = vst.msk [vmem:[%s8684_s29 + $0x9c] sm:$0xf] %vm3696_vm0, %v7099_v34  ;;  %3719 = vst.msk [vmem:[%s8684_s29 + $0x58] sm:$0xf] %vm3696_vm0, %v7082_v19  ;;  %v5225_v56 = vcombine.low %v4271_v48, %v4278_v16  ;;  %v7133_v5 = vcombine.high %v4271_v48, %v4278_v16  ;;  %v4379_v1 = vcombine.low %v8954_v50, %v8981_v12 }
 0x509   : > { %3720 = vst.msk [vmem:[%s8684_s29 + $0x5c] sm:$0xf] %vm3696_vm0, %v7083_v25  ;;  %3751 = vst.msk [vmem:[%s8684_s29 + $0xd8] sm:$0xf] %vm3696_vm0, %v7114_v44  ;;  %v4321_v55 = vrot.slane %v4313_v51, %v8572_v10  ;;  %v4328_v58 = vrot.slane %v4314_v36, %v8572_v10  ;;  %v4329_v4 = vcombine.low %v8947_v52, %v4312_v21 }
 0x50a   : > { %3752 = vst.msk [vmem:[%s8684_s29 + $0xdc] sm:$0xf] %vm3696_vm0, %v7115_v38  ;;  %v4330_v31 = vcombine.high %v8947_v52, %v4312_v21  ;;  %v5216_v15 = vrot.slane %v5209_v60, %v8568_v11  ;;  %v5224_v8 = vrot.slane %v7132_v20, %v8568_v11  ;;  %v5232_v24 = vrot.slane %v5225_v56, %v8568_v11 }
 0x50b   : > { %v5240_v17 = vrot.slane %v7133_v5, %v8568_v11  ;;  %v4337_v62 = vrot.slane %v4329_v4, %v8572_v10  ;;  %v5259_v2 = vcombine.low %v4321_v55, %v4328_v58  ;;  %v7134_v59 = vcombine.high %v4321_v55, %v4328_v58 }
 0x50c   : > { %v4344_v61 = vrot.slane %v4330_v31, %v8572_v10  ;;  %v5241_v26 = vcombine.low %v5216_v15, %v5224_v8  ;;  %v4380_v34 = vcombine.high %v8954_v50, %v8981_v12  ;;  %v4387_v52 = vrot.slane %v4379_v1, %v8572_v10 }
 0x50d   : > { %v5249_v7 = vcombine.low %v5232_v24, %v5240_v17  ;;  %v5266_v48 = vrot.slane %v5259_v2, %v8568_v11  ;;  %v5274_v16 = vrot.slane %v7134_v59, %v8568_v11  ;;  %v4395_v51 = vcombine.low %v8960_v39, %v8993_v30 }
 0x50e   : > { %v5275_v19 = vcombine.low %v4337_v62, %v4344_v61  ;;  %v7135_v25 = vcombine.high %v4337_v62, %v4344_v61  ;;  %v5248_v44 = vrot.slane %v5241_v26, %v8572_v10  ;;  %v4394_v21 = vrot.slane %v4380_v34, %v8572_v10 }
 0x50f   : > { %v5256_v38 = vrot.slane %v5249_v7, %v8572_v10  ;;  %v5291_v12 = vcombine.low %v5266_v48, %v5274_v16  ;;  %v4396_v60 = vcombine.high %v8960_v39, %v8993_v30  ;;  %v4403_v5 = vrot.slane %v4395_v51, %v8572_v10 }
 0x510   : > { %v5282_v36 = vrot.slane %v5275_v19, %v8568_v11  ;;  %v5290_v50 = vrot.slane %v7135_v25, %v8568_v11  ;;  %v4430_v1 = vcombine.high %v8977_v0, %v8566_v28  ;;  %v4437_v31 = vrot.slane %v8977_v0, %v8568_v11 }
 0x511   : > { %v5257_v20 = vcombine.low %v5248_v44, %v5256_v38  ;;  %v5258_v56 = vcombine.high %v5248_v44, %v5256_v38  ;;  %v5298_v55 = vrot.slane %v5291_v12, %v8572_v10  ;;  %v4410_v4 = vrot.slane %v4396_v60, %v8572_v10 }
 0x512   : > { %v5299_v58 = vcombine.low %v5282_v36, %v5290_v50  ;;  %v4444_v24 = vrot.slane %v4430_v1, %v8568_v11  ;;  %v5309_v39 = vcombine.low %v4387_v52, %v4394_v21  ;;  %v4445_v17 = vcombine.low %v8964_v13, %v4437_v31 }
 0x513   : > { %v5836_v15 = vshrl.u32 %v5257_v20, 16  ;;  %v5842_v8 = vshrl.u32 %v5258_v56, 16  ;;  %v4446_v62 = vcombine.high %v8964_v13, %v4437_v31  ;;  %v7136_v61 = vcombine.high %v4387_v52, %v4394_v21 }
 0x514   : > { %v5306_v30 = vrot.slane %v5299_v58, %v8572_v10  ;;  %v4461_v2 = vcombine.low %v8969_v9, %v4444_v24  ;;  %v4462_v59 = vcombine.high %v8969_v9, %v4444_v24  ;;  %v5316_v26 = vrot.slane %v5309_v39, %v8568_v11  ;;  %v1375_v39 = vpop.permute.xlu1 %1374 }
 0x515   : > { %v5325_v7 = vcombine.low %v4403_v5, %v4410_v4  ;;  %v4453_v48 = vrot.slane %v4445_v17, %v8572_v10  ;;  %v4460_v16 = vrot.slane %v4446_v62, %v8572_v10  ;;  %v5324_v13 = vrot.slane %v7136_v61, %v8568_v11 }
 0x516   : > { %v5307_v0 = vcombine.low %v5298_v55, %v5306_v30  ;;  %v5308_v34 = vcombine.high %v5298_v55, %v5306_v30  ;;  %v4469_v19 = vrot.slane %v4461_v2, %v8572_v10  ;;  %v4476_v25 = vrot.slane %v4462_v59, %v8572_v10 }
 0x517   : > { %v5332_v52 = vrot.slane %v5325_v7, %v8568_v11  ;;  %v7137_v51 = vcombine.high %v4403_v5, %v4410_v4  ;;  %v5341_v36 = vcombine.low %v5316_v26, %v5324_v13  ;;  %v5359_v50 = vcombine.low %v4453_v48, %v4460_v16 }
 0x518   : > { %v5835_v44 = vpack.i.b16 %v5307_v0, %v5257_v20  ;;  %v5837_v38 = vshrl.u32 %v5307_v0, 16  ;;  %v5841_v9 = vpack.i.b16 %v5308_v34, %v5258_v56  ;;  %v5843_v21 = vshrl.u32 %v5308_v34, 16 }
 0x519   : > { %v7138_v12 = vcombine.high %v4453_v48, %v4460_v16  ;;  %v9070_v20 = vrot.slane %v1897_v42, %v8568_v11  ;;  %v5340_v4 = vrot.slane %v7137_v51, %v8568_v11  ;;  %v5366_v42 = vrot.slane %v5359_v50, %v8568_v11 }
 0x51a   : > { %v5838_v60 = vpack.i.b16 %v5837_v38, %v5836_v15  ;;  %v5844_v1 = vpack.i.b16 %v5843_v21, %v5842_v8  ;;  %v7160_v55 = vcombine.low %v5835_v44, %v5835_v44  ;;  %v7161_v58 = vcombine.high %v5835_v44, %v5835_v44 }
 0x51b   : > { %v7192_v56 = vcombine.low %v5841_v9, %v5841_v9  ;;  %v7193_v5 = vcombine.high %v5841_v9, %v5841_v9  ;;  %v5349_v22 = vcombine.low %v5332_v52, %v5340_v4  ;;  %v5374_v30 = vrot.slane %v7138_v12, %v8568_v11 }
 0x51c   : > { %v7176_v31 = vcombine.low %v5838_v60, %v5838_v60  ;;  %v7177_v15 = vcombine.high %v5838_v60, %v5838_v60  ;;  %v7208_v24 = vcombine.low %v5844_v1, %v5844_v1  ;;  %v7209_v8 = vcombine.high %v5844_v1, %v5844_v1  ;;  %6101 = vst.msk [vmem:[%s8768_s25 + $0x10] sm:$0xf] %vm3696_vm0, %v7160_v55 }
 0x51d   : > { %6102 = vst.msk [vmem:[%s8768_s25 + $0x14] sm:$0xf] %vm3696_vm0, %v7161_v58  ;;  %6133 = vst.msk [vmem:[%s8768_s25 + $0x90] sm:$0xf] %vm3696_vm0, %v7192_v56  ;;  %v5375_v17 = vcombine.low %v4469_v19, %v4476_v25  ;;  %v5348_v62 = vrot.slane %v5341_v36, %v8572_v10  ;;  %v7139_v61 = vcombine.high %v4469_v19, %v4476_v25  ;;  %v1493_v2 = vshrl.u32 %v8972_v46, 16 }
 0x51e   : > { %6134 = vst.msk [vmem:[%s8768_s25 + $0x94] sm:$0xf] %vm3696_vm0, %v7193_v5  ;;  %6117 = vst.msk [vmem:[%s8768_s25 + $0x50] sm:$0xf] %vm3696_vm0, %v7176_v31  ;;  %v2080_v59 = vcombine.high %v8985_v37, %v8566_v28  ;;  %v5356_v26 = vrot.slane %v5349_v22, %v8572_v10  ;;  %v5391_v0 = vcombine.low %v5366_v42, %v5374_v30  ;;  %v1461_v46 = vshrl.u32 %v1375_v39, 16 }
 0x51f   : > { %6118 = vst.msk [vmem:[%s8768_s25 + $0x54] sm:$0xf] %vm3696_vm0, %v7177_v15  ;;  %6149 = vst.msk [vmem:[%s8768_s25 + $0xd0] sm:$0xf] %vm3696_vm0, %v7208_v24  ;;  %v5382_v7 = vrot.slane %v5375_v17, %v8568_v11  ;;  %v1458_v34 = vpack.i.b16 %v1375_v39, %v8466_v29  ;;  %v5390_v48 = vrot.slane %v7139_v61, %v8568_v11 }
 0x520   : > { %6150 = vst.msk [vmem:[%s8768_s25 + $0xd4] sm:$0xf] %vm3696_vm0, %v7209_v8  ;;  %v9101_v16 = vpack.i.b16 %v1493_v2, %v1492_v43  ;;  %v9105_v19 = vrot.slane %v8985_v37, %v8568_v11  ;;  %v5357_v25 = vcombine.low %v5348_v62, %v5356_v26  ;;  %v5358_v13 = vcombine.high %v5348_v62, %v5356_v26  ;;  %v9139_v2 = vpop.permute.xlu0 %1394 }
 0x521   : > { %v9108_v52 = vrot.slane %v2080_v59, %v8568_v11  ;;  %v1816_v44 = vcombine.high %v1458_v34, %v8566_v28  ;;  %v5398_v38 = vrot.slane %v5391_v0, %v8572_v10  ;;  %v5399_v9 = vcombine.low %v5382_v7, %v5390_v48 }
 0x522   : > { %v2146_v3 = vcombine.high %v9101_v16, %v8566_v28  ;;  %v1462_v43 = vpack.i.b16 %v1461_v46, %v1460_v23  ;;  %v5848_v21 = vshrl.u32 %v5357_v25, 16  ;;  %v9118_v37 = vrot.slane %v9101_v16, %v8568_v11 }
 0x523   : > { %v1823_v51 = vrot.slane %v1458_v34, %v8568_v11  ;;  %v1830_v36 = vrot.slane %v1816_v44, %v8568_v11  ;;  %v5406_v50 = vrot.slane %v5399_v9, %v8572_v10  ;;  %v5854_v12 = vshrl.u32 %v5358_v13, 16 }
 0x524   : > { %v1882_v60 = vcombine.high %v1462_v43, %v8566_v28  ;;  %v1889_v1 = vrot.slane %v1462_v43, %v8568_v11 }
 0x525   : > { %v1846_v55 = vcombine.low %v1823_v51, %v8879_v6  ;;  %v1847_v29 = vcombine.high %v1823_v51, %v8879_v6  ;;  %v1862_v23 = vcombine.low %v1830_v36, %v8883_v32  ;;  %v1863_v58 = vcombine.high %v1830_v36, %v8883_v32 }
 0x526   : > { %v5407_v56 = vcombine.low %v5398_v38, %v5406_v50  ;;  %v5408_v5 = vcombine.high %v5398_v38, %v5406_v50  ;;  %v1896_v4 = vrot.slane %v1882_v60, %v8568_v11  ;;  %v1912_v31 = vcombine.low %v1889_v1, %v8897_v54 }
 0x527   : > { %v1854_v15 = vrot.slane %v1846_v55, %v8572_v10  ;;  %v1861_v24 = vrot.slane %v1847_v29, %v8572_v10  ;;  %v1870_v8 = vrot.slane %v1862_v23, %v8572_v10  ;;  %v1877_v39 = vrot.slane %v1863_v58, %v8572_v10  ;;  %v1411_v23 = vpop.permute.xlu0 %1410 }
 0x528   : > { %v5847_v22 = vpack.i.b16 %v5407_v56, %v5357_v25  ;;  %v5849_v6 = vshrl.u32 %v5407_v56, 16  ;;  %v5853_v42 = vpack.i.b16 %v5408_v5, %v5358_v13  ;;  %v5855_v30 = vshrl.u32 %v5408_v5, 16 }
 0x529   : > { %v1913_v32 = vcombine.high %v1889_v1, %v8897_v54  ;;  %v1920_v17 = vrot.slane %v1912_v31, %v8572_v10  ;;  %v1928_v62 = vcombine.low %v1896_v4, %v9070_v20  ;;  %v1929_v61 = vcombine.high %v1896_v4, %v9070_v20 }
 0x52a   : > { %v5850_v59 = vpack.i.b16 %v5849_v6, %v5848_v21  ;;  %v5856_v26 = vpack.i.b16 %v5855_v30, %v5854_v12  ;;  %v7162_v7 = vcombine.low %v5847_v22, %v5847_v22  ;;  %v7163_v0 = vcombine.high %v5847_v22, %v5847_v22  ;;  %v1381_v12 = vpop.permute.xlu1 %1380 }
 0x52b   : > { %v7194_v34 = vcombine.low %v5853_v42, %v5853_v42  ;;  %v7195_v48 = vcombine.high %v5853_v42, %v5853_v42  ;;  %v1927_v54 = vrot.slane %v1913_v32, %v8572_v10  ;;  %v1936_v16 = vrot.slane %v1928_v62, %v8572_v10 }
 0x52c   : > { %v7178_v46 = vcombine.low %v5850_v59, %v5850_v59  ;;  %v7179_v20 = vcombine.high %v5850_v59, %v5850_v59  ;;  %v7210_v25 = vcombine.low %v5856_v26, %v5856_v26  ;;  %v7211_v13 = vcombine.high %v5856_v26, %v5856_v26  ;;  %6103 = vst.msk [vmem:[%s8768_s25 + $0x18] sm:$0xf] %vm3696_vm0, %v7162_v7 }
 0x52d   : > { %6104 = vst.msk [vmem:[%s8768_s25 + $0x1c] sm:$0xf] %vm3696_vm0, %v7163_v0  ;;  %6135 = vst.msk [vmem:[%s8768_s25 + $0x98] sm:$0xf] %vm3696_vm0, %v7194_v34  ;;  %v1943_v44 = vrot.slane %v1929_v61, %v8572_v10  ;;  %v2808_v38 = vcombine.low %v1854_v15, %v1861_v24  ;;  %v7036_v9 = vcombine.high %v1854_v15, %v1861_v24  ;;  %v1509_v24 = vshrl.u32 %v1381_v12, 16 }
 0x52e   : > { %6136 = vst.msk [vmem:[%s8768_s25 + $0x9c] sm:$0xf] %vm3696_vm0, %v7195_v48  ;;  %v2824_v43 = vcombine.low %v1870_v8, %v1877_v39  ;;  %6119 = vst.msk [vmem:[%s8768_s25 + $0x58] sm:$0xf] %vm3696_vm0, %v7178_v46  ;;  %v9161_v21 = vrot.slane %v2146_v3, %v8568_v11  ;;  %v7037_v51 = vcombine.high %v1870_v8, %v1877_v39  ;;  %v1500_v30 = vshrl.u32 %v9139_v2, 16 }
 0x52f   : > { %6120 = vst.msk [vmem:[%s8768_s25 + $0x5c] sm:$0xf] %vm3696_vm0, %v7179_v20  ;;  %6151 = vst.msk [vmem:[%s8768_s25 + $0xd8] sm:$0xf] %vm3696_vm0, %v7210_v25  ;;  %v2858_v36 = vcombine.low %v1920_v17, %v1927_v54  ;;  %v7038_v50 = vcombine.high %v1920_v17, %v1927_v54  ;;  %v2815_v60 = vrot.slane %v2808_v38, %v8568_v11  ;;  %v1501_v26 = vshrl.u32 %v1411_v23, 16 }
 0x530   : > { %6152 = vst.msk [vmem:[%s8768_s25 + $0xdc] sm:$0xf] %vm3696_vm0, %v7211_v13  ;;  %v2823_v1 = vrot.slane %v7036_v9, %v8568_v11  ;;  %v2831_v55 = vrot.slane %v2824_v43, %v8568_v11  ;;  %v2874_v29 = vcombine.low %v1936_v16, %v1943_v44  ;;  %v2839_v58 = vrot.slane %v7037_v51, %v8568_v11 }
 0x531   : > { %v2865_v56 = vrot.slane %v2858_v36, %v8568_v11  ;;  %v2873_v5 = vrot.slane %v7038_v50, %v8568_v11  ;;  %v7039_v3 = vcombine.high %v1936_v16, %v1943_v44  ;;  %v1506_v15 = vpack.i.b16 %v1381_v12, %v8490_v53 }
 0x532   : > { %v2840_v4 = vcombine.low %v2815_v60, %v2823_v1  ;;  %v2881_v31 = vrot.slane %v2874_v29, %v8568_v11  ;;  %v2848_v8 = vcombine.low %v2831_v55, %v2839_v58  ;;  %v1498_v6 = vpack.i.b16 %v1411_v23, %v9139_v2 }
 0x533   : > { %v2889_v39 = vrot.slane %v7039_v3, %v8568_v11  ;;  %v2890_v22 = vcombine.low %v2865_v56, %v2873_v5  ;;  %v1510_v32 = vpack.i.b16 %v1509_v24, %v1508_v45  ;;  %v2212_v17 = vcombine.high %v1506_v15, %v8566_v28 }
 0x534   : > { %v2847_v42 = vrot.slane %v2840_v4, %v8572_v10  ;;  %v2855_v62 = vrot.slane %v2848_v8, %v8572_v10  ;;  %v9180_v59 = vrot.slane %v1506_v15, %v8568_v11  ;;  %v2095_v2 = vcombine.high %v1498_v6, %v8566_v28  ;;  %v9207_v8 = vpop.permute.xlu1 %1396 }
 0x535   : > { %v2898_v61 = vcombine.low %v2881_v31, %v2889_v39  ;;  %v2897_v7 = vrot.slane %v2890_v22, %v8572_v10  ;;  %v9184_v0 = vrot.slane %v2212_v17, %v8568_v11  ;;  %v2278_v34 = vcombine.high %v1510_v32, %v8566_v28  ;;  %v1383_v39 = vpop.permute.xlu0 %1382 }
 0x536   : > { %v2856_v53 = vcombine.low %v2847_v42, %v2855_v62  ;;  %v2857_v45 = vcombine.high %v2847_v42, %v2855_v62  ;;  %v9190_v54 = vrot.slane %v1510_v32, %v8568_v11  ;;  %v1502_v46 = vpack.i.b16 %v1501_v26, %v1500_v30 }
 0x537   : > { %v2905_v48 = vrot.slane %v2898_v61, %v8572_v10  ;;  %v9193_v16 = vrot.slane %v2278_v34, %v8568_v11  ;;  %v2102_v20 = vrot.slane %v1498_v6, %v8568_v11  ;;  %v2109_v25 = vrot.slane %v2095_v2, %v8568_v11 }
 0x538   : > { %v3435_v38 = vshrl.u32 %v2856_v53, 16  ;;  %v3441_v9 = vshrl.u32 %v2857_v45, 16  ;;  %v2161_v15 = vcombine.high %v1502_v46, %v8566_v28  ;;  %v2168_v24 = vrot.slane %v1502_v46, %v8568_v11 }
 0x539   : > { %v2906_v13 = vcombine.low %v2897_v7, %v2905_v48  ;;  %v2907_v44 = vcombine.high %v2897_v7, %v2905_v48  ;;  %v2110_v43 = vcombine.low %v9105_v19, %v2102_v20  ;;  %v2111_v51 = vcombine.high %v9105_v19, %v2102_v20 }
 0x53a   : > { %v2126_v36 = vcombine.low %v9108_v52, %v2109_v25  ;;  %v2127_v50 = vcombine.high %v9108_v52, %v2109_v25  ;;  %v2175_v32 = vrot.slane %v2161_v15, %v8568_v11  ;;  %v2176_v17 = vcombine.low %v9118_v37, %v2168_v24 }
 0x53b   : > { %v3434_v12 = vpack.i.b16 %v2906_v13, %v2856_v53  ;;  %v3436_v60 = vshrl.u32 %v2906_v13, 16  ;;  %v3440_v1 = vpack.i.b16 %v2907_v44, %v2857_v45  ;;  %v3442_v55 = vshrl.u32 %v2907_v44, 16 }
 0x53c   : > { %v2118_v29 = vrot.slane %v2110_v43, %v8572_v10  ;;  %v2125_v23 = vrot.slane %v2111_v51, %v8572_v10  ;;  %v2134_v58 = vrot.slane %v2126_v36, %v8572_v10  ;;  %v2141_v56 = vrot.slane %v2127_v50, %v8572_v10  ;;  %v1413_v51 = vpop.permute.xlu1 %1412  ;;  %v9239_v36 = vpop.permute.xlu0 %1398 }
 0x53d   : > { %v3437_v5 = vpack.i.b16 %v3436_v60, %v3435_v38  ;;  %v3443_v19 = vpack.i.b16 %v3442_v55, %v3441_v9  ;;  %v7064_v3 = vcombine.low %v3434_v12, %v3434_v12  ;;  %v7065_v52 = vcombine.high %v3434_v12, %v3434_v12 }
 0x53e   : > { %v7096_v4 = vcombine.low %v3440_v1, %v3440_v1  ;;  %v7097_v31 = vcombine.high %v3440_v1, %v3440_v1  ;;  %v2177_v62 = vcombine.high %v9118_v37, %v2168_v24  ;;  %v3008_v61 = vcombine.low %v2118_v29, %v2125_v23 }
 0x53f   : > { %v7080_v22 = vcombine.low %v3437_v5, %v3437_v5  ;;  %v7081_v6 = vcombine.high %v3437_v5, %v3437_v5  ;;  %v7112_v42 = vcombine.low %v3443_v19, %v3443_v19  ;;  %v7113_v30 = vcombine.high %v3443_v19, %v3443_v19  ;;  %3701 = vst.msk [vmem:[%s8684_s29 + $0x10] sm:$0xf] %vm3696_vm0, %v7064_v3 }
 0x540   : > { %3702 = vst.msk [vmem:[%s8684_s29 + $0x14] sm:$0xf] %vm3696_vm0, %v7065_v52  ;;  %3733 = vst.msk [vmem:[%s8684_s29 + $0x90] sm:$0xf] %vm3696_vm0, %v7096_v4  ;;  %v7044_v26 = vcombine.high %v2118_v29, %v2125_v23  ;;  %v3024_v7 = vcombine.low %v2134_v58, %v2141_v56  ;;  %v7045_v34 = vcombine.high %v2134_v58, %v2141_v56  ;;  %v1516_v5 = vshrl.u32 %v9207_v8, 16 }
 0x541   : > { %3734 = vst.msk [vmem:[%s8684_s29 + $0x94] sm:$0xf] %vm3696_vm0, %v7097_v31  ;;  %3717 = vst.msk [vmem:[%s8684_s29 + $0x50] sm:$0xf] %vm3696_vm0, %v7080_v22  ;;  %v1522_v2 = vpack.i.b16 %v1383_v39, %v8508_v41  ;;  %v2184_v53 = vrot.slane %v2176_v17, %v8572_v10  ;;  %v2191_v45 = vrot.slane %v2177_v62, %v8572_v10 }
 0x542   : > { %3718 = vst.msk [vmem:[%s8684_s29 + $0x54] sm:$0xf] %vm3696_vm0, %v7081_v6  ;;  %3749 = vst.msk [vmem:[%s8684_s29 + $0xd0] sm:$0xf] %vm3696_vm0, %v7112_v42  ;;  %v2192_v37 = vcombine.low %v9161_v21, %v2175_v32  ;;  %v2193_v48 = vcombine.high %v9161_v21, %v2175_v32  ;;  %v3015_v46 = vrot.slane %v3008_v61, %v8568_v11  ;;  %v1525_v21 = vshrl.u32 %v1383_v39, 16  ;;  %v9262_v32 = vpop.permute.xlu0 %1414 }
 0x543   : > { %3750 = vst.msk [vmem:[%s8684_s29 + $0xd4] sm:$0xf] %vm3696_vm0, %v7113_v30  ;;  %v3023_v20 = vrot.slane %v7044_v26, %v8568_v11  ;;  %v3031_v25 = vrot.slane %v3024_v7, %v8568_v11  ;;  %v3039_v13 = vrot.slane %v7045_v34, %v8568_v11  ;;  %v3058_v9 = vcombine.low %v2184_v53, %v2191_v45  ;;  %v1385_v30 = vpop.permute.xlu1 %1384 }
 0x544   : > { %v2200_v44 = vrot.slane %v2192_v37, %v8572_v10  ;;  %v2207_v38 = vrot.slane %v2193_v48, %v8572_v10  ;;  %v7046_v43 = vcombine.high %v2184_v53, %v2191_v45  ;;  %v2344_v60 = vcombine.high %v1522_v2, %v8566_v28 }
 0x545   : > { %v3040_v50 = vcombine.low %v3015_v46, %v3023_v20  ;;  %v3048_v12 = vcombine.low %v3031_v25, %v3039_v13  ;;  %v3065_v1 = vrot.slane %v3058_v9, %v8568_v11  ;;  %v1526_v19 = vpack.i.b16 %v1525_v21, %v1524_v40 }
 0x546   : > { %v3073_v55 = vrot.slane %v7046_v43, %v8568_v11  ;;  %v3074_v29 = vcombine.low %v2200_v44, %v2207_v38  ;;  %v7047_v23 = vcombine.high %v2200_v44, %v2207_v38  ;;  %v9252_v31 = vrot.slane %v1522_v2, %v8568_v11 }
 0x547   : > { %v3047_v58 = vrot.slane %v3040_v50, %v8572_v10  ;;  %v3055_v56 = vrot.slane %v3048_v12, %v8572_v10  ;;  %v9255_v39 = vrot.slane %v2344_v60, %v8568_v11  ;;  %v2410_v22 = vcombine.high %v1526_v19, %v8566_v28 }
 0x548   : > { %v3081_v3 = vrot.slane %v3074_v29, %v8568_v11  ;;  %v3089_v52 = vrot.slane %v7047_v23, %v8568_v11  ;;  %v3090_v4 = vcombine.low %v3065_v1, %v3073_v55  ;;  %v9259_v42 = vrot.slane %v1526_v19, %v8568_v11 }
 0x549   : > { %v3056_v15 = vcombine.low %v3047_v58, %v3055_v56  ;;  %v3057_v24 = vcombine.high %v3047_v58, %v3055_v56  ;;  %v1514_v41 = vpack.i.b16 %v1413_v51, %v9207_v8  ;;  %v1517_v40 = vshrl.u32 %v1413_v51, 16 }
 0x54a   : > { %v3098_v6 = vcombine.low %v3081_v3, %v3089_v52  ;;  %v3097_v17 = vrot.slane %v3090_v4, %v8572_v10  ;;  %v9266_v26 = vrot.slane %v2410_v22, %v8568_v11  ;;  %v1532_v8 = vshrl.u32 %v9239_v36, 16 }
 0x54b   : > { %v3459_v62 = vshrl.u32 %v3056_v15, 16  ;;  %v3465_v61 = vshrl.u32 %v3057_v24, 16  ;;  %v1518_v34 = vpack.i.b16 %v1517_v40, %v1516_v5  ;;  %v2227_v2 = vcombine.high %v1514_v41, %v8566_v28 }
 0x54c   : > { %v3105_v7 = vrot.slane %v3098_v6, %v8572_v10  ;;  %v2234_v53 = vrot.slane %v1514_v41, %v8568_v11  ;;  %v9273_v45 = vpack.i.b16 %v1385_v30, %v8506_v33  ;;  %v1541_v37 = vshrl.u32 %v1385_v30, 16 }
 0x54d   : > { %v1533_v48 = vshrl.u32 %v9262_v32, 16  ;;  %v2241_v25 = vrot.slane %v2227_v2, %v8568_v11  ;;  %v2293_v38 = vcombine.high %v1518_v34, %v8566_v28  ;;  %v2300_v9 = vrot.slane %v1518_v34, %v8568_v11 }
 0x54e   : > { %v3106_v46 = vcombine.low %v3097_v17, %v3105_v7  ;;  %v3107_v20 = vcombine.high %v3097_v17, %v3105_v7  ;;  %v2242_v13 = vcombine.low %v9180_v59, %v2234_v53  ;;  %v2243_v44 = vcombine.high %v9180_v59, %v2234_v53 }
 0x54f   : > { %v9283_v43 = vpack.i.b16 %v1541_v37, %v1540_v49  ;;  %v2258_v59 = vcombine.low %v9184_v0, %v2241_v25  ;;  %v2259_v55 = vcombine.high %v9184_v0, %v2241_v25  ;;  %v2307_v0 = vrot.slane %v2293_v38, %v8568_v11 }
 0x550   : > { %v3458_v51 = vpack.i.b16 %v3106_v46, %v3056_v15  ;;  %v3460_v50 = vshrl.u32 %v3106_v46, 16  ;;  %v3464_v12 = vpack.i.b16 %v3107_v20, %v3057_v24  ;;  %v3466_v21 = vshrl.u32 %v3107_v20, 16 }
 0x551   : > { %v2250_v60 = vrot.slane %v2242_v13, %v8572_v10  ;;  %v2257_v1 = vrot.slane %v2243_v44, %v8572_v10  ;;  %v2266_v5 = vrot.slane %v2258_v59, %v8572_v10  ;;  %v2273_v19 = vrot.slane %v2259_v55, %v8572_v10 }
 0x552   : > { %v3461_v29 = vpack.i.b16 %v3460_v50, %v3459_v62  ;;  %v3467_v33 = vpack.i.b16 %v3466_v21, %v3465_v61  ;;  %v7068_v49 = vcombine.low %v3458_v51, %v3458_v51  ;;  %v7069_v23 = vcombine.high %v3458_v51, %v3458_v51 }
 0x553   : > { %v7100_v58 = vcombine.low %v3464_v12, %v3464_v12  ;;  %v7101_v56 = vcombine.high %v3464_v12, %v3464_v12  ;;  %v2308_v24 = vcombine.low %v9190_v54, %v2300_v9  ;;  %v2309_v22 = vcombine.high %v9190_v54, %v2300_v9 }
 0x554   : > { %v7084_v3 = vcombine.low %v3461_v29, %v3461_v29  ;;  %v7085_v52 = vcombine.high %v3461_v29, %v3461_v29  ;;  %v7116_v4 = vcombine.low %v3467_v33, %v3467_v33  ;;  %v7117_v15 = vcombine.high %v3467_v33, %v3467_v33  ;;  %3705 = vst.msk [vmem:[%s8684_s29 + $0x20] sm:$0xf] %vm3696_vm0, %v7068_v49 }
 0x555   : > { %3706 = vst.msk [vmem:[%s8684_s29 + $0x24] sm:$0xf] %vm3696_vm0, %v7069_v23  ;;  %3737 = vst.msk [vmem:[%s8684_s29 + $0xa0] sm:$0xf] %vm3696_vm0, %v7100_v58  ;;  %v3108_v6 = vcombine.low %v2250_v60, %v2257_v1  ;;  %v7048_v41 = vcombine.high %v2250_v60, %v2257_v1  ;;  %v3124_v40 = vcombine.low %v2266_v5, %v2273_v19 }
 0x556   : > { %3738 = vst.msk [vmem:[%s8684_s29 + $0xa4] sm:$0xf] %vm3696_vm0, %v7101_v56  ;;  %3721 = vst.msk [vmem:[%s8684_s29 + $0x60] sm:$0xf] %vm3696_vm0, %v7084_v3  ;;  %v7049_v30 = vcombine.high %v2266_v5, %v2273_v19  ;;  %v2476_v17 = vcombine.high %v9273_v45, %v8566_v28  ;;  %v2316_v62 = vrot.slane %v2308_v24, %v8572_v10 }
 0x557   : > { %3722 = vst.msk [vmem:[%s8684_s29 + $0x64] sm:$0xf] %vm3696_vm0, %v7085_v52  ;;  %3753 = vst.msk [vmem:[%s8684_s29 + $0xe0] sm:$0xf] %vm3696_vm0, %v7116_v4  ;;  %v2323_v61 = vrot.slane %v2309_v22, %v8572_v10  ;;  %v2324_v54 = vcombine.low %v9193_v16, %v2307_v0  ;;  %v2325_v7 = vcombine.high %v9193_v16, %v2307_v0 }
 0x558   : > { %3754 = vst.msk [vmem:[%s8684_s29 + $0xe4] sm:$0xf] %vm3696_vm0, %v7117_v15  ;;  %v3115_v34 = vrot.slane %v3108_v6, %v8568_v11  ;;  %v3123_v2 = vrot.slane %v7048_v41, %v8568_v11  ;;  %v3131_v53 = vrot.slane %v3124_v40, %v8568_v11  ;;  %v3139_v37 = vrot.slane %v7049_v30, %v8568_v11 }
 0x559   : > { %v2332_v46 = vrot.slane %v2324_v54, %v8572_v10  ;;  %v2339_v20 = vrot.slane %v2325_v7, %v8572_v10  ;;  %v3158_v25 = vcombine.low %v2316_v62, %v2323_v61  ;;  %v7050_v13 = vcombine.high %v2316_v62, %v2323_v61 }
 0x55a   : > { %v3140_v44 = vcombine.low %v3115_v34, %v3123_v2  ;;  %v3148_v38 = vcombine.low %v3131_v53, %v3139_v37  ;;  %v9324_v16 = vrot.slane %v9273_v45, %v8568_v11  ;;  %v1530_v9 = vpack.i.b16 %v9262_v32, %v9239_v36 }
 0x55b   : > { %v3165_v51 = vrot.slane %v3158_v25, %v8568_v11  ;;  %v3173_v50 = vrot.slane %v7050_v13, %v8568_v11  ;;  %v3174_v12 = vcombine.low %v2332_v46, %v2339_v20  ;;  %v7051_v21 = vcombine.high %v2332_v46, %v2339_v20 }
 0x55c   : > { %v3147_v60 = vrot.slane %v3140_v44, %v8572_v10  ;;  %v3155_v1 = vrot.slane %v3148_v38, %v8572_v10  ;;  %v9337_v45 = vrot.slane %v2476_v17, %v8568_v11  ;;  %v2542_v59 = vcombine.high %v9283_v43, %v8566_v28 }
 0x55d   : > { %v3181_v55 = vrot.slane %v3174_v12, %v8568_v11  ;;  %v3189_v29 = vrot.slane %v7051_v21, %v8568_v11  ;;  %v3190_v33 = vcombine.low %v3165_v51, %v3173_v50  ;;  %v1534_v49 = vpack.i.b16 %v1533_v48, %v1532_v8 }
 0x55e   : > { %v9348_v23 = vcombine.low %v3147_v60, %v3155_v1  ;;  %v9350_v58 = vcombine.high %v3147_v60, %v3155_v1  ;;  %v9354_v56 = vrot.slane %v9283_v43, %v8568_v11  ;;  %v2359_v5 = vcombine.high %v1530_v9, %v8566_v28 }
 0x55f   : > { %v3197_v36 = vrot.slane %v3190_v33, %v8572_v10  ;;  %v3198_v32 = vcombine.low %v3181_v55, %v3189_v29  ;;  %v2366_v8 = vrot.slane %v1530_v9, %v8568_v11  ;;  %v2425_v48 = vcombine.high %v1534_v49, %v8566_v28 }
 0x560   : > { %v3471_v19 = vshrl.u32 %v9348_v23, 16  ;;  %v3477_v3 = vshrl.u32 %v9350_v58, 16  ;;  %v2373_v52 = vrot.slane %v2359_v5, %v8568_v11  ;;  %v2432_v4 = vrot.slane %v1534_v49, %v8568_v11 }
 0x561   : > { %v3205_v15 = vrot.slane %v3198_v32, %v8572_v10  ;;  %v2374_v0 = vcombine.low %v9252_v31, %v2366_v8  ;;  %v2375_v24 = vcombine.high %v9252_v31, %v2366_v8  ;;  %v2439_v22 = vrot.slane %v2425_v48, %v8568_v11 }
 0x562   : > { %7699 = shalt.err (!%p7696_p10)
}
 0x563   : > { %s7700_s15 = scalar_lea.hbm %s9360_s20, 2048  ;;  %s7704_s9 = scalar_lea.hbm %s10057_s11, 8192 }
 0x564   : > { %p7701_p13 = scmp.ne.s32.totalorder %s9360_s20, %s7700_s15  ;;  %p7705_p11 = scmp.lt.u32.totalorder %s9360_s20, %s10057_s11 }
 0x565   : > { %p7706_p8 = scmp.lt.u32.totalorder %s7704_s9, %s7700_s15  ;;  %p7708_p5 = scmp.lt.u32.totalorder %s7700_s15, %s9360_s20 }
 0x566   : > { %p7702_p0 = pnand %p7701_p13, %p10059_p3 }
 0x567   : > { %p7707_p4 = por %p7706_p8, %p7705_p11 }
 0x568   : > { %p7703_p9 = pneg %p7702_p0 }
 0x569   : > { %p7709_p7 = por %p7708_p5, %p7707_p4 }
 0x56b   : > { %p7710_p12 = pnand %p7709_p7, %p7703_p9 }
 0x56d   : > { %7713 = shalt.err (!%p7710_p12)
}
 0x56e   : > { %s7810_s13 = smov 128   ;;  %s7811_s26 = smov 8   ;;  %v2390_v31 = vcombine.low %v9255_v39, %v2373_v52  ;;  %v2391_v6 = vcombine.high %v9255_v39, %v2373_v52  ;;  %v2440_v41 = vcombine.low %v9259_v42, %v2432_v4  ;;  %v2441_v40 = vcombine.high %v9259_v42, %v2432_v4  ;;  %v1401_v44 = vpop.permute.xlu1 %1400 }
 0x56f   : > { %7408 = dma.vmem_to_hbm [thread:$0]  (%p10059_p3), %s9366_s28, 2048, %s9360_s20, %s6162_s27, %s7810_s13, %s7810_s13, %s7811_s26   ;;  %v3206_v30 = vcombine.low %v3197_v36, %v3205_v15  ;;  %v3207_v17 = vcombine.high %v3197_v36, %v3205_v15  ;;  %v2382_v62 = vrot.slane %v2374_v0, %v8572_v10  ;;  %v2389_v61 = vrot.slane %v2375_v24, %v8572_v10 }
 0x570   : > { %v2398_v54 = vrot.slane %v2390_v31, %v8572_v10  ;;  %v2405_v7 = vrot.slane %v2391_v6, %v8572_v10  ;;  %v2448_v34 = vrot.slane %v2440_v41, %v8572_v10  ;;  %v2455_v2 = vrot.slane %v2441_v40, %v8572_v10  ;;  %s7227_s17 = sshll.u32 (%p10059_p3), %s7780_s21, 7  ;;  %s10061_s4 = sld [smem:[#allocation27_spill]] (%p10059_p3) }
 0x571   : > { %v3470_v39 = vpack.i.b16 %v3206_v30, %v9348_v23  ;;  %v3472_v53 = vshrl.u32 %v3206_v30, 16  ;;  %v3476_v37 = vpack.i.b16 %v3207_v17, %v9350_v58  ;;  %v3478_v42 = vshrl.u32 %v3207_v17, 16  ;;  %s6197_s20 = sadd.s32 (%p10059_p3), %s7227_s17, %s9331_s24 }
 0x572   : > { %v2456_v46 = vcombine.low %v9266_v26, %v2439_v22  ;;  %v2457_v20 = vcombine.high %v9266_v26, %v2439_v22  ;;  %v3208_v25 = vcombine.low %v2382_v62, %v2389_v61  ;;  %v7052_v13 = vcombine.high %v2382_v62, %v2389_v61  ;;  %v1417_v0 = vpop.permute.xlu1 %1416  ;;  %s7228_s28 = sshll.u32 (%p10059_p3), %s6197_s20, 2 }
 0x573   : > { %v3473_v38 = vpack.i.b16 %v3472_v53, %v3471_v19  ;;  %v3479_v9 = vpack.i.b16 %v3478_v42, %v3477_v3  ;;  %v7070_v51 = vcombine.low %v3470_v39, %v3470_v39  ;;  %v7071_v50 = vcombine.high %v3470_v39, %v3470_v39  ;;  %v3786_v19 = vpop.permute.xlu0 %3785 }
 0x574   : > { %v7102_v12 = vcombine.low %v3476_v37, %v3476_v37  ;;  %v7103_v21 = vcombine.high %v3476_v37, %v3476_v37  ;;  %v2464_v60 = vrot.slane %v2456_v46, %v8572_v10  ;;  %v2471_v26 = vrot.slane %v2457_v20, %v8572_v10 }
 0x575   : > { %v7086_v1 = vcombine.low %v3473_v38, %v3473_v38  ;;  %v7087_v55 = vcombine.high %v3473_v38, %v3473_v38  ;;  %v7118_v29 = vcombine.low %v3479_v9, %v3479_v9  ;;  %v7119_v33 = vcombine.high %v3479_v9, %v3479_v9  ;;  %3707 = vst.msk [vmem:[%s8684_s29 + $0x28] sm:$0xf] %vm3696_vm0, %v7070_v51 }
 0x576   : > { %3708 = vst.msk [vmem:[%s8684_s29 + $0x2c] sm:$0xf] %vm3696_vm0, %v7071_v50  ;;  %3739 = vst.msk [vmem:[%s8684_s29 + $0xa8] sm:$0xf] %vm3696_vm0, %v7102_v12  ;;  %v3215_v49 = vrot.slane %v3208_v25, %v8568_v11  ;;  %v3223_v23 = vrot.slane %v7052_v13, %v8568_v11  ;;  %v3224_v58 = vcombine.low %v2398_v54, %v2405_v7  ;;  %v1548_v40 = vshrl.u32 %v1401_v44, 16  ;;  %s9843_s15 = scalar_lea.vmem (%p10059_p3), %s10061_s4, %s7228_s28 }
 0x577   : > { %3740 = vst.msk [vmem:[%s8684_s29 + $0xac] sm:$0xf] %vm3696_vm0, %v7103_v21  ;;  %v7053_v5 = vcombine.high %v2398_v54, %v2405_v7  ;;  %3723 = vst.msk [vmem:[%s8684_s29 + $0x68] sm:$0xf] %vm3696_vm0, %v7086_v1  ;;  %v3258_v36 = vcombine.low %v2448_v34, %v2455_v2  ;;  %v7054_v32 = vcombine.high %v2448_v34, %v2455_v2  ;;  %v1549_v61 = vshrl.u32 %v1417_v0, 16 }
 0x578   : > { %3724 = vst.msk [vmem:[%s8684_s29 + $0x6c] sm:$0xf] %vm3696_vm0, %v7087_v55  ;;  %3755 = vst.msk [vmem:[%s8684_s29 + $0xe8] sm:$0xf] %vm3696_vm0, %v7118_v29  ;;  %v3274_v8 = vcombine.low %v2464_v60, %v2471_v26  ;;  %v7055_v48 = vcombine.high %v2464_v60, %v2471_v26  ;;  %v9438_v3 = vrot.slane %v2542_v59, %v8568_v11  ;;  %v3894_v59 = vshrl.u32 %v3786_v19, 16 }
 0x579   : > { %3756 = vst.msk [vmem:[%s8684_s29 + $0xec] sm:$0xf] %vm3696_vm0, %v7119_v33  ;;  %v3231_v52 = vrot.slane %v3224_v58, %v8568_v11  ;;  %v3239_v4 = vrot.slane %v7053_v5, %v8568_v11  ;;  %v3240_v15 = vcombine.low %v3215_v49, %v3223_v23  ;;  %v3265_v24 = vrot.slane %v3258_v36, %v8568_v11 }
 0x57a   : > { %v3273_v22 = vrot.slane %v7054_v32, %v8568_v11  ;;  %v3281_v31 = vrot.slane %v3274_v8, %v8568_v11  ;;  %v3289_v6 = vrot.slane %v7055_v48, %v8568_v11  ;;  %v3891_v43 = vpack.i.b16 %v3786_v19, %v8520_v27 }
 0x57b   : > { %v3248_v41 = vcombine.low %v3231_v52, %v3239_v4  ;;  %v1546_v62 = vpack.i.b16 %v1417_v0, %v1401_v44  ;;  %v3247_v54 = vrot.slane %v3240_v15, %v8572_v10  ;;  %v3895_v34 = vpack.i.b16 %v3894_v59, %v3893_v57 }
 0x57c   : > { %v3290_v30 = vcombine.low %v3265_v24, %v3273_v22  ;;  %v3298_v17 = vcombine.low %v3281_v31, %v3289_v6  ;;  %v4481_v2 = vcombine.high %v3891_v43, %v8566_v28  ;;  %v9455_v37 = vrot.slane %v3891_v43, %v8568_v11  ;;  %v3802_v6 = vpop.permute.xlu0 %3801 }
 0x57d   : > { %v3255_v7 = vrot.slane %v3248_v41, %v8572_v10  ;;  %v2491_v42 = vcombine.high %v1546_v62, %v8566_v28  ;;  %v1550_v13 = vpack.i.b16 %v1549_v61, %v1548_v40  ;;  %v4547_v57 = vcombine.high %v3895_v34, %v8566_v28 }
 0x57e   : > { %v3297_v39 = vrot.slane %v3290_v30, %v8572_v10  ;;  %v3305_v53 = vrot.slane %v3298_v17, %v8572_v10  ;;  %v9459_v25 = vrot.slane %v4481_v2, %v8568_v11  ;;  %v2498_v38 = vrot.slane %v1546_v62, %v8568_v11 }
 0x57f   : > { %v3256_v46 = vcombine.low %v3247_v54, %v3255_v7  ;;  %v3257_v20 = vcombine.high %v3247_v54, %v3255_v7  ;;  %v9464_v50 = vrot.slane %v3895_v34, %v8568_v11  ;;  %v2505_v12 = vrot.slane %v2491_v42, %v8568_v11 }
 0x580   : > { %v3306_v44 = vcombine.low %v3297_v39, %v3305_v53  ;;  %v3307_v27 = vcombine.high %v3297_v39, %v3305_v53  ;;  %v2506_v55 = vcombine.low %v9324_v16, %v2498_v38  ;;  %v2507_v29 = vcombine.high %v9324_v16, %v2498_v38  ;;  %v3788_v16 = vpop.permute.xlu1 %3787 }
 0x581   : > { %v3483_v9 = vshrl.u32 %v3256_v46, 16  ;;  %v3489_v51 = vshrl.u32 %v3257_v20, 16  ;;  %v2522_v33 = vcombine.low %v9337_v45, %v2505_v12  ;;  %v2523_v49 = vcombine.high %v9337_v45, %v2505_v12 }
 0x582   : > { %v3482_v21 = vpack.i.b16 %v3306_v44, %v3256_v46  ;;  %v3484_v60 = vshrl.u32 %v3306_v44, 16  ;;  %v3488_v26 = vpack.i.b16 %v3307_v27, %v3257_v20  ;;  %v3490_v1 = vshrl.u32 %v3307_v27, 16 }
 0x583   : > { %v2514_v48 = vrot.slane %v2506_v55, %v8572_v10  ;;  %v2521_v19 = vrot.slane %v2507_v29, %v8572_v10  ;;  %v2530_v0 = vrot.slane %v2522_v33, %v8572_v10  ;;  %v2537_v24 = vrot.slane %v2523_v49, %v8572_v10 }
 0x584   : > { %v3485_v23 = vpack.i.b16 %v3484_v60, %v3483_v9  ;;  %v3491_v58 = vpack.i.b16 %v3490_v1, %v3489_v51  ;;  %v7072_v5 = vcombine.low %v3482_v21, %v3482_v21  ;;  %v7073_v36 = vcombine.high %v3482_v21, %v3482_v21  ;;  %v3818_v51 = vpop.permute.xlu0 %3817 }
 0x585   : > { %v7104_v32 = vcombine.low %v3488_v26, %v3488_v26  ;;  %v7105_v8 = vcombine.high %v3488_v26, %v3488_v26  ;;  %v2557_v22 = vcombine.high %v1550_v13, %v8566_v28  ;;  %v2564_v31 = vrot.slane %v1550_v13, %v8568_v11 }
 0x586   : > { %v7088_v52 = vcombine.low %v3485_v23, %v3485_v23  ;;  %v7089_v4 = vcombine.high %v3485_v23, %v3485_v23  ;;  %v7120_v45 = vcombine.low %v3491_v58, %v3491_v58  ;;  %v7121_v15 = vcombine.high %v3491_v58, %v3491_v58  ;;  %3709 = vst.msk [vmem:[%s8684_s29 + $0x30] sm:$0xf] %vm3696_vm0, %v7072_v5 }
 0x587   : > { %3710 = vst.msk [vmem:[%s8684_s29 + $0x34] sm:$0xf] %vm3696_vm0, %v7073_v36  ;;  %3741 = vst.msk [vmem:[%s8684_s29 + $0xb0] sm:$0xf] %vm3696_vm0, %v7104_v32  ;;  %v9494_v41 = vrot.slane %v4547_v57, %v8568_v11  ;;  %v3308_v40 = vcombine.low %v2514_v48, %v2521_v19  ;;  %v7056_v43 = vcombine.high %v2514_v48, %v2521_v19  ;;  %v3910_v2 = vshrl.u32 %v3788_v16, 16 }
 0x588   : > { %3742 = vst.msk [vmem:[%s8684_s29 + $0xb4] sm:$0xf] %vm3696_vm0, %v7105_v8  ;;  %3725 = vst.msk [vmem:[%s8684_s29 + $0x70] sm:$0xf] %vm3696_vm0, %v7088_v52  ;;  %v3907_v59 = vpack.i.b16 %v3788_v16, %v8518_v47  ;;  %v2571_v30 = vrot.slane %v2557_v22, %v8568_v11  ;;  %v2572_v17 = vcombine.low %v9354_v56, %v2564_v31  ;;  %v3901_v60 = vshrl.u32 %v3802_v6, 16 }
 0x589   : > { %3726 = vst.msk [vmem:[%s8684_s29 + $0x74] sm:$0xf] %vm3696_vm0, %v7089_v4  ;;  %3757 = vst.msk [vmem:[%s8684_s29 + $0xf0] sm:$0xf] %vm3696_vm0, %v7120_v45  ;;  %v2573_v62 = vcombine.high %v9354_v56, %v2564_v31  ;;  %v3324_v61 = vcombine.low %v2530_v0, %v2537_v24  ;;  %v3315_v54 = vrot.slane %v3308_v40, %v8568_v11  ;;  %v3902_v19 = vshrl.u32 %v3818_v51, 16 }
 0x58a   : > { %3758 = vst.msk [vmem:[%s8684_s29 + $0xf4] sm:$0xf] %vm3696_vm0, %v7121_v15  ;;  %v3323_v7 = vrot.slane %v7056_v43, %v8568_v11  ;;  %v7057_v34 = vcombine.high %v2530_v0, %v2537_v24  ;;  %v2580_v39 = vrot.slane %v2572_v17, %v8572_v10  ;;  %v2588_v42 = vcombine.low %v9438_v3, %v2571_v30  ;;  %v9534_v15 = vpop.permute.xlu0 %3789 }
 0x58b   : > { %v2587_v53 = vrot.slane %v2573_v62, %v8572_v10  ;;  %v2589_v46 = vcombine.high %v9438_v3, %v2571_v30  ;;  %v3331_v20 = vrot.slane %v3324_v61, %v8568_v11  ;;  %v3911_v44 = vpack.i.b16 %v3910_v2, %v3909_v35 }
 0x58c   : > { %v3339_v13 = vrot.slane %v7057_v34, %v8568_v11  ;;  %v3340_v56 = vcombine.low %v3315_v54, %v3323_v7  ;;  %v2596_v27 = vrot.slane %v2588_v42, %v8572_v10  ;;  %v4613_v3 = vcombine.high %v3907_v59, %v8566_v28 }
 0x58d   : > { %v2603_v57 = vrot.slane %v2589_v46, %v8572_v10  ;;  %v3358_v38 = vcombine.low %v2580_v39, %v2587_v53  ;;  %v7058_v9 = vcombine.high %v2580_v39, %v2587_v53  ;;  %v9518_v29 = vrot.slane %v3907_v59, %v8568_v11  ;;  %v9554_v46 = vpop.permute.xlu1 %3803 }
 0x58e   : > { %v3347_v12 = vrot.slane %v3340_v56, %v8572_v10  ;;  %v3348_v21 = vcombine.low %v3331_v20, %v3339_v13  ;;  %v9521_v33 = vrot.slane %v4613_v3, %v8568_v11  ;;  %v4679_v49 = vcombine.high %v3911_v44, %v8566_v28 }
 0x58f   : > { %v3365_v26 = vrot.slane %v3358_v38, %v8568_v11  ;;  %v3373_v1 = vrot.slane %v7058_v9, %v8568_v11  ;;  %v3374_v55 = vcombine.low %v2596_v27, %v2603_v57  ;;  %v7059_v47 = vcombine.high %v2596_v27, %v2603_v57 }
 0x590   : > { %v3355_v35 = vrot.slane %v3348_v21, %v8572_v10  ;;  %v3899_v36 = vpack.i.b16 %v3818_v51, %v3802_v6  ;;  %v9527_v48 = vrot.slane %v3911_v44, %v8568_v11  ;;  %v9530_v52 = vrot.slane %v4679_v49, %v8568_v11 }
 0x591   : > { %v3381_v23 = vrot.slane %v3374_v55, %v8568_v11  ;;  %v3389_v58 = vrot.slane %v7059_v47, %v8568_v11  ;;  %v3390_v5 = vcombine.low %v3365_v26, %v3373_v1  ;;  %v3903_v31 = vpack.i.b16 %v3902_v19, %v3901_v60 }
 0x592   : > { %v3356_v32 = vcombine.low %v3347_v12, %v3355_v35  ;;  %v3357_v8 = vcombine.high %v3347_v12, %v3355_v35  ;;  %v4496_v4 = vcombine.high %v3899_v36, %v8566_v28  ;;  %v4503_v45 = vrot.slane %v3899_v36, %v8568_v11  ;;  %v3820_v36 = vpop.permute.xlu1 %3819 }
 0x593   : > { %v3398_v16 = vcombine.low %v3381_v23, %v3389_v58  ;;  %v3397_v0 = vrot.slane %v3390_v5, %v8572_v10  ;;  %v4562_v30 = vcombine.high %v3903_v31, %v8566_v28  ;;  %v4569_v17 = vrot.slane %v3903_v31, %v8568_v11 }
 0x594   : > { %v3495_v24 = vshrl.u32 %v3356_v32, 16  ;;  %v3501_v22 = vshrl.u32 %v3357_v8, 16  ;;  %v4510_v40 = vrot.slane %v4496_v4, %v8568_v11  ;;  %v4511_v43 = vcombine.low %v9455_v37, %v4503_v45 }
 0x595   : > { %v3405_v6 = vrot.slane %v3398_v16, %v8572_v10  ;;  %v4512_v59 = vcombine.high %v9455_v37, %v4503_v45  ;;  %v9545_v62 = vpack.i.b16 %v9534_v15, %v8532_v18  ;;  %v3926_v61 = vshrl.u32 %v9534_v15, 16 }
 0x596   : > { %v4519_v34 = vrot.slane %v4511_v43, %v8572_v10  ;;  %v4527_v39 = vcombine.low %v9459_v25, %v4510_v40  ;;  %v4528_v37 = vcombine.high %v9459_v25, %v4510_v40  ;;  %v4576_v53 = vrot.slane %v4562_v30, %v8568_v11 }
 0x597   : > { %v3406_v54 = vcombine.low %v3397_v0, %v3405_v6  ;;  %v3407_v7 = vcombine.high %v3397_v0, %v3405_v6  ;;  %v4526_v2 = vrot.slane %v4512_v59, %v8572_v10  ;;  %v4577_v42 = vcombine.low %v9464_v50, %v4569_v17 }
 0x598   : > { %v4535_v27 = vrot.slane %v4527_v39, %v8572_v10  ;;  %v4542_v57 = vrot.slane %v4528_v37, %v8572_v10  ;;  %v4578_v38 = vcombine.high %v9464_v50, %v4569_v17  ;;  %v4593_v1 = vcombine.low %v9494_v41, %v4576_v53  ;;  %v3792_v37 = vpop.permute.xlu1 %3791 }
 0x599   : > { %v3494_v20 = vpack.i.b16 %v3406_v54, %v3356_v32  ;;  %v3496_v13 = vshrl.u32 %v3406_v54, 16  ;;  %v3500_v56 = vpack.i.b16 %v3407_v7, %v3357_v8  ;;  %v3502_v44 = vshrl.u32 %v3407_v7, 16 }
 0x59a   : > { %v4585_v25 = vrot.slane %v4577_v42, %v8572_v10  ;;  %v4592_v26 = vrot.slane %v4578_v38, %v8572_v10  ;;  %v4594_v49 = vcombine.high %v9494_v41, %v4576_v53  ;;  %v4601_v23 = vrot.slane %v4593_v1, %v8572_v10 }
 0x59b   : > { %v3497_v9 = vpack.i.b16 %v3496_v13, %v3495_v24  ;;  %v3503_v51 = vpack.i.b16 %v3502_v44, %v3501_v22  ;;  %v7074_v12 = vcombine.low %v3494_v20, %v3494_v20  ;;  %v7075_v21 = vcombine.high %v3494_v20, %v3494_v20 }
 0x59c   : > { %v7106_v60 = vcombine.low %v3500_v56, %v3500_v56  ;;  %v7107_v3 = vcombine.high %v3500_v56, %v3500_v56  ;;  %v5409_v58 = vcombine.low %v4519_v34, %v4526_v2  ;;  %v7140_v5 = vcombine.high %v4519_v34, %v4526_v2 }
 0x59d   : > { %v7090_v55 = vcombine.low %v3497_v9, %v3497_v9  ;;  %v7091_v50 = vcombine.high %v3497_v9, %v3497_v9  ;;  %v7122_v47 = vcombine.low %v3503_v51, %v3503_v51  ;;  %v7123_v35 = vcombine.high %v3503_v51, %v3503_v51  ;;  %3711 = vst.msk [vmem:[%s8684_s29 + $0x38] sm:$0xf] %vm3696_vm0, %v7074_v12 }
 0x59e   : > { %3712 = vst.msk [vmem:[%s8684_s29 + $0x3c] sm:$0xf] %vm3696_vm0, %v7075_v21  ;;  %3743 = vst.msk [vmem:[%s8684_s29 + $0xb8] sm:$0xf] %vm3696_vm0, %v7106_v60  ;;  %v5425_v32 = vcombine.low %v4535_v27, %v4542_v57  ;;  %v7141_v8 = vcombine.high %v4535_v27, %v4542_v57  ;;  %v5459_v19 = vcombine.low %v4585_v25, %v4592_v26  ;;  %v10060_v15 = vshrl.u32 %v8532_v18, 16 }
 0x59f   : > { %3744 = vst.msk [vmem:[%s8684_s29 + $0xbc] sm:$0xf] %vm3696_vm0, %v7107_v3  ;;  %3727 = vst.msk [vmem:[%s8684_s29 + $0x78] sm:$0xf] %vm3696_vm0, %v7090_v55  ;;  %v7142_v16 = vcombine.high %v4585_v25, %v4592_v26  ;;  %v4608_v4 = vrot.slane %v4594_v49, %v8572_v10  ;;  %v5416_v41 = vrot.slane %v5409_v58, %v8568_v11  ;;  %v3917_v7 = vshrl.u32 %v9554_v46, 16 }
 0x5a0   : > { %3728 = vst.msk [vmem:[%s8684_s29 + $0x7c] sm:$0xf] %vm3696_vm0, %v7091_v50  ;;  %3759 = vst.msk [vmem:[%s8684_s29 + $0xf8] sm:$0xf] %vm3696_vm0, %v7122_v47  ;;  %v5424_v45 = vrot.slane %v7140_v5, %v8568_v11  ;;  %v3927_v0 = vpack.i.b16 %v3926_v61, %v10060_v15  ;;  %v5432_v24 = vrot.slane %v5425_v32, %v8568_v11  ;;  %v3918_v57 = vshrl.u32 %v3820_v36, 16 }
 0x5a1   : > { %3760 = vst.msk [vmem:[%s8684_s29 + $0xfc] sm:$0xf] %vm3696_vm0, %v7123_v35  ;;  %v5440_v22 = vrot.slane %v7141_v8, %v8568_v11  ;;  %v5466_v31 = vrot.slane %v5459_v19, %v8568_v11  ;;  %v5474_v6 = vrot.slane %v7142_v16, %v8568_v11  ;;  %v5475_v43 = vcombine.low %v4601_v23, %v4608_v4 }
 0x5a2   : > { %v5441_v40 = vcombine.low %v5416_v41, %v5424_v45  ;;  %v7143_v59 = vcombine.high %v4601_v23, %v4608_v4  ;;  %v4745_v30 = vcombine.high %v9545_v62, %v8566_v28  ;;  %v4811_v18 = vcombine.high %v3927_v0, %v8566_v28 }
 0x5a3   : > { %v5449_v17 = vcombine.low %v5432_v24, %v5440_v22  ;;  %v5491_v54 = vcombine.low %v5466_v31, %v5474_v6  ;;  %v5482_v34 = vrot.slane %v5475_v43, %v8568_v11  ;;  %v9598_v39 = vrot.slane %v9545_v62, %v8568_v11  ;;  %v9612_v62 = vpop.permute.xlu0 %3805 }
 0x5a4   : > { %v5448_v61 = vrot.slane %v5441_v40, %v8572_v10  ;;  %v5490_v2 = vrot.slane %v7143_v59, %v8568_v11  ;;  %v9603_v20 = vrot.slane %v4745_v30, %v8568_v11  ;;  %v9606_v13 = vrot.slane %v3927_v0, %v8568_v11 }
 0x5a5   : > { %v5456_v53 = vrot.slane %v5449_v17, %v8572_v10  ;;  %v5498_v42 = vrot.slane %v5491_v54, %v8572_v10  ;;  %v9609_v44 = vrot.slane %v4811_v18, %v8568_v11  ;;  %v3915_v27 = vpack.i.b16 %v3820_v36, %v9554_v46 }
 0x5a6   : > { %v5499_v56 = vcombine.low %v5482_v34, %v5490_v2  ;;  %v9615_v9 = vpack.i.b16 %v3792_v37, %v8530_v14  ;;  %v3942_v51 = vshrl.u32 %v3792_v37, 16  ;;  %v3919_v21 = vpack.i.b16 %v3918_v57, %v3917_v7 }
 0x5a7   : > { %v5457_v38 = vcombine.low %v5448_v61, %v5456_v53  ;;  %v5458_v25 = vcombine.high %v5448_v61, %v5456_v53  ;;  %v4628_v60 = vcombine.high %v3915_v27, %v8566_v28  ;;  %v4635_v3 = vrot.slane %v3915_v27, %v8568_v11 }
 0x5a8   : > { %v5506_v12 = vrot.slane %v5499_v56, %v8572_v10  ;;  %v3933_v46 = vshrl.u32 %v9612_v62, 16  ;;  %v9623_v55 = vpack.i.b16 %v3942_v51, %v3941_v63  ;;  %v4694_v58 = vcombine.high %v3919_v21, %v8566_v28 }
 0x5a9   : > { %v5860_v26 = vshrl.u32 %v5457_v38, 16  ;;  %v5866_v1 = vshrl.u32 %v5458_v25, 16  ;;  %v4642_v35 = vrot.slane %v4628_v60, %v8568_v11  ;;  %v4643_v49 = vcombine.low %v9518_v29, %v4635_v3  ;;  %v9671_v60 = vpop.permute.xlu1 %3807 }
 0x5aa   : > { %v5507_v50 = vcombine.low %v5498_v42, %v5506_v12  ;;  %v5508_v47 = vcombine.high %v5498_v42, %v5506_v12  ;;  %v4644_v23 = vcombine.high %v9518_v29, %v4635_v3  ;;  %v4701_v5 = vrot.slane %v3919_v21, %v8568_v11  ;;  %v3822_v21 = vpop.permute.xlu0 %3821 }
 0x5ab   : > { %v4877_v36 = vcombine.high %v9615_v9, %v8566_v28  ;;  %v4651_v19 = vrot.slane %v4643_v49, %v8572_v10  ;;  %v4659_v4 = vcombine.low %v9521_v33, %v4642_v35  ;;  %v4660_v29 = vcombine.high %v9521_v33, %v4642_v35 }
 0x5ac   : > { %v5859_v32 = vpack.i.b16 %v5507_v50, %v5457_v38  ;;  %v5861_v8 = vshrl.u32 %v5507_v50, 16  ;;  %v5865_v14 = vpack.i.b16 %v5508_v47, %v5458_v25  ;;  %v5867_v63 = vshrl.u32 %v5508_v47, 16 }
 0x5ad   : > { %v4658_v16 = vrot.slane %v4644_v23, %v8572_v10  ;;  %v4667_v31 = vrot.slane %v4659_v4, %v8572_v10  ;;  %v4674_v6 = vrot.slane %v4660_v29, %v8572_v10  ;;  %v4708_v33 = vrot.slane %v4694_v58, %v8568_v11 }
 0x5ae   : > { %v5862_v41 = vpack.i.b16 %v5861_v8, %v5860_v26  ;;  %v5868_v45 = vpack.i.b16 %v5867_v63, %v5866_v1  ;;  %v7164_v15 = vcombine.low %v5859_v32, %v5859_v32  ;;  %v7165_v0 = vcombine.high %v5859_v32, %v5859_v32 }
 0x5af   : > { %v7196_v24 = vcombine.low %v5865_v14, %v5865_v14  ;;  %v7197_v22 = vcombine.high %v5865_v14, %v5865_v14  ;;  %v4709_v17 = vcombine.low %v9527_v48, %v4701_v5  ;;  %v4710_v54 = vcombine.high %v9527_v48, %v4701_v5 }
 0x5b0   : > { %v7180_v40 = vcombine.low %v5862_v41, %v5862_v41  ;;  %v7181_v43 = vcombine.high %v5862_v41, %v5862_v41  ;;  %v7212_v59 = vcombine.low %v5868_v45, %v5868_v45  ;;  %v7213_v30 = vcombine.high %v5868_v45, %v5868_v45  ;;  %6105 = vst.msk [vmem:[%s8768_s25 + $0x20] sm:$0xf] %vm3696_vm0, %v7164_v15 }
 0x5b1   : > { %6106 = vst.msk [vmem:[%s8768_s25 + $0x24] sm:$0xf] %vm3696_vm0, %v7165_v0  ;;  %6137 = vst.msk [vmem:[%s8768_s25 + $0xa0] sm:$0xf] %vm3696_vm0, %v7196_v24  ;;  %v5509_v7 = vcombine.low %v4651_v19, %v4658_v16  ;;  %v7144_v18 = vcombine.high %v4651_v19, %v4658_v16  ;;  %v5525_v61 = vcombine.low %v4667_v31, %v4674_v6  ;;  %v3934_v63 = vshrl.u32 %v3822_v21, 16  ;;  %v9695_v24 = vpop.permute.xlu1 %3823 }
 0x5b2   : > { %6138 = vst.msk [vmem:[%s8768_s25 + $0xa4] sm:$0xf] %vm3696_vm0, %v7197_v22  ;;  %6121 = vst.msk [vmem:[%s8768_s25 + $0x60] sm:$0xf] %vm3696_vm0, %v7180_v40  ;;  %v7145_v34 = vcombine.high %v4667_v31, %v4674_v6  ;;  %v9659_v2 = vrot.slane %v9615_v9, %v8568_v11  ;;  %v4717_v37 = vrot.slane %v4709_v17, %v8572_v10  ;;  %v3949_v0 = vshrl.u32 %v9671_v60, 16 }
 0x5b3   : > { %6122 = vst.msk [vmem:[%s8768_s25 + $0x64] sm:$0xf] %vm3696_vm0, %v7181_v43  ;;  %6153 = vst.msk [vmem:[%s8768_s25 + $0xe0] sm:$0xf] %vm3696_vm0, %v7212_v59  ;;  %v4724_v48 = vrot.slane %v4710_v54, %v8572_v10  ;;  %v4725_v53 = vcombine.low %v9530_v52, %v4708_v33  ;;  %v4726_v42 = vcombine.high %v9530_v52, %v4708_v33 }
 0x5b4   : > { %6154 = vst.msk [vmem:[%s8768_s25 + $0xe4] sm:$0xf] %vm3696_vm0, %v7213_v30  ;;  %v5516_v56 = vrot.slane %v5509_v7, %v8568_v11  ;;  %v5524_v27 = vrot.slane %v7144_v18, %v8568_v11  ;;  %v5532_v57 = vrot.slane %v5525_v61, %v8568_v11  ;;  %v5540_v38 = vrot.slane %v7145_v34, %v8568_v11 }
 0x5b5   : > { %v4733_v25 = vrot.slane %v4725_v53, %v8572_v10  ;;  %v4740_v9 = vrot.slane %v4726_v42, %v8572_v10  ;;  %v5559_v51 = vcombine.low %v4717_v37, %v4724_v48  ;;  %v7146_v12 = vcombine.high %v4717_v37, %v4724_v48 }
 0x5b6   : > { %v5541_v3 = vcombine.low %v5516_v56, %v5524_v27  ;;  %v5549_v26 = vcombine.low %v5532_v57, %v5540_v38  ;;  %v9674_v52 = vrot.slane %v4877_v36, %v8568_v11  ;;  %v4943_v1 = vcombine.high %v9623_v55, %v8566_v28 }
 0x5b7   : > { %v5566_v50 = vrot.slane %v5559_v51, %v8568_v11  ;;  %v5574_v47 = vrot.slane %v7146_v12, %v8568_v11  ;;  %v5575_v35 = vcombine.low %v4733_v25, %v4740_v9  ;;  %v7147_v49 = vcombine.high %v4733_v25, %v4740_v9 }
 0x5b8   : > { %v5548_v23 = vrot.slane %v5541_v3, %v8572_v10  ;;  %v5556_v58 = vrot.slane %v5549_v26, %v8572_v10  ;;  %v9684_v5 = vrot.slane %v9623_v55, %v8568_v11  ;;  %v3931_v36 = vpack.i.b16 %v3822_v21, %v9612_v62 }
 0x5b9   : > { %v5582_v32 = vrot.slane %v5575_v35, %v8568_v11  ;;  %v5590_v8 = vrot.slane %v7147_v49, %v8568_v11  ;;  %v5591_v14 = vcombine.low %v5566_v50, %v5574_v47  ;;  %v3935_v15 = vpack.i.b16 %v3934_v63, %v3933_v46 }
 0x5ba   : > { %v5557_v19 = vcombine.low %v5548_v23, %v5556_v58  ;;  %v5558_v16 = vcombine.high %v5548_v23, %v5556_v58  ;;  %v4760_v4 = vcombine.high %v3931_v36, %v8566_v28  ;;  %v4767_v29 = vrot.slane %v3931_v36, %v8568_v11 }
 0x5bb   : > { %v5598_v41 = vrot.slane %v5591_v14, %v8572_v10  ;;  %v5599_v45 = vcombine.low %v5582_v32, %v5590_v8  ;;  %v4826_v30 = vcombine.high %v3935_v15, %v8566_v28  ;;  %v4833_v33 = vrot.slane %v3935_v15, %v8568_v11 }
 0x5bc   : > { %v5872_v22 = vshrl.u32 %v5557_v19, 16  ;;  %v5878_v31 = vshrl.u32 %v5558_v16, 16  ;;  %v4774_v6 = vrot.slane %v4760_v4, %v8568_v11  ;;  %v4775_v40 = vcombine.low %v9598_v39, %v4767_v29 }
 0x5bd   : > { %v5606_v43 = vrot.slane %v5599_v45, %v8572_v10  ;;  %v4776_v59 = vcombine.high %v9598_v39, %v4767_v29  ;;  %v9708_v54 = vpack.i.b16 %v9695_v24, %v9671_v60  ;;  %v4840_v39 = vrot.slane %v4826_v30, %v8568_v11 }
 0x5be   : > { %v4783_v62 = vrot.slane %v4775_v40, %v8572_v10  ;;  %v4791_v46 = vcombine.low %v9603_v20, %v4774_v6  ;;  %v4792_v17 = vcombine.high %v9603_v20, %v4774_v6  ;;  %v4841_v48 = vcombine.low %v9606_v13, %v4833_v33 }
 0x5bf   : > { %v5607_v7 = vcombine.low %v5598_v41, %v5606_v43  ;;  %v5608_v18 = vcombine.high %v5598_v41, %v5606_v43  ;;  %v4790_v61 = vrot.slane %v4776_v59, %v8572_v10  ;;  %v4842_v53 = vcombine.high %v9606_v13, %v4833_v33 }
 0x5c0   : > { %v4799_v34 = vrot.slane %v4791_v46, %v8572_v10  ;;  %v4806_v37 = vrot.slane %v4792_v17, %v8572_v10  ;;  %v4849_v57 = vrot.slane %v4841_v48, %v8572_v10  ;;  %v4857_v25 = vcombine.low %v9609_v44, %v4840_v39 }
 0x5c1   : > { %v5871_v42 = vpack.i.b16 %v5607_v7, %v5557_v19  ;;  %v5873_v20 = vshrl.u32 %v5607_v7, 16  ;;  %v5877_v56 = vpack.i.b16 %v5608_v18, %v5558_v16  ;;  %v5879_v27 = vshrl.u32 %v5608_v18, 16 }
 0x5c2   : > { %v4856_v38 = vrot.slane %v4842_v53, %v8572_v10  ;;  %v4858_v9 = vcombine.high %v9609_v44, %v4840_v39  ;;  %v4865_v50 = vrot.slane %v4857_v25, %v8572_v10  ;;  %v5609_v44 = vcombine.low %v4783_v62, %v4790_v61 }
 0x5c3   : > { %v5874_v51 = vpack.i.b16 %v5873_v20, %v5872_v22  ;;  %v5880_v12 = vpack.i.b16 %v5879_v27, %v5878_v31  ;;  %v7166_v21 = vcombine.low %v5871_v42, %v5871_v42  ;;  %v7167_v13 = vcombine.high %v5871_v42, %v5871_v42 }
 0x5c4   : > { %v7198_v3 = vcombine.low %v5877_v56, %v5877_v56  ;;  %v7199_v26 = vcombine.high %v5877_v56, %v5877_v56  ;;  %v4872_v47 = vrot.slane %v4858_v9, %v8572_v10  ;;  %v7148_v36 = vcombine.high %v4783_v62, %v4790_v61 }
 0x5c5   : > { %v7182_v35 = vcombine.low %v5874_v51, %v5874_v51  ;;  %v7183_v49 = vcombine.high %v5874_v51, %v5874_v51  ;;  %v7214_v23 = vcombine.low %v5880_v12, %v5880_v12  ;;  %v7215_v58 = vcombine.high %v5880_v12, %v5880_v12  ;;  %6107 = vst.msk [vmem:[%s8768_s25 + $0x28] sm:$0xf] %vm3696_vm0, %v7166_v21 }
 0x5c6   : > { %6108 = vst.msk [vmem:[%s8768_s25 + $0x2c] sm:$0xf] %vm3696_vm0, %v7167_v13  ;;  %6139 = vst.msk [vmem:[%s8768_s25 + $0xa8] sm:$0xf] %vm3696_vm0, %v7198_v3  ;;  %v5625_v32 = vcombine.low %v4799_v34, %v4806_v37  ;;  %v7149_v8 = vcombine.high %v4799_v34, %v4806_v37  ;;  %v5659_v14 = vcombine.low %v4849_v57, %v4856_v38  ;;  %v3950_v59 = vshrl.u32 %v9695_v24, 16 }
 0x5c7   : > { %6140 = vst.msk [vmem:[%s8768_s25 + $0xac] sm:$0xf] %vm3696_vm0, %v7199_v26  ;;  %6123 = vst.msk [vmem:[%s8768_s25 + $0x68] sm:$0xf] %vm3696_vm0, %v7182_v35  ;;  %v7150_v63 = vcombine.high %v4849_v57, %v4856_v38  ;;  %v5675_v19 = vcombine.low %v4865_v50, %v4872_v47  ;;  %v7151_v16 = vcombine.high %v4865_v50, %v4872_v47 }
 0x5c8   : > { %6124 = vst.msk [vmem:[%s8768_s25 + $0x6c] sm:$0xf] %vm3696_vm0, %v7183_v49  ;;  %6155 = vst.msk [vmem:[%s8768_s25 + $0xe8] sm:$0xf] %vm3696_vm0, %v7214_v23  ;;  %v5616_v4 = vrot.slane %v5609_v44, %v8568_v11  ;;  %v5624_v29 = vrot.slane %v7148_v36, %v8568_v11  ;;  %v5632_v41 = vrot.slane %v5625_v32, %v8568_v11 }
 0x5c9   : > { %6156 = vst.msk [vmem:[%s8768_s25 + $0xec] sm:$0xf] %vm3696_vm0, %v7215_v58  ;;  %v5640_v45 = vrot.slane %v7149_v8, %v8568_v11  ;;  %v5666_v15 = vrot.slane %v5659_v14, %v8568_v11  ;;  %v5674_v22 = vrot.slane %v7150_v63, %v8568_v11  ;;  %v5682_v31 = vrot.slane %v5675_v19, %v8568_v11 }
 0x5ca   : > { %v5690_v6 = vrot.slane %v7151_v16, %v8568_v11  ;;  %v5641_v40 = vcombine.low %v5616_v4, %v5624_v29  ;;  %v4892_v30 = vcombine.high %v9708_v54, %v8566_v28  ;;  %v9753_v33 = vrot.slane %v4943_v1, %v8568_v11 }
 0x5cb   : > { %v5649_v43 = vcombine.low %v5632_v41, %v5640_v45  ;;  %v5691_v62 = vcombine.low %v5666_v15, %v5674_v22  ;;  %v4899_v17 = vrot.slane %v9708_v54, %v8568_v11  ;;  %v3951_v24 = vpack.i.b16 %v3950_v59, %v3949_v0 }
 0x5cc   : > { %v5699_v46 = vcombine.low %v5682_v31, %v5690_v6  ;;  %v5648_v7 = vrot.slane %v5641_v40, %v8572_v10  ;;  %v4906_v61 = vrot.slane %v4892_v30, %v8568_v11 }
 0x5cd   : > { %v5656_v18 = vrot.slane %v5649_v43, %v8572_v10  ;;  %v5698_v39 = vrot.slane %v5691_v62, %v8572_v10  ;;  %v4907_v1 = vcombine.low %v9659_v2, %v4899_v17  ;;  %v4908_v34 = vcombine.high %v9659_v2, %v4899_v17 }
 0x5ce   : > { %v5706_v55 = vrot.slane %v5699_v46, %v8572_v10  ;;  %v4923_v54 = vcombine.low %v9674_v52, %v4906_v61  ;;  %v4924_v53 = vcombine.high %v9674_v52, %v4906_v61  ;;  %v4958_v12 = vcombine.high %v3951_v24, %v8566_v28 }
 0x5cf   : > { %v5657_v37 = vcombine.low %v5648_v7, %v5656_v18  ;;  %v5658_v48 = vcombine.high %v5648_v7, %v5656_v18  ;;  %v4915_v60 = vrot.slane %v4907_v1, %v8572_v10  ;;  %v4922_v0 = vrot.slane %v4908_v34, %v8572_v10 }
 0x5d0   : > { %v5707_v42 = vcombine.low %v5698_v39, %v5706_v55  ;;  %v5708_v20 = vcombine.high %v5698_v39, %v5706_v55  ;;  %v4931_v57 = vrot.slane %v4923_v54, %v8572_v10  ;;  %v4938_v38 = vrot.slane %v4924_v53, %v8572_v10 }
 0x5d1   : > { %v5884_v56 = vshrl.u32 %v5657_v37, 16  ;;  %v5890_v27 = vshrl.u32 %v5658_v48, 16  ;;  %v4965_v52 = vrot.slane %v3951_v24, %v8568_v11  ;;  %v5709_v21 = vcombine.low %v4915_v60, %v4922_v0 }
 0x5d2   : > { %v5883_v25 = vpack.i.b16 %v5707_v42, %v5657_v37  ;;  %v5885_v2 = vshrl.u32 %v5707_v42, 16  ;;  %v5889_v9 = vpack.i.b16 %v5708_v20, %v5658_v48  ;;  %v5891_v51 = vshrl.u32 %v5708_v20, 16 }
 0x5d3   : > { %v7152_v13 = vcombine.high %v4915_v60, %v4922_v0  ;;  %v4972_v23 = vrot.slane %v4958_v12, %v8568_v11  ;;  %v4973_v28 = vcombine.low %v9684_v5, %v4965_v52  ;;  %v4974_v8 = vcombine.high %v9684_v5, %v4965_v52  ;;  %v6215_v52 = vld [vmem:[%s8684_s29] sm:$0xff] (%p10059_p3)  }
 0x5d4   : > { %v5886_v3 = vpack.i.b16 %v5885_v2, %v5884_v56  ;;  %v5892_v26 = vpack.i.b16 %v5891_v51, %v5890_v27  ;;  %v7168_v50 = vcombine.low %v5883_v25, %v5883_v25  ;;  %v7169_v47 = vcombine.high %v5883_v25, %v5883_v25  ;;  %6216 = vst [vmem:[%s9843_s15] sm:$0xff] (%p10059_p3), %v6215_v52  }
 0x5d5   : > { %v7200_v35 = vcombine.low %v5889_v9, %v5889_v9  ;;  %v7201_v49 = vcombine.high %v5889_v9, %v5889_v9  ;;  %v4981_v14 = vrot.slane %v4973_v28, %v8572_v10  ;;  %v4989_v63 = vcombine.low %v9753_v33, %v4972_v23  ;;  %v6255_v28 = vld [vmem:[%s8684_s29 + $0x50] sm:$0xff] (%p10059_p3)  }
 0x5d6   : > { %v7184_v58 = vcombine.low %v5886_v3, %v5886_v3  ;;  %v7185_v44 = vcombine.high %v5886_v3, %v5886_v3  ;;  %v7216_v36 = vcombine.low %v5892_v26, %v5892_v26  ;;  %v7217_v32 = vcombine.high %v5892_v26, %v5892_v26  ;;  %6109 = vst.msk [vmem:[%s8768_s25 + $0x30] sm:$0xf] %vm3696_vm0, %v7168_v50  ;;  %v6227_v3 = vld [vmem:[%s8684_s29 + $0x18] sm:$0xff] (%p10059_p3)   ;;  %v6231_v26 = vld [vmem:[%s8684_s29 + $0x20] sm:$0xff] (%p10059_p3)   ;;  %v6235_v50 = vld [vmem:[%s8684_s29 + $0x28] sm:$0xff] (%p10059_p3)  }
 0x5d7   : > { %6110 = vst.msk [vmem:[%s8768_s25 + $0x34] sm:$0xf] %vm3696_vm0, %v7169_v47  ;;  %6141 = vst.msk [vmem:[%s8768_s25 + $0xb0] sm:$0xf] %vm3696_vm0, %v7200_v35  ;;  %v4990_v19 = vcombine.high %v9753_v33, %v4972_v23  ;;  %v5716_v16 = vrot.slane %v5709_v21, %v8568_v11  ;;  %v5724_v4 = vrot.slane %v7152_v13, %v8568_v11  ;;  %v6219_v21 = vld [vmem:[%s8684_s29 + $0x8] sm:$0xff] (%p10059_p3)   ;;  %v6223_v13 = vld [vmem:[%s8684_s29 + $0x10] sm:$0xff] (%p10059_p3)  }
 0x5d8   : > { %6142 = vst.msk [vmem:[%s8768_s25 + $0xb4] sm:$0xf] %vm3696_vm0, %v7201_v49  ;;  %6125 = vst.msk [vmem:[%s8768_s25 + $0x70] sm:$0xf] %vm3696_vm0, %v7184_v58  ;;  %v5725_v29 = vcombine.low %v4931_v57, %v4938_v38  ;;  %v7153_v5 = vcombine.high %v4931_v57, %v4938_v38  ;;  %v4988_v41 = vrot.slane %v4974_v8, %v8572_v10  ;;  %v6239_v47 = vld [vmem:[%s8684_s29 + $0x30] sm:$0xff] (%p10059_p3)   ;;  %v6243_v35 = vld [vmem:[%s8684_s29 + $0x38] sm:$0xff] (%p10059_p3)  }
 0x5d9   : > { %6126 = vst.msk [vmem:[%s8768_s25 + $0x74] sm:$0xf] %vm3696_vm0, %v7185_v44  ;;  %6157 = vst.msk [vmem:[%s8768_s25 + $0xf0] sm:$0xf] %vm3696_vm0, %v7216_v36  ;;  %v4997_v45 = vrot.slane %v4989_v63, %v8572_v10  ;;  %v5004_v15 = vrot.slane %v4990_v19, %v8572_v10  ;;  %v5741_v6 = vcombine.low %v5716_v16, %v5724_v4  ;;  %v6247_v49 = vld [vmem:[%s8684_s29 + $0x40] sm:$0xff] (%p10059_p3)   ;;  %v6251_v23 = vld [vmem:[%s8684_s29 + $0x48] sm:$0xff] (%p10059_p3)  }
 0x5da   : > { %6158 = vst.msk [vmem:[%s8768_s25 + $0xf4] sm:$0xf] %vm3696_vm0, %v7217_v32  ;;  %v5732_v22 = vrot.slane %v5725_v29, %v8568_v11  ;;  %v5740_v31 = vrot.slane %v7153_v5, %v8568_v11  ;;  %v5759_v40 = vcombine.low %v4981_v14, %v4988_v41  ;;  %v7154_v43 = vcombine.high %v4981_v14, %v4988_v41  ;;  %v6259_v58 = vld [vmem:[%s8684_s29 + $0x58] sm:$0xff] (%p10059_p3)   ;;  %v6263_v44 = vld [vmem:[%s8684_s29 + $0x60] sm:$0xff] (%p10059_p3)   ;;  %v6267_v36 = vld [vmem:[%s8684_s29 + $0x68] sm:$0xff] (%p10059_p3)  }
 0x5db   : > { %v5775_v59 = vcombine.low %v4997_v45, %v5004_v15  ;;  %v7155_v30 = vcombine.high %v4997_v45, %v5004_v15  ;;  %v5748_v18 = vrot.slane %v5741_v6, %v8572_v10  ;;  %6220 = vst [vmem:[%s9843_s15 + $0x8] sm:$0xff] (%p10059_p3), %v6219_v21   ;;  %6224 = vst [vmem:[%s9843_s15 + $0x10] sm:$0xff] (%p10059_p3), %v6223_v13   ;;  %v6271_v32 = vld [vmem:[%s8684_s29 + $0x70] sm:$0xff] (%p10059_p3)   ;;  %v6275_v8 = vld [vmem:[%s8684_s29 + $0x78] sm:$0xff] (%p10059_p3)  }
 0x5dc   : > { %v5749_v33 = vcombine.low %v5732_v22, %v5740_v31  ;;  %v5766_v62 = vrot.slane %v5759_v40, %v8568_v11  ;;  %v5774_v46 = vrot.slane %v7154_v43, %v8568_v11  ;;  %6228 = vst [vmem:[%s9843_s15 + $0x18] sm:$0xff] (%p10059_p3), %v6227_v3   ;;  %6232 = vst [vmem:[%s9843_s15 + $0x20] sm:$0xff] (%p10059_p3), %v6231_v26   ;;  %v6279_v14 = vld [vmem:[%s8684_s29 + $0x80] sm:$0xff] (%p10059_p3)   ;;  %v6283_v63 = vld [vmem:[%s8684_s29 + $0x88] sm:$0xff] (%p10059_p3)  }
 0x5dd   : > { %v5782_v17 = vrot.slane %v5775_v59, %v8568_v11  ;;  %v5790_v7 = vrot.slane %v7155_v30, %v8568_v11  ;;  %6236 = vst [vmem:[%s9843_s15 + $0x28] sm:$0xff] (%p10059_p3), %v6235_v50   ;;  %6240 = vst [vmem:[%s9843_s15 + $0x30] sm:$0xff] (%p10059_p3), %v6239_v47   ;;  %v6287_v19 = vld [vmem:[%s8684_s29 + $0x90] sm:$0xff] (%p10059_p3)   ;;  %v6291_v16 = vld [vmem:[%s8684_s29 + $0x98] sm:$0xff] (%p10059_p3)  }
 0x5de   : > { %v5756_v24 = vrot.slane %v5749_v33, %v8572_v10  ;;  %v5791_v61 = vcombine.low %v5766_v62, %v5774_v46  ;;  %6244 = vst [vmem:[%s9843_s15 + $0x38] sm:$0xff] (%p10059_p3), %v6243_v35   ;;  %6248 = vst [vmem:[%s9843_s15 + $0x80] sm:$0xff] (%p10059_p3), %v6247_v49   ;;  %v6295_v4 = vld [vmem:[%s8684_s29 + $0xa0] sm:$0xff] (%p10059_p3)   ;;  %v6299_v29 = vld [vmem:[%s8684_s29 + $0xa8] sm:$0xff] (%p10059_p3)  }
 0x5df   : > { %v5799_v39 = vcombine.low %v5782_v17, %v5790_v7  ;;  %6252 = vst [vmem:[%s9843_s15 + $0x88] sm:$0xff] (%p10059_p3), %v6251_v23   ;;  %6256 = vst [vmem:[%s9843_s15 + $0x90] sm:$0xff] (%p10059_p3), %v6255_v28   ;;  %v6303_v5 = vld [vmem:[%s8684_s29 + $0xb0] sm:$0xff] (%p10059_p3)   ;;  %v6307_v41 = vld [vmem:[%s8684_s29 + $0xb8] sm:$0xff] (%p10059_p3)  }
 0x5e0   : > { %v5757_v55 = vcombine.low %v5748_v18, %v5756_v24  ;;  %v5758_v1 = vcombine.high %v5748_v18, %v5756_v24  ;;  %v5798_v34 = vrot.slane %v5791_v61, %v8572_v10  ;;  %6260 = vst [vmem:[%s9843_s15 + $0x98] sm:$0xff] (%p10059_p3), %v6259_v58   ;;  %6264 = vst [vmem:[%s9843_s15 + $0xa0] sm:$0xff] (%p10059_p3), %v6263_v44   ;;  %v6311_v45 = vld [vmem:[%s8684_s29 + $0xc0] sm:$0xff] (%p10059_p3)   ;;  %v6315_v15 = vld [vmem:[%s8684_s29 + $0xc8] sm:$0xff] (%p10059_p3)  }
 0x5e1   : > { %v5806_v37 = vrot.slane %v5799_v39, %v8572_v10  ;;  %6268 = vst [vmem:[%s9843_s15 + $0xa8] sm:$0xff] (%p10059_p3), %v6267_v36   ;;  %6272 = vst [vmem:[%s9843_s15 + $0xb0] sm:$0xff] (%p10059_p3), %v6271_v32   ;;  %v6319_v22 = vld [vmem:[%s8684_s29 + $0xd0] sm:$0xff] (%p10059_p3)   ;;  %v6323_v31 = vld [vmem:[%s8684_s29 + $0xd8] sm:$0xff] (%p10059_p3)  }
 0x5e2   : > { %v5896_v53 = vshrl.u32 %v5757_v55, 16  ;;  %v5902_v42 = vshrl.u32 %v5758_v1, 16  ;;  %6276 = vst [vmem:[%s9843_s15 + $0xb8] sm:$0xff] (%p10059_p3), %v6275_v8   ;;  %6280 = vst [vmem:[%s9843_s15 + $0x100] sm:$0xff] (%p10059_p3), %v6279_v14   ;;  %v6327_v6 = vld [vmem:[%s8684_s29 + $0xe0] sm:$0xff] (%p10059_p3)   ;;  %v6331_v40 = vld [vmem:[%s8684_s29 + $0xe8] sm:$0xff] (%p10059_p3)  }
 0x5e3   : > { %v5807_v48 = vcombine.low %v5798_v34, %v5806_v37  ;;  %v5808_v54 = vcombine.high %v5798_v34, %v5806_v37  ;;  %6284 = vst [vmem:[%s9843_s15 + $0x108] sm:$0xff] (%p10059_p3), %v6283_v63   ;;  %6288 = vst [vmem:[%s9843_s15 + $0x110] sm:$0xff] (%p10059_p3), %v6287_v19   ;;  %v6335_v43 = vld [vmem:[%s8684_s29 + $0xf0] sm:$0xff] (%p10059_p3)   ;;  %v6339_v59 = vld [vmem:[%s8684_s29 + $0xf8] sm:$0xff] (%p10059_p3)  }
 0x5e4   : > { %6292 = vst [vmem:[%s9843_s15 + $0x118] sm:$0xff] (%p10059_p3), %v6291_v16   ;;  %6296 = vst [vmem:[%s9843_s15 + $0x120] sm:$0xff] (%p10059_p3), %v6295_v4  }
 0x5e5   : > { %v5895_v20 = vpack.i.b16 %v5807_v48, %v5757_v55  ;;  %v5897_v11 = vshrl.u32 %v5807_v48, 16  ;;  %v5901_v60 = vpack.i.b16 %v5808_v54, %v5758_v1  ;;  %v5903_v0 = vshrl.u32 %v5808_v54, 16  ;;  %6300 = vst [vmem:[%s9843_s15 + $0x128] sm:$0xff] (%p10059_p3), %v6299_v29   ;;  %6304 = vst [vmem:[%s9843_s15 + $0x130] sm:$0xff] (%p10059_p3), %v6303_v5  }
 0x5e6   : > { %6308 = vst [vmem:[%s9843_s15 + $0x138] sm:$0xff] (%p10059_p3), %v6307_v41   ;;  %6312 = vst [vmem:[%s9843_s15 + $0x180] sm:$0xff] (%p10059_p3), %v6311_v45  }
 0x5e7   : > { %v5898_v56 = vpack.i.b16 %v5897_v11, %v5896_v53  ;;  %v5904_v27 = vpack.i.b16 %v5903_v0, %v5902_v42  ;;  %v7170_v57 = vcombine.low %v5895_v20, %v5895_v20  ;;  %v7171_v10 = vcombine.high %v5895_v20, %v5895_v20  ;;  %6194 = sbr.rel (!%p10059_p3) target bundleno = 1520 (0x5f0), region = 80  ;;  %6316 = vst [vmem:[%s9843_s15 + $0x188] sm:$0xff] (%p10059_p3), %v6315_v15  }
 0x5e8   : > { %v7202_v38 = vcombine.low %v5901_v60, %v5901_v60  ;;  %v7203_v25 = vcombine.high %v5901_v60, %v5901_v60  ;;  %6320 = vst [vmem:[%s9843_s15 + $0x190] sm:$0xff] (%p10059_p3), %v6319_v22   ;;  %6324 = vst [vmem:[%s9843_s15 + $0x198] sm:$0xff] (%p10059_p3), %v6323_v31  }
 0x5e9   : > { %v7186_v2 = vcombine.low %v5898_v56, %v5898_v56  ;;  %v7187_v9 = vcombine.high %v5898_v56, %v5898_v56  ;;  %v7218_v51 = vcombine.low %v5904_v27, %v5904_v27  ;;  %v7219_v12 = vcombine.high %v5904_v27, %v5904_v27  ;;  %6111 = vst.msk [vmem:[%s8768_s25 + $0x38] sm:$0xf] %vm3696_vm0, %v7170_v57 }
 0x5ea   : > { %6112 = vst.msk [vmem:[%s8768_s25 + $0x3c] sm:$0xf] %vm3696_vm0, %v7171_v10  ;;  %6143 = vst.msk [vmem:[%s8768_s25 + $0xb8] sm:$0xf] %vm3696_vm0, %v7202_v38 }
 0x5eb   : > { %6144 = vst.msk [vmem:[%s8768_s25 + $0xbc] sm:$0xf] %vm3696_vm0, %v7203_v25  ;;  %6127 = vst.msk [vmem:[%s8768_s25 + $0x78] sm:$0xf] %vm3696_vm0, %v7186_v2 }
 0x5ec   : > { %6128 = vst.msk [vmem:[%s8768_s25 + $0x7c] sm:$0xf] %vm3696_vm0, %v7187_v9  ;;  %6159 = vst.msk [vmem:[%s8768_s25 + $0xf8] sm:$0xf] %vm3696_vm0, %v7218_v51 }
 0x5ed   : > { %6160 = vst.msk [vmem:[%s8768_s25 + $0xfc] sm:$0xf] %vm3696_vm0, %v7219_v12  ;;  %6328 = vst [vmem:[%s9843_s15 + $0x1a0] sm:$0xff] (%p10059_p3), %v6327_v6  }
 0x5ee   : > { %6332 = vst [vmem:[%s9843_s15 + $0x1a8] sm:$0xff] %v6331_v40   ;;  %6336 = vst [vmem:[%s9843_s15 + $0x1b0] sm:$0xff] %v6335_v43  }
 0x5ef   : > { %6340 = vst [vmem:[%s9843_s15 + $0x1b8] sm:$0xff] %v6339_v59  }
 0x5f0 PF: > { %s10062_s10 = sld [smem:[#allocation20_spill]] }
 0x5f6   : > { %p10063_p3 = scmp.ne.s32.totalorder %s10062_s10, 0 }
 0x5f7   : > { %s7230_s29 = sshll.u32 (%p10063_p3), %s7780_s21, 7  ;;  %v6514_v30 = vld [vmem:[%s8768_s25] sm:$0xff] (%p10063_p3)   ;;  %v6518_v33 = vld [vmem:[%s8768_s25 + $0x8] sm:$0xff] (%p10063_p3)   ;;  %v6522_v62 = vld [vmem:[%s8768_s25 + $0x10] sm:$0xff] (%p10063_p3)   ;;  %s10064_s13 = sld [smem:[#allocation28_spill]] (%p10063_p3) }
 0x5f8   : > { %6493 = sbr.rel (!%p10063_p3) target bundleno = 1550 (0x60e), region = 121  ;;  %s6496_s6 = sadd.s32 (%p10063_p3), %s7230_s29, %s9331_s24  ;;  %v6526_v46 = vld [vmem:[%s8768_s25 + $0x18] sm:$0xff] (%p10063_p3)   ;;  %v6530_v17 = vld [vmem:[%s8768_s25 + $0x20] sm:$0xff] (%p10063_p3)   ;;  %v6534_v7 = vld [vmem:[%s8768_s25 + $0x28] sm:$0xff] (%p10063_p3)  }
 0x5f9   : > { %s7231_s9 = sshll.u32 (%p10063_p3), %s6496_s6, 2  ;;  %v6538_v18 = vld [vmem:[%s8768_s25 + $0x30] sm:$0xff] (%p10063_p3)   ;;  %v6542_v24 = vld [vmem:[%s8768_s25 + $0x38] sm:$0xff] (%p10063_p3)   ;;  %v6546_v61 = vld [vmem:[%s8768_s25 + $0x40] sm:$0xff] (%p10063_p3)  }
 0x5fa   : > { %v6550_v39 = vld [vmem:[%s8768_s25 + $0x48] sm:$0xff] (%p10063_p3)   ;;  %v6554_v55 = vld [vmem:[%s8768_s25 + $0x50] sm:$0xff] (%p10063_p3)   ;;  %v6558_v1 = vld [vmem:[%s8768_s25 + $0x58] sm:$0xff] (%p10063_p3)  }
 0x5fb   : > { %v6562_v34 = vld [vmem:[%s8768_s25 + $0x60] sm:$0xff] (%p10063_p3)   ;;  %v6566_v37 = vld [vmem:[%s8768_s25 + $0x68] sm:$0xff] (%p10063_p3)   ;;  %v6570_v48 = vld [vmem:[%s8768_s25 + $0x70] sm:$0xff] (%p10063_p3)  }
 0x5fc   : > { %v6574_v54 = vld [vmem:[%s8768_s25 + $0x78] sm:$0xff] (%p10063_p3)   ;;  %v6578_v53 = vld [vmem:[%s8768_s25 + $0x80] sm:$0xff] (%p10063_p3)   ;;  %v6582_v42 = vld [vmem:[%s8768_s25 + $0x88] sm:$0xff] (%p10063_p3)  }
 0x5fd   : > { %s9916_s26 = scalar_lea.vmem (%p10063_p3), %s10064_s13, %s7231_s9  ;;  %v6586_v20 = vld [vmem:[%s8768_s25 + $0x90] sm:$0xff] (%p10063_p3)   ;;  %v6590_v11 = vld [vmem:[%s8768_s25 + $0x98] sm:$0xff] (%p10063_p3)   ;;  %v6594_v60 = vld [vmem:[%s8768_s25 + $0xa0] sm:$0xff] (%p10063_p3)  }
 0x5fe   : > { %6515 = vst [vmem:[%s9916_s26] sm:$0xff] (%p10063_p3), %v6514_v30   ;;  %6519 = vst [vmem:[%s9916_s26 + $0x8] sm:$0xff] (%p10063_p3), %v6518_v33   ;;  %v6598_v0 = vld [vmem:[%s8768_s25 + $0xa8] sm:$0xff] (%p10063_p3)   ;;  %v6602_v56 = vld [vmem:[%s8768_s25 + $0xb0] sm:$0xff] (%p10063_p3)  }
 0x5ff   : > { %6523 = vst [vmem:[%s9916_s26 + $0x10] sm:$0xff] %v6522_v62   ;;  %6527 = vst [vmem:[%s9916_s26 + $0x18] sm:$0xff] %v6526_v46   ;;  %v6606_v27 = vld [vmem:[%s8768_s25 + $0xb8] sm:$0xff]   ;;  %v6610_v57 = vld [vmem:[%s8768_s25 + $0xc0] sm:$0xff]  }
 0x600   : > { %6531 = vst [vmem:[%s9916_s26 + $0x20] sm:$0xff] %v6530_v17   ;;  %6535 = vst [vmem:[%s9916_s26 + $0x28] sm:$0xff] %v6534_v7   ;;  %v6614_v10 = vld [vmem:[%s8768_s25 + $0xc8] sm:$0xff]   ;;  %v6618_v38 = vld [vmem:[%s8768_s25 + $0xd0] sm:$0xff]  }
 0x601   : > { %6539 = vst [vmem:[%s9916_s26 + $0x30] sm:$0xff] %v6538_v18   ;;  %6543 = vst [vmem:[%s9916_s26 + $0x38] sm:$0xff] %v6542_v24   ;;  %v6622_v25 = vld [vmem:[%s8768_s25 + $0xd8] sm:$0xff]   ;;  %v6626_v2 = vld [vmem:[%s8768_s25 + $0xe0] sm:$0xff]  }
 0x602   : > { %6547 = vst [vmem:[%s9916_s26 + $0x80] sm:$0xff] %v6546_v61   ;;  %6551 = vst [vmem:[%s9916_s26 + $0x88] sm:$0xff] %v6550_v39   ;;  %v6630_v9 = vld [vmem:[%s8768_s25 + $0xe8] sm:$0xff]   ;;  %v6634_v51 = vld [vmem:[%s8768_s25 + $0xf0] sm:$0xff]  }
 0x603   : > { %6555 = vst [vmem:[%s9916_s26 + $0x90] sm:$0xff] %v6554_v55   ;;  %6559 = vst [vmem:[%s9916_s26 + $0x98] sm:$0xff] %v6558_v1   ;;  %v6638_v12 = vld [vmem:[%s8768_s25 + $0xf8] sm:$0xff]  }
 0x604   : > { %6563 = vst [vmem:[%s9916_s26 + $0xa0] sm:$0xff] %v6562_v34   ;;  %6567 = vst [vmem:[%s9916_s26 + $0xa8] sm:$0xff] %v6566_v37  }
 0x605   : > { %6571 = vst [vmem:[%s9916_s26 + $0xb0] sm:$0xff] %v6570_v48   ;;  %6575 = vst [vmem:[%s9916_s26 + $0xb8] sm:$0xff] %v6574_v54  }
 0x606   : > { %6579 = vst [vmem:[%s9916_s26 + $0x100] sm:$0xff] %v6578_v53   ;;  %6583 = vst [vmem:[%s9916_s26 + $0x108] sm:$0xff] %v6582_v42  }
 0x607   : > { %6587 = vst [vmem:[%s9916_s26 + $0x110] sm:$0xff] %v6586_v20   ;;  %6591 = vst [vmem:[%s9916_s26 + $0x118] sm:$0xff] %v6590_v11  }
 0x608   : > { %6595 = vst [vmem:[%s9916_s26 + $0x120] sm:$0xff] %v6594_v60   ;;  %6599 = vst [vmem:[%s9916_s26 + $0x128] sm:$0xff] %v6598_v0  }
 0x609   : > { %6603 = vst [vmem:[%s9916_s26 + $0x130] sm:$0xff] %v6602_v56   ;;  %6607 = vst [vmem:[%s9916_s26 + $0x138] sm:$0xff] %v6606_v27  }
 0x60a   : > { %6611 = vst [vmem:[%s9916_s26 + $0x180] sm:$0xff] %v6610_v57   ;;  %6615 = vst [vmem:[%s9916_s26 + $0x188] sm:$0xff] %v6614_v10  }
 0x60b   : > { %6619 = vst [vmem:[%s9916_s26 + $0x190] sm:$0xff] %v6618_v38   ;;  %6623 = vst [vmem:[%s9916_s26 + $0x198] sm:$0xff] %v6622_v25  }
 0x60c   : > { %6627 = vst [vmem:[%s9916_s26 + $0x1a0] sm:$0xff] %v6626_v2   ;;  %6631 = vst [vmem:[%s9916_s26 + $0x1a8] sm:$0xff] %v6630_v9  }
 0x60d   : > { %6635 = vst [vmem:[%s9916_s26 + $0x1b0] sm:$0xff] %v6634_v51   ;;  %6639 = vst [vmem:[%s9916_s26 + $0x1b8] sm:$0xff] %v6638_v12  }
 0x60e PF: > { %s10065_s21 = sld [smem:[#allocation19_spill]]  ;;  %s10066_s24 = sld [smem:[#allocation17_spill]] }
 0x60f   : > { %s10067_s17 = sld [smem:[#allocation21_spill]] }
 0x614   : > { %p7435_p2 = scmp.ge.s32.totalorder %s10065_s21, 2  ;;  %s6798_s20 = sand.u32 1, %s10066_s24  }
 0x615   : > { %p10068_p1 = scmp.ne.s32.totalorder %s10067_s17, 0  ;;  %s6799_s28 = scalar_lea.sflag [#allocation4], %s6798_s20 }
 0x617   : > { %p7425_p6 = pnand %p7435_p2, %p10068_p1 }
 0x619   : > { %7759 = dma.done.wait (!%p7425_p6), %s6799_s28, 2048  }
 0x61a   : > { %7761 = vsyncadd (!%p7425_p6), %s6799_s28, 4294965248  ;;  %s30_s24 = sadd.s32 1, %s10065_s21   ;;  %s10069_s17 = smov %s7768_s18 }
 0x61b   : > { %p27_p10 = scmp.ge.s32.totalorder %s30_s24, 6   ;;  %s10070_s18 = smov %s7772_s19 }
 0x61c   : > { %s10071_s19 = smov %s8070_s16  ;;  %s10072_s20 = smov %s7784_s22 }
 0x61d   : > { %s10073_s21 = smov %s7788_s23  ;;  %s10074_s22 = smov %s10077_s12 }
 0x61e   : > { %s10075_s23 = smov %s10081_s2  ;;  %29 = sbr.rel (!%p27_p10) target bundleno = 17 (0x11), region = 225 }
 0x625   :  { %6818 = vsyncpa [#allocation3], 1 }
 0x626   :  { %6820 = vsyncpa [#allocation3 + $0x1], 1 }
 0x627   :  { %6821 = vsyncpa [#allocation6], 1 }
 0x628   :  { %6822 = vsyncpa [#allocation9], 1 }
 0x629   :  { %6823 = vsyncpa [#allocation4], 1 }
 0x62a   :  { %6825 = vsyncpa [#allocation4 + $0x1], 1 }

</bundles_post_ra>
